<compile_context>
chip_gen: v5e
topology: v5e:2x2
jax: 0.10.0
libtpu: 0.0.40
codegen_flags: <defaults>
</compile_context>

<pallas_src>
import math

import jax
import jax.numpy as jnp
from jax.experimental import pallas as pl
from jax.experimental.pallas import tpu as pltpu


def make_kernel(L, C, H, tb, eps=1e-5):
    H2, H4, H6, H8 = 2 * H, 4 * H, 6 * H, 8 * H

    def kernel(x_ref, fwd_ref, wih_ref, bih_ref, whh_ref, wp_ref, bp_ref,
               gam_ref, bet_ref, out_ref, xg_scr, h_scr):
        # x_ref / out_ref: (L, tb, C) — time-major once the leading dims are
        # collapsed (free: tb % 8 == 0 keeps sublane tiling intact).
        x2 = x_ref[...].reshape(L * tb, C)                       # (L*tb, C)

        # ---- hoisted input projection for BOTH directions (one MXU matmul).
        # Gate-paired column layout, each slice H wide:
        #   [ i_f i_b | f_f f_b | o_f o_b | g_f g_b ]
        xg_scr[...] = (jnp.dot(x2, wih_ref[...],
                               preferred_element_type=jnp.float32)
                       + bih_ref[...])                           # (L*tb, 8H)

        # Column ownership mask (fwd-direction columns), hoisted out of loop.
        fwd = jnp.broadcast_to(fwd_ref[...] > 0.5, (tb, H8))     # (tb, 8H) bool

        h = jnp.zeros((tb, H2), jnp.float32)                     # [h_fwd | h_bwd]
        c = jnp.zeros((tb, H2), jnp.float32)                     # [c_fwd | c_bwd]

        # ---- fused bidirectional recurrence, fully unrolled (static L) -----
        # One (tb, 2H) @ (2H, 8H) MXU matmul per step; forward direction walks
        # time s = 0..L-1 while backward walks tr = L-1..0 on the other half.
        for s in range(L):
            tr = L - 1 - s
            xg_f = xg_scr[pl.ds(s * tb, tb), :]                  # fwd-time rows
            xg_b = xg_scr[pl.ds(tr * tb, tb), :]                 # bwd-time rows
            gates = (jnp.where(fwd, xg_f, xg_b)
                     + jnp.dot(h, whh_ref[...],
                               preferred_element_type=jnp.float32))
            sg = jax.nn.sigmoid(gates[:, 0:H6])                  # i | f | o
            gg = jnp.tanh(gates[:, H6:H8])                       # g (both dirs)
            c = sg[:, H2:H4] * c + sg[:, 0:H2] * gg
            h = sg[:, H4:H6] * jnp.tanh(c)
            # time-correct writeback of the two direction halves
            h_scr[pl.ds(s * tb, tb), 0:H] = h[:, 0:H]            # fwd @ time s
            h_scr[pl.ds(tr * tb, tb), H:H2] = h[:, H:H2]         # bwd @ time tr

        # ---- fused proj(cat([h_fwd, h_bwd])) + LayerNorm + residual --------
        y = (jnp.dot(h_scr[...], wp_ref[...],
                     preferred_element_type=jnp.float32)
             + bp_ref[...])                                      # (L*tb, C)
        mu = jnp.mean(y, axis=-1, keepdims=True)
        var = jnp.mean(y * y, axis=-1, keepdims=True) - mu * mu  # one-pass stats
        y = (y - mu) * jax.lax.rsqrt(var + eps)
        y = y * gam_ref[...] + bet_ref[...]

        out_ref[...] = (x2 + y).reshape(L, tb, C)

    return kernel


def lstm_block_forward(chunk, params, hidden_size, tbk=None):
    """chunk: (N, L, K, C) float32 -> (N, K, L, C), matching the torch module."""
    N, L, K, C = chunk.shape
    H = hidden_size
    if tbk is None:
        tbk = K                      # whole-K batch tile per grid step
    assert K % tbk == 0 and (tbk == K or tbk % 8 == 0)

    # 1.0 on forward-direction gate columns, 0.0 on backward-direction ones.
    col = jnp.arange(8 * H, dtype=jnp.int32)
    fwd_mask = ((col % (2 * H)) < H).astype(jnp.float32)[None, :]   # (1, 8H)

    kernel = make_kernel(L, C, H, tbk)

    def rep(a):
        nd = a.ndim
        return pl.BlockSpec(a.shape, lambda n, k, _nd=nd: (0,) * _nd)

    wih, bih, whh = params["wih_cat"], params["b_cat"], params["whh_cat"]
    wp, bp = params["wproj_t"], params["bproj"]
    gam, bet = params["gamma"], params["beta"]

    out_nlkc = pl.pallas_call(
        kernel,
        out_shape=jax.ShapeDtypeStruct((N, L, K, C), jnp.float32),
        grid_spec=pltpu.PrefetchScalarGridSpec(
            num_scalar_prefetch=0,
            grid=(N, K // tbk),
            in_specs=[
                # chunk consumed in native (N, L, K, C) layout — no XLA transposes
                pl.BlockSpec((None, L, tbk, C), lambda n, k: (n, 0, k, 0)),
                rep(fwd_mask),
                rep(wih), rep(bih), rep(whh),
                rep(wp), rep(bp), rep(gam), rep(bet),
            ],
            out_specs=pl.BlockSpec((None, L, tbk, C), lambda n, k: (n, 0, k, 0)),
            scratch_shapes=[
                pltpu.VMEM((L * tbk, 8 * H), jnp.float32),   # hoisted input gates
                pltpu.VMEM((L * tbk, 2 * H), jnp.float32),   # [h_fwd | h_bwd]
            ],
        ),
        compiler_params=pltpu.CompilerParams(
            dimension_semantics=("parallel", "parallel")),
    )(chunk.astype(jnp.float32), fwd_mask, wih, bih, whh, wp, bp, gam, bet)

    # (N, L, K, C) -> (N, K, L, C): the module's output layout (single XLA pass).
    return jnp.transpose(out_nlkc, (0, 2, 1, 3))


# ---------------------------------------------------------------------------
# Parameter packing (gate-paired column layout) and deterministic init
# ---------------------------------------------------------------------------
def _split_gates(w, H):
    # torch gate order [i, f, g, o] along the last axis of a (*, 4H) matrix
    return w[:, 0:H], w[:, H:2 * H], w[:, 2 * H:3 * H], w[:, 3 * H:4 * H]


def _pack_gate_cols(wf, wb, H):
    i_f, f_f, g_f, o_f = _split_gates(wf, H)
    i_b, f_b, g_b, o_b = _split_gates(wb, H)
    # column layout: [ i_f i_b | f_f f_b | o_f o_b | g_f g_b ]
    return jnp.concatenate([i_f, i_b, f_f, f_b, o_f, o_b, g_f, g_b], axis=1)


def init_params(key, C, H):
    ks = jax.random.split(key, 10)
    kl = 1.0 / math.sqrt(H)

    def u(kk, shape, bound):
        return jax.random.uniform(kk, shape, jnp.float32, -bound, bound)

    W_ih_f = u(ks[0], (4 * H, C), kl)
    W_hh_f = u(ks[1], (4 * H, H), kl)
    b_ih_f = u(ks[2], (4 * H,), kl)
    b_hh_f = u(ks[3], (4 * H,), kl)
    W_ih_b = u(ks[4], (4 * H, C), kl)
    W_hh_b = u(ks[5], (4 * H, H), kl)
    b_ih_b = u(ks[6], (4 * H,), kl)
    b_hh_b = u(ks[7], (4 * H,), kl)
    kp = 1.0 / math.sqrt(2 * H)
    W_proj = u(ks[8], (C, 2 * H), kp)
    b_proj = u(ks[9], (C,), kp)
    gamma = jnp.ones((C,), jnp.float32)
    beta = jnp.zeros((C,), jnp.float32)

    zeros_h = jnp.zeros((H, 4 * H), jnp.float32)
    kernel_params = dict(
        # input projection, both directions, gate-paired columns: (C, 8H)
        wih_cat=_pack_gate_cols(W_ih_f.T, W_ih_b.T, H),
        # folded biases b_ih + b_hh, same column layout: (1, 8H)
        b_cat=_pack_gate_cols((b_ih_f + b_hh_f)[None, :],
                              (b_ih_b + b_hh_b)[None, :], H),
        # block-diagonal recurrent weights: rows 0:H <- h_fwd, H:2H <- h_bwd
        whh_cat=jnp.concatenate([_pack_gate_cols(W_hh_f.T, zeros_h, H),
                                 _pack_gate_cols(zeros_h, W_hh_b.T, H)],
                                axis=0),                          # (2H, 8H)
        wproj_t=W_proj.T, bproj=b_proj[None, :],
        gamma=gamma[None, :], beta=beta[None, :],
    )
    ref_params = dict(
        W_ih_f=W_ih_f, W_hh_f=W_hh_f, b_f=b_ih_f + b_hh_f,
        W_ih_b=W_ih_b, W_hh_b=W_hh_b, b_b=b_ih_b + b_hh_b,
        W_proj=W_proj, b_proj=b_proj, gamma=gamma, beta=beta,
    )
    return kernel_params, ref_params


# ---------------------------------------------------------------------------
# Pure-JAX reference (semantics of the torch module) for validation
# ---------------------------------------------------------------------------
def _lstm_dir_ref(x, W_ih, W_hh, b, reverse):
    B, L, _ = x.shape
    H = W_hh.shape[1]
    xs = jnp.swapaxes(x, 0, 1)
    if reverse:
        xs = xs[::-1]

    def step(carry, xt):
        h, c = carry
        gates = xt @ W_ih.T + h @ W_hh.T + b
        i, f, g, o = jnp.split(gates, 4, axis=-1)
        c = jax.nn.sigmoid(f) * c + jax.nn.sigmoid(i) * jnp.tanh(g)
        h = jax.nn.sigmoid(o) * jnp.tanh(c)
        return (h, c), h

    init = (jnp.zeros((B, H), jnp.float32), jnp.zeros((B, H), jnp.float32))
    _, hs = jax.lax.scan(step, init, xs)
    if reverse:
        hs = hs[::-1]
    return jnp.swapaxes(hs, 0, 1)


def ref_forward(chunk, rp):
    N, L, K, C = chunk.shape
    x = jnp.transpose(chunk, (0, 2, 1, 3)).reshape(N * K, L, C)
    hf = _lstm_dir_ref(x, rp["W_ih_f"], rp["W_hh_f"], rp["b_f"], False)
    hb = _lstm_dir_ref(x, rp["W_ih_b"], rp["W_hh_b"], rp["b_b"], True)
    h = jnp.concatenate([hf, hb], axis=-1)
    y = h @ rp["W_proj"].T + rp["b_proj"]
    mu = y.mean(-1, keepdims=True)
    var = ((y - mu) ** 2).mean(-1, keepdims=True)
    y = (y - mu) / jnp.sqrt(var + 1e-5) * rp["gamma"] + rp["beta"]
    return (x + y).reshape(N, K, L, C)


if __name__ == "__main__":
    N, L, K, C, H = 2, 8, 16, 16, 32   # chunk: N x L x K x C, hidden=32, bidir
    key = jax.random.PRNGKey(0)
    k_x, k_p = jax.random.split(key)
    chunk = jax.random.normal(k_x, (N, L, K, C), jnp.float32)
    kernel_params, ref_params = init_params(k_p, C, H)

    out = lstm_block_forward(chunk, kernel_params, H)
    out = jax.block_until_ready(out)

    ref = ref_forward(chunk, ref_params)
    assert out.shape == (N, K, L, C), out.shape
    if not bool(jnp.allclose(out, ref, atol=2e-3, rtol=2e-3)):
        raise AssertionError(
            f"mismatch vs reference: max abs err = {jnp.max(jnp.abs(out - ref))}")
    print("KERNEL_OK")
</pallas_src>

<mosaic_0001>
module attributes {stable_mosaic.version = 11 : i64} {
  func.func @kernel(%arg0: i32, %arg1: i32, %arg2: memref<1x8x16x16xf32, #tpu.memory_space<vmem>>, %arg3: memref<1x256xf32, #tpu.memory_space<vmem>>, %arg4: memref<16x256xf32, #tpu.memory_space<vmem>>, %arg5: memref<1x256xf32, #tpu.memory_space<vmem>>, %arg6: memref<64x256xf32, #tpu.memory_space<vmem>>, %arg7: memref<64x16xf32, #tpu.memory_space<vmem>>, %arg8: memref<1x16xf32, #tpu.memory_space<vmem>>, %arg9: memref<1x16xf32, #tpu.memory_space<vmem>>, %arg10: memref<1x16xf32, #tpu.memory_space<vmem>>, %arg11: memref<1x8x16x16xf32, #tpu.memory_space<vmem>>, %arg12: memref<128x256xf32, #tpu.memory_space<vmem>>, %arg13: memref<128x64xf32, #tpu.memory_space<vmem>>) attributes {dimension_semantics = [#tpu.dimension_semantics<parallel>, #tpu.dimension_semantics<parallel>], iteration_bounds = array<i64: 2, 1>, scalar_prefetch = 0 : i64, scratch_operands = 2 : i64, tpu.core_type = #tpu.core_type<tc>, window_params = [{transform_indices = @transform_0, window_bounds = array<i64: 1, 8, 16, 16>}, {pipeline_mode = #tpu.pipeline_mode<synchronous>, transform_indices = @transform_1, window_bounds = array<i64: 1, 256>}, {pipeline_mode = #tpu.pipeline_mode<synchronous>, transform_indices = @transform_2, window_bounds = array<i64: 16, 256>}, {pipeline_mode = #tpu.pipeline_mode<synchronous>, transform_indices = @transform_3, window_bounds = array<i64: 1, 256>}, {pipeline_mode = #tpu.pipeline_mode<synchronous>, transform_indices = @transform_4, window_bounds = array<i64: 64, 256>}, {pipeline_mode = #tpu.pipeline_mode<synchronous>, transform_indices = @transform_5, window_bounds = array<i64: 64, 16>}, {pipeline_mode = #tpu.pipeline_mode<synchronous>, transform_indices = @transform_6, window_bounds = array<i64: 1, 16>}, {pipeline_mode = #tpu.pipeline_mode<synchronous>, transform_indices = @transform_7, window_bounds = array<i64: 1, 16>}, {pipeline_mode = #tpu.pipeline_mode<synchronous>, transform_indices = @transform_8, window_bounds = array<i64: 1, 16>}, {transform_indices = @transform_9, window_bounds = array<i64: 1, 8, 16, 16>}]} {
    %c0 = arith.constant 0 : index
    %c0_0 = arith.constant 0 : index
    %c0_1 = arith.constant 0 : index
    %c0_2 = arith.constant 0 : index
    %0 = vector.load %arg2[%c0, %c0_0, %c0_1, %c0_2] : memref<1x8x16x16xf32, #tpu.memory_space<vmem>>, vector<1x8x16x16xf32>
    %1 = vector.shape_cast %0 : vector<1x8x16x16xf32> to vector<8x16x16xf32>
    %2 = vector.shape_cast %1 : vector<8x16x16xf32> to vector<128x16xf32>
    %c0_3 = arith.constant 0 : index
    %c0_4 = arith.constant 0 : index
    %3 = vector.load %arg4[%c0_3, %c0_4] : memref<16x256xf32, #tpu.memory_space<vmem>>, vector<16x256xf32>
    %cst = arith.constant dense<0.000000e+00> : vector<128x256xf32>
    %4 = tpu.matmul %2, %3, %cst {dimension_numbers = #tpu.dot_dimension_numbers<[1], [0], [0], [1], [0, 0, 1, 1], [], []>} : vector<128x16xf32>, vector<16x256xf32>, vector<128x256xf32> -> vector<128x256xf32>
    %c0_5 = arith.constant 0 : index
    %c0_6 = arith.constant 0 : index
    %5 = vector.load %arg5[%c0_5, %c0_6] : memref<1x256xf32, #tpu.memory_space<vmem>>, vector<1x256xf32>
    %6 = vector.broadcast %5 : vector<1x256xf32> to vector<128x256xf32>
    %7 = arith.addf %4, %6 : vector<128x256xf32>
    %c0_7 = arith.constant 0 : index
    %c0_8 = arith.constant 0 : index
    %8 = vector.load %arg12[%c0_7, %c0_8] : memref<128x256xf32, #tpu.memory_space<vmem>>, vector<128x256xf32>
    tpu.vector_store %arg12[%c0_7, %c0_8], %7 {strides = array<i32>} : memref<128x256xf32, #tpu.memory_space<vmem>>, vector<128x256xf32>,
    %c0_9 = arith.constant 0 : index
    %c0_10 = arith.constant 0 : index
    %9 = vector.load %arg3[%c0_9, %c0_10] : memref<1x256xf32, #tpu.memory_space<vmem>>, vector<1x256xf32>
    %cst_11 = arith.constant 5.000000e-01 : f32
    %10 = vector.broadcast %cst_11 : f32 to vector<1x256xf32>
    %11 = arith.cmpf ogt, %9, %10 : vector<1x256xf32>
    %12 = vector.shape_cast %11 : vector<1x256xi1> to vector<1x256xi1>
    %13 = vector.broadcast %12 : vector<1x256xi1> to vector<16x256xi1>
    %cst_12 = arith.constant 0.000000e+00 : f32
    %14 = vector.broadcast %cst_12 : f32 to vector<16x64xf32>
    %cst_13 = arith.constant 0.000000e+00 : f32
    %15 = vector.broadcast %cst_13 : f32 to vector<16x64xf32>
    %c0_14 = arith.constant 0 : index
    %c0_15 = arith.constant 0 : index
    %16 = vector.load %arg12[%c0_14, %c0_15] : memref<128x256xf32, #tpu.memory_space<vmem>>, vector<16x256xf32>
    %c112 = arith.constant 112 : index
    %c0_16 = arith.constant 0 : index
    %17 = vector.load %arg12[%c112, %c0_16] : memref<128x256xf32, #tpu.memory_space<vmem>>, vector<16x256xf32>
    %18 = arith.select %13, %16, %17 : vector<16x256xi1>, vector<16x256xf32>
    %c0_17 = arith.constant 0 : index
    %c0_18 = arith.constant 0 : index
    %19 = vector.load %arg6[%c0_17, %c0_18] : memref<64x256xf32, #tpu.memory_space<vmem>>, vector<64x256xf32>
    %cst_19 = arith.constant dense<0.000000e+00> : vector<16x256xf32>
    %20 = tpu.matmul %14, %19, %cst_19 {dimension_numbers = #tpu.dot_dimension_numbers<[1], [0], [0], [1], [0, 0, 1, 1], [], []>} : vector<16x64xf32>, vector<64x256xf32>, vector<16x256xf32> -> vector<16x256xf32>
    %21 = arith.addf %18, %20 : vector<16x256xf32>
    %22 = vector.extract_strided_slice %21 {offsets = [0, 0], sizes = [16, 192], strides = [1, 1]} : vector<16x256xf32> to vector<16x192xf32>
    %23 = arith.negf %22 : vector<16x192xf32>
    %24 = math.exp %23 : vector<16x192xf32>
    %cst_20 = arith.constant 1.000000e+00 : f32
    %25 = vector.broadcast %cst_20 : f32 to vector<16x192xf32>
    %26 = arith.addf %25, %24 : vector<16x192xf32>
    %27 = arith.divf %25, %26 : vector<16x192xf32>
    %28 = vector.extract_strided_slice %21 {offsets = [0, 192], sizes = [16, 64], strides = [1, 1]} : vector<16x256xf32> to vector<16x64xf32>
    %29 = math.tanh %28 : vector<16x64xf32>
    %30 = vector.extract_strided_slice %27 {offsets = [0, 64], sizes = [16, 64], strides = [1, 1]} : vector<16x192xf32> to vector<16x64xf32>
    %31 = arith.mulf %30, %15 : vector<16x64xf32>
    %32 = vector.extract_strided_slice %27 {offsets = [0, 0], sizes = [16, 64], strides = [1, 1]} : vector<16x192xf32> to vector<16x64xf32>
    %33 = arith.mulf %32, %29 : vector<16x64xf32>
    %34 = arith.addf %31, %33 : vector<16x64xf32>
    %35 = vector.extract_strided_slice %27 {offsets = [0, 128], sizes = [16, 64], strides = [1, 1]} : vector<16x192xf32> to vector<16x64xf32>
    %36 = math.tanh %34 : vector<16x64xf32>
    %37 = arith.mulf %35, %36 : vector<16x64xf32>
    %38 = vector.extract_strided_slice %37 {offsets = [0, 0], sizes = [16, 32], strides = [1, 1]} : vector<16x64xf32> to vector<16x32xf32>
    %c0_21 = arith.constant 0 : index
    %c0_22 = arith.constant 0 : index
    %39 = vector.load %arg13[%c0_21, %c0_22] : memref<128x64xf32, #tpu.memory_space<vmem>>, vector<16x32xf32>
    tpu.vector_store %arg13[%c0_21, %c0_22], %38 {strides = array<i32>} : memref<128x64xf32, #tpu.memory_space<vmem>>, vector<16x32xf32>,
    %40 = vector.extract_strided_slice %37 {offsets = [0, 32], sizes = [16, 32], strides = [1, 1]} : vector<16x64xf32> to vector<16x32xf32>
    %c112_23 = arith.constant 112 : index
    %c32 = arith.constant 32 : index
    %41 = vector.load %arg13[%c112_23, %c32] : memref<128x64xf32, #tpu.memory_space<vmem>>, vector<16x32xf32>
    tpu.vector_store %arg13[%c112_23, %c32], %40 {strides = array<i32>} : memref<128x64xf32, #tpu.memory_space<vmem>>, vector<16x32xf32>,
    %c16 = arith.constant 16 : index
    %c0_24 = arith.constant 0 : index
    %42 = vector.load %arg12[%c16, %c0_24] : memref<128x256xf32, #tpu.memory_space<vmem>>, vector<16x256xf32>
    %c96 = arith.constant 96 : index
    %c0_25 = arith.constant 0 : index
    %43 = vector.load %arg12[%c96, %c0_25] : memref<128x256xf32, #tpu.memory_space<vmem>>, vector<16x256xf32>
    %44 = arith.select %13, %42, %43 : vector<16x256xi1>, vector<16x256xf32>
    %c0_26 = arith.constant 0 : index
    %c0_27 = arith.constant 0 : index
    %45 = vector.load %arg6[%c0_26, %c0_27] : memref<64x256xf32, #tpu.memory_space<vmem>>, vector<64x256xf32>
    %cst_28 = arith.constant dense<0.000000e+00> : vector<16x256xf32>
    %46 = tpu.matmul %37, %45, %cst_28 {dimension_numbers = #tpu.dot_dimension_numbers<[1], [0], [0], [1], [0, 0, 1, 1], [], []>} : vector<16x64xf32>, vector<64x256xf32>, vector<16x256xf32> -> vector<16x256xf32>
    %47 = arith.addf %44, %46 : vector<16x256xf32>
    %48 = vector.extract_strided_slice %47 {offsets = [0, 0], sizes = [16, 192], strides = [1, 1]} : vector<16x256xf32> to vector<16x192xf32>
    %49 = arith.negf %48 : vector<16x192xf32>
    %50 = math.exp %49 : vector<16x192xf32>
    %cst_29 = arith.constant 1.000000e+00 : f32
    %51 = vector.broadcast %cst_29 : f32 to vector<16x192xf32>
    %52 = arith.addf %51, %50 : vector<16x192xf32>
    %53 = arith.divf %51, %52 : vector<16x192xf32>
    %54 = vector.extract_strided_slice %47 {offsets = [0, 192], sizes = [16, 64], strides = [1, 1]} : vector<16x256xf32> to vector<16x64xf32>
    %55 = math.tanh %54 : vector<16x64xf32>
    %56 = vector.extract_strided_slice %53 {offsets = [0, 64], sizes = [16, 64], strides = [1, 1]} : vector<16x192xf32> to vector<16x64xf32>
    %57 = arith.mulf %56, %34 : vector<16x64xf32>
    %58 = vector.extract_strided_slice %53 {offsets = [0, 0], sizes = [16, 64], strides = [1, 1]} : vector<16x192xf32> to vector<16x64xf32>
    %59 = arith.mulf %58, %55 : vector<16x64xf32>
    %60 = arith.addf %57, %59 : vector<16x64xf32>
    %61 = vector.extract_strided_slice %53 {offsets = [0, 128], sizes = [16, 64], strides = [1, 1]} : vector<16x192xf32> to vector<16x64xf32>
    %62 = math.tanh %60 : vector<16x64xf32>
    %63 = arith.mulf %61, %62 : vector<16x64xf32>
    %64 = vector.extract_strided_slice %63 {offsets = [0, 0], sizes = [16, 32], strides = [1, 1]} : vector<16x64xf32> to vector<16x32xf32>
    %c16_30 = arith.constant 16 : index
    %c0_31 = arith.constant 0 : index
    %65 = vector.load %arg13[%c16_30, %c0_31] : memref<128x64xf32, #tpu.memory_space<vmem>>, vector<16x32xf32>
    tpu.vector_store %arg13[%c16_30, %c0_31], %64 {strides = array<i32>} : memref<128x64xf32, #tpu.memory_space<vmem>>, vector<16x32xf32>,
    %66 = vector.extract_strided_slice %63 {offsets = [0, 32], sizes = [16, 32], strides = [1, 1]} : vector<16x64xf32> to vector<16x32xf32>
    %c96_32 = arith.constant 96 : index
    %c32_33 = arith.constant 32 : index
    %67 = vector.load %arg13[%c96_32, %c32_33] : memref<128x64xf32, #tpu.memory_space<vmem>>, vector<16x32xf32>
    tpu.vector_store %arg13[%c96_32, %c32_33], %66 {strides = array<i32>} : memref<128x64xf32, #tpu.memory_space<vmem>>, vector<16x32xf32>,
    %c32_34 = arith.constant 32 : index
    %c0_35 = arith.constant 0 : index
    %68 = vector.load %arg12[%c32_34, %c0_35] : memref<128x256xf32, #tpu.memory_space<vmem>>, vector<16x256xf32>
    %c80 = arith.constant 80 : index
    %c0_36 = arith.constant 0 : index
    %69 = vector.load %arg12[%c80, %c0_36] : memref<128x256xf32, #tpu.memory_space<vmem>>, vector<16x256xf32>
    %70 = arith.select %13, %68, %69 : vector<16x256xi1>, vector<16x256xf32>
    %c0_37 = arith.constant 0 : index
    %c0_38 = arith.constant 0 : index
    %71 = vector.load %arg6[%c0_37, %c0_38] : memref<64x256xf32, #tpu.memory_space<vmem>>, vector<64x256xf32>
    %cst_39 = arith.constant dense<0.000000e+00> : vector<16x256xf32>
    %72 = tpu.matmul %63, %71, %cst_39 {dimension_numbers = #tpu.dot_dimension_numbers<[1], [0], [0], [1], [0, 0, 1, 1], [], []>} : vector<16x64xf32>, vector<64x256xf32>, vector<16x256xf32> -> vector<16x256xf32>
    %73 = arith.addf %70, %72 : vector<16x256xf32>
    %74 = vector.extract_strided_slice %73 {offsets = [0, 0], sizes = [16, 192], strides = [1, 1]} : vector<16x256xf32> to vector<16x192xf32>
    %75 = arith.negf %74 : vector<16x192xf32>
    %76 = math.exp %75 : vector<16x192xf32>
    %cst_40 = arith.constant 1.000000e+00 : f32
    %77 = vector.broadcast %cst_40 : f32 to vector<16x192xf32>
    %78 = arith.addf %77, %76 : vector<16x192xf32>
    %79 = arith.divf %77, %78 : vector<16x192xf32>
    %80 = vector.extract_strided_slice %73 {offsets = [0, 192], sizes = [16, 64], strides = [1, 1]} : vector<16x256xf32> to vector<16x64xf32>
    %81 = math.tanh %80 : vector<16x64xf32>
    %82 = vector.extract_strided_slice %79 {offsets = [0, 64], sizes = [16, 64], strides = [1, 1]} : vector<16x192xf32> to vector<16x64xf32>
    %83 = arith.mulf %82, %60 : vector<16x64xf32>
    %84 = vector.extract_strided_slice %79 {offsets = [0, 0], sizes = [16, 64], strides = [1, 1]} : vector<16x192xf32> to vector<16x64xf32>
    %85 = arith.mulf %84, %81 : vector<16x64xf32>
    %86 = arith.addf %83, %85 : vector<16x64xf32>
    %87 = vector.extract_strided_slice %79 {offsets = [0, 128], sizes = [16, 64], strides = [1, 1]} : vector<16x192xf32> to vector<16x64xf32>
    %88 = math.tanh %86 : vector<16x64xf32>
    %89 = arith.mulf %87, %88 : vector<16x64xf32>
    %90 = vector.extract_strided_slice %89 {offsets = [0, 0], sizes = [16, 32], strides = [1, 1]} : vector<16x64xf32> to vector<16x32xf32>
    %c32_41 = arith.constant 32 : index
    %c0_42 = arith.constant 0 : index
    %91 = vector.load %arg13[%c32_41, %c0_42] : memref<128x64xf32, #tpu.memory_space<vmem>>, vector<16x32xf32>
    tpu.vector_store %arg13[%c32_41, %c0_42], %90 {strides = array<i32>} : memref<128x64xf32, #tpu.memory_space<vmem>>, vector<16x32xf32>,
    %92 = vector.extract_strided_slice %89 {offsets = [0, 32], sizes = [16, 32], strides = [1, 1]} : vector<16x64xf32> to vector<16x32xf32>
    %c80_43 = arith.constant 80 : index
    %c32_44 = arith.constant 32 : index
    %93 = vector.load %arg13[%c80_43, %c32_44] : memref<128x64xf32, #tpu.memory_space<vmem>>, vector<16x32xf32>
    tpu.vector_store %arg13[%c80_43, %c32_44], %92 {strides = array<i32>} : memref<128x64xf32, #tpu.memory_space<vmem>>, vector<16x32xf32>,
    %c48 = arith.constant 48 : index
    %c0_45 = arith.constant 0 : index
    %94 = vector.load %arg12[%c48, %c0_45] : memref<128x256xf32, #tpu.memory_space<vmem>>, vector<16x256xf32>
    %c64 = arith.constant 64 : index
    %c0_46 = arith.constant 0 : index
    %95 = vector.load %arg12[%c64, %c0_46] : memref<128x256xf32, #tpu.memory_space<vmem>>, vector<16x256xf32>
    %96 = arith.select %13, %94, %95 : vector<16x256xi1>, vector<16x256xf32>
    %c0_47 = arith.constant 0 : index
    %c0_48 = arith.constant 0 : index
    %97 = vector.load %arg6[%c0_47, %c0_48] : memref<64x256xf32, #tpu.memory_space<vmem>>, vector<64x256xf32>
    %cst_49 = arith.constant dense<0.000000e+00> : vector<16x256xf32>
    %98 = tpu.matmul %89, %97, %cst_49 {dimension_numbers = #tpu.dot_dimension_numbers<[1], [0], [0], [1], [0, 0, 1, 1], [], []>} : vector<16x64xf32>, vector<64x256xf32>, vector<16x256xf32> -> vector<16x256xf32>
    %99 = arith.addf %96, %98 : vector<16x256xf32>
    %100 = vector.extract_strided_slice %99 {offsets = [0, 0], sizes = [16, 192], strides = [1, 1]} : vector<16x256xf32> to vector<16x192xf32>
    %101 = arith.negf %100 : vector<16x192xf32>
    %102 = math.exp %101 : vector<16x192xf32>
    %cst_50 = arith.constant 1.000000e+00 : f32
    %103 = vector.broadcast %cst_50 : f32 to vector<16x192xf32>
    %104 = arith.addf %103, %102 : vector<16x192xf32>
    %105 = arith.divf %103, %104 : vector<16x192xf32>
    %106 = vector.extract_strided_slice %99 {offsets = [0, 192], sizes = [16, 64], strides = [1, 1]} : vector<16x256xf32> to vector<16x64xf32>
    %107 = math.tanh %106 : vector<16x64xf32>
    %108 = vector.extract_strided_slice %105 {offsets = [0, 64], sizes = [16, 64], strides = [1, 1]} : vector<16x192xf32> to vector<16x64xf32>
    %109 = arith.mulf %108, %86 : vector<16x64xf32>
    %110 = vector.extract_strided_slice %105 {offsets = [0, 0], sizes = [16, 64], strides = [1, 1]} : vector<16x192xf32> to vector<16x64xf32>
    %111 = arith.mulf %110, %107 : vector<16x64xf32>
    %112 = arith.addf %109, %111 : vector<16x64xf32>
    %113 = vector.extract_strided_slice %105 {offsets = [0, 128], sizes = [16, 64], strides = [1, 1]} : vector<16x192xf32> to vector<16x64xf32>
    %114 = math.tanh %112 : vector<16x64xf32>
    %115 = arith.mulf %113, %114 : vector<16x64xf32>
    %116 = vector.extract_strided_slice %115 {offsets = [0, 0], sizes = [16, 32], strides = [1, 1]} : vector<16x64xf32> to vector<16x32xf32>
    %c48_51 = arith.constant 48 : index
    %c0_52 = arith.constant 0 : index
    %117 = vector.load %arg13[%c48_51, %c0_52] : memref<128x64xf32, #tpu.memory_space<vmem>>, vector<16x32xf32>
    tpu.vector_store %arg13[%c48_51, %c0_52], %116 {strides = array<i32>} : memref<128x64xf32, #tpu.memory_space<vmem>>, vector<16x32xf32>,
    %118 = vector.extract_strided_slice %115 {offsets = [0, 32], sizes = [16, 32], strides = [1, 1]} : vector<16x64xf32> to vector<16x32xf32>
    %c64_53 = arith.constant 64 : index
    %c32_54 = arith.constant 32 : index
    %119 = vector.load %arg13[%c64_53, %c32_54] : memref<128x64xf32, #tpu.memory_space<vmem>>, vector<16x32xf32>
    tpu.vector_store %arg13[%c64_53, %c32_54], %118 {strides = array<i32>} : memref<128x64xf32, #tpu.memory_space<vmem>>, vector<16x32xf32>,
    %c64_55 = arith.constant 64 : index
    %c0_56 = arith.constant 0 : index
    %120 = vector.load %arg12[%c64_55, %c0_56] : memref<128x256xf32, #tpu.memory_space<vmem>>, vector<16x256xf32>
    %c48_57 = arith.constant 48 : index
    %c0_58 = arith.constant 0 : index
    %121 = vector.load %arg12[%c48_57, %c0_58] : memref<128x256xf32, #tpu.memory_space<vmem>>, vector<16x256xf32>
    %122 = arith.select %13, %120, %121 : vector<16x256xi1>, vector<16x256xf32>
    %c0_59 = arith.constant 0 : index
    %c0_60 = arith.constant 0 : index
    %123 = vector.load %arg6[%c0_59, %c0_60] : memref<64x256xf32, #tpu.memory_space<vmem>>, vector<64x256xf32>
    %cst_61 = arith.constant dense<0.000000e+00> : vector<16x256xf32>
    %124 = tpu.matmul %115, %123, %cst_61 {dimension_numbers = #tpu.dot_dimension_numbers<[1], [0], [0], [1], [0, 0, 1, 1], [], []>} : vector<16x64xf32>, vector<64x256xf32>, vector<16x256xf32> -> vector<16x256xf32>
    %125 = arith.addf %122, %124 : vector<16x256xf32>
    %126 = vector.extract_strided_slice %125 {offsets = [0, 0], sizes = [16, 192], strides = [1, 1]} : vector<16x256xf32> to vector<16x192xf32>
    %127 = arith.negf %126 : vector<16x192xf32>
    %128 = math.exp %127 : vector<16x192xf32>
    %cst_62 = arith.constant 1.000000e+00 : f32
    %129 = vector.broadcast %cst_62 : f32 to vector<16x192xf32>
    %130 = arith.addf %129, %128 : vector<16x192xf32>
    %131 = arith.divf %129, %130 : vector<16x192xf32>
    %132 = vector.extract_strided_slice %125 {offsets = [0, 192], sizes = [16, 64], strides = [1, 1]} : vector<16x256xf32> to vector<16x64xf32>
    %133 = math.tanh %132 : vector<16x64xf32>
    %134 = vector.extract_strided_slice %131 {offsets = [0, 64], sizes = [16, 64], strides = [1, 1]} : vector<16x192xf32> to vector<16x64xf32>
    %135 = arith.mulf %134, %112 : vector<16x64xf32>
    %136 = vector.extract_strided_slice %131 {offsets = [0, 0], sizes = [16, 64], strides = [1, 1]} : vector<16x192xf32> to vector<16x64xf32>
    %137 = arith.mulf %136, %133 : vector<16x64xf32>
    %138 = arith.addf %135, %137 : vector<16x64xf32>
    %139 = vector.extract_strided_slice %131 {offsets = [0, 128], sizes = [16, 64], strides = [1, 1]} : vector<16x192xf32> to vector<16x64xf32>
    %140 = math.tanh %138 : vector<16x64xf32>
    %141 = arith.mulf %139, %140 : vector<16x64xf32>
    %142 = vector.extract_strided_slice %141 {offsets = [0, 0], sizes = [16, 32], strides = [1, 1]} : vector<16x64xf32> to vector<16x32xf32>
    %c64_63 = arith.constant 64 : index
    %c0_64 = arith.constant 0 : index
    %143 = vector.load %arg13[%c64_63, %c0_64] : memref<128x64xf32, #tpu.memory_space<vmem>>, vector<16x32xf32>
    tpu.vector_store %arg13[%c64_63, %c0_64], %142 {strides = array<i32>} : memref<128x64xf32, #tpu.memory_space<vmem>>, vector<16x32xf32>,
    %144 = vector.extract_strided_slice %141 {offsets = [0, 32], sizes = [16, 32], strides = [1, 1]} : vector<16x64xf32> to vector<16x32xf32>
    %c48_65 = arith.constant 48 : index
    %c32_66 = arith.constant 32 : index
    %145 = vector.load %arg13[%c48_65, %c32_66] : memref<128x64xf32, #tpu.memory_space<vmem>>, vector<16x32xf32>
    tpu.vector_store %arg13[%c48_65, %c32_66], %144 {strides = array<i32>} : memref<128x64xf32, #tpu.memory_space<vmem>>, vector<16x32xf32>,
    %c80_67 = arith.constant 80 : index
    %c0_68 = arith.constant 0 : index
    %146 = vector.load %arg12[%c80_67, %c0_68] : memref<128x256xf32, #tpu.memory_space<vmem>>, vector<16x256xf32>
    %c32_69 = arith.constant 32 : index
    %c0_70 = arith.constant 0 : index
    %147 = vector.load %arg12[%c32_69, %c0_70] : memref<128x256xf32, #tpu.memory_space<vmem>>, vector<16x256xf32>
    %148 = arith.select %13, %146, %147 : vector<16x256xi1>, vector<16x256xf32>
    %c0_71 = arith.constant 0 : index
    %c0_72 = arith.constant 0 : index
    %149 = vector.load %arg6[%c0_71, %c0_72] : memref<64x256xf32, #tpu.memory_space<vmem>>, vector<64x256xf32>
    %cst_73 = arith.constant dense<0.000000e+00> : vector<16x256xf32>
    %150 = tpu.matmul %141, %149, %cst_73 {dimension_numbers = #tpu.dot_dimension_numbers<[1], [0], [0], [1], [0, 0, 1, 1], [], []>} : vector<16x64xf32>, vector<64x256xf32>, vector<16x256xf32> -> vector<16x256xf32>
    %151 = arith.addf %148, %150 : vector<16x256xf32>
    %152 = vector.extract_strided_slice %151 {offsets = [0, 0], sizes = [16, 192], strides = [1, 1]} : vector<16x256xf32> to vector<16x192xf32>
    %153 = arith.negf %152 : vector<16x192xf32>
    %154 = math.exp %153 : vector<16x192xf32>
    %cst_74 = arith.constant 1.000000e+00 : f32
    %155 = vector.broadcast %cst_74 : f32 to vector<16x192xf32>
    %156 = arith.addf %155, %154 : vector<16x192xf32>
    %157 = arith.divf %155, %156 : vector<16x192xf32>
    %158 = vector.extract_strided_slice %151 {offsets = [0, 192], sizes = [16, 64], strides = [1, 1]} : vector<16x256xf32> to vector<16x64xf32>
    %159 = math.tanh %158 : vector<16x64xf32>
    %160 = vector.extract_strided_slice %157 {offsets = [0, 64], sizes = [16, 64], strides = [1, 1]} : vector<16x192xf32> to vector<16x64xf32>
    %161 = arith.mulf %160, %138 : vector<16x64xf32>
    %162 = vector.extract_strided_slice %157 {offsets = [0, 0], sizes = [16, 64], strides = [1, 1]} : vector<16x192xf32> to vector<16x64xf32>
    %163 = arith.mulf %162, %159 : vector<16x64xf32>
    %164 = arith.addf %161, %163 : vector<16x64xf32>
    %165 = vector.extract_strided_slice %157 {offsets = [0, 128], sizes = [16, 64], strides = [1, 1]} : vector<16x192xf32> to vector<16x64xf32>
    %166 = math.tanh %164 : vector<16x64xf32>
    %167 = arith.mulf %165, %166 : vector<16x64xf32>
    %168 = vector.extract_strided_slice %167 {offsets = [0, 0], sizes = [16, 32], strides = [1, 1]} : vector<16x64xf32> to vector<16x32xf32>
    %c80_75 = arith.constant 80 : index
    %c0_76 = arith.constant 0 : index
    %169 = vector.load %arg13[%c80_75, %c0_76] : memref<128x64xf32, #tpu.memory_space<vmem>>, vector<16x32xf32>
    tpu.vector_store %arg13[%c80_75, %c0_76], %168 {strides = array<i32>} : memref<128x64xf32, #tpu.memory_space<vmem>>, vector<16x32xf32>,
    %170 = vector.extract_strided_slice %167 {offsets = [0, 32], sizes = [16, 32], strides = [1, 1]} : vector<16x64xf32> to vector<16x32xf32>
    %c32_77 = arith.constant 32 : index
    %c32_78 = arith.constant 32 : index
    %171 = vector.load %arg13[%c32_77, %c32_78] : memref<128x64xf32, #tpu.memory_space<vmem>>, vector<16x32xf32>
    tpu.vector_store %arg13[%c32_77, %c32_78], %170 {strides = array<i32>} : memref<128x64xf32, #tpu.memory_space<vmem>>, vector<16x32xf32>,
    %c96_79 = arith.constant 96 : index
    %c0_80 = arith.constant 0 : index
    %172 = vector.load %arg12[%c96_79, %c0_80] : memref<128x256xf32, #tpu.memory_space<vmem>>, vector<16x256xf32>
    %c16_81 = arith.constant 16 : index
    %c0_82 = arith.constant 0 : index
    %173 = vector.load %arg12[%c16_81, %c0_82] : memref<128x256xf32, #tpu.memory_space<vmem>>, vector<16x256xf32>
    %174 = arith.select %13, %172, %173 : vector<16x256xi1>, vector<16x256xf32>
    %c0_83 = arith.constant 0 : index
    %c0_84 = arith.constant 0 : index
    %175 = vector.load %arg6[%c0_83, %c0_84] : memref<64x256xf32, #tpu.memory_space<vmem>>, vector<64x256xf32>
    %cst_85 = arith.constant dense<0.000000e+00> : vector<16x256xf32>
    %176 = tpu.matmul %167, %175, %cst_85 {dimension_numbers = #tpu.dot_dimension_numbers<[1], [0], [0], [1], [0, 0, 1, 1], [], []>} : vector<16x64xf32>, vector<64x256xf32>, vector<16x256xf32> -> vector<16x256xf32>
    %177 = arith.addf %174, %176 : vector<16x256xf32>
    %178 = vector.extract_strided_slice %177 {offsets = [0, 0], sizes = [16, 192], strides = [1, 1]} : vector<16x256xf32> to vector<16x192xf32>
    %179 = arith.negf %178 : vector<16x192xf32>
    %180 = math.exp %179 : vector<16x192xf32>
    %cst_86 = arith.constant 1.000000e+00 : f32
    %181 = vector.broadcast %cst_86 : f32 to vector<16x192xf32>
    %182 = arith.addf %181, %180 : vector<16x192xf32>
    %183 = arith.divf %181, %182 : vector<16x192xf32>
    %184 = vector.extract_strided_slice %177 {offsets = [0, 192], sizes = [16, 64], strides = [1, 1]} : vector<16x256xf32> to vector<16x64xf32>
    %185 = math.tanh %184 : vector<16x64xf32>
    %186 = vector.extract_strided_slice %183 {offsets = [0, 64], sizes = [16, 64], strides = [1, 1]} : vector<16x192xf32> to vector<16x64xf32>
    %187 = arith.mulf %186, %164 : vector<16x64xf32>
    %188 = vector.extract_strided_slice %183 {offsets = [0, 0], sizes = [16, 64], strides = [1, 1]} : vector<16x192xf32> to vector<16x64xf32>
    %189 = arith.mulf %188, %185 : vector<16x64xf32>
    %190 = arith.addf %187, %189 : vector<16x64xf32>
    %191 = vector.extract_strided_slice %183 {offsets = [0, 128], sizes = [16, 64], strides = [1, 1]} : vector<16x192xf32> to vector<16x64xf32>
    %192 = math.tanh %190 : vector<16x64xf32>
    %193 = arith.mulf %191, %192 : vector<16x64xf32>
    %194 = vector.extract_strided_slice %193 {offsets = [0, 0], sizes = [16, 32], strides = [1, 1]} : vector<16x64xf32> to vector<16x32xf32>
    %c96_87 = arith.constant 96 : index
    %c0_88 = arith.constant 0 : index
    %195 = vector.load %arg13[%c96_87, %c0_88] : memref<128x64xf32, #tpu.memory_space<vmem>>, vector<16x32xf32>
    tpu.vector_store %arg13[%c96_87, %c0_88], %194 {strides = array<i32>} : memref<128x64xf32, #tpu.memory_space<vmem>>, vector<16x32xf32>,
    %196 = vector.extract_strided_slice %193 {offsets = [0, 32], sizes = [16, 32], strides = [1, 1]} : vector<16x64xf32> to vector<16x32xf32>
    %c16_89 = arith.constant 16 : index
    %c32_90 = arith.constant 32 : index
    %197 = vector.load %arg13[%c16_89, %c32_90] : memref<128x64xf32, #tpu.memory_space<vmem>>, vector<16x32xf32>
    tpu.vector_store %arg13[%c16_89, %c32_90], %196 {strides = array<i32>} : memref<128x64xf32, #tpu.memory_space<vmem>>, vector<16x32xf32>,
    %c112_91 = arith.constant 112 : index
    %c0_92 = arith.constant 0 : index
    %198 = vector.load %arg12[%c112_91, %c0_92] : memref<128x256xf32, #tpu.memory_space<vmem>>, vector<16x256xf32>
    %c0_93 = arith.constant 0 : index
    %c0_94 = arith.constant 0 : index
    %199 = vector.load %arg12[%c0_93, %c0_94] : memref<128x256xf32, #tpu.memory_space<vmem>>, vector<16x256xf32>
    %200 = arith.select %13, %198, %199 : vector<16x256xi1>, vector<16x256xf32>
    %c0_95 = arith.constant 0 : index
    %c0_96 = arith.constant 0 : index
    %201 = vector.load %arg6[%c0_95, %c0_96] : memref<64x256xf32, #tpu.memory_space<vmem>>, vector<64x256xf32>
    %cst_97 = arith.constant dense<0.000000e+00> : vector<16x256xf32>
    %202 = tpu.matmul %193, %201, %cst_97 {dimension_numbers = #tpu.dot_dimension_numbers<[1], [0], [0], [1], [0, 0, 1, 1], [], []>} : vector<16x64xf32>, vector<64x256xf32>, vector<16x256xf32> -> vector<16x256xf32>
    %203 = arith.addf %200, %202 : vector<16x256xf32>
    %204 = vector.extract_strided_slice %203 {offsets = [0, 0], sizes = [16, 192], strides = [1, 1]} : vector<16x256xf32> to vector<16x192xf32>
    %205 = arith.negf %204 : vector<16x192xf32>
    %206 = math.exp %205 : vector<16x192xf32>
    %cst_98 = arith.constant 1.000000e+00 : f32
    %207 = vector.broadcast %cst_98 : f32 to vector<16x192xf32>
    %208 = arith.addf %207, %206 : vector<16x192xf32>
    %209 = arith.divf %207, %208 : vector<16x192xf32>
    %210 = vector.extract_strided_slice %203 {offsets = [0, 192], sizes = [16, 64], strides = [1, 1]} : vector<16x256xf32> to vector<16x64xf32>
    %211 = math.tanh %210 : vector<16x64xf32>
    %212 = vector.extract_strided_slice %209 {offsets = [0, 64], sizes = [16, 64], strides = [1, 1]} : vector<16x192xf32> to vector<16x64xf32>
    %213 = arith.mulf %212, %190 : vector<16x64xf32>
    %214 = vector.extract_strided_slice %209 {offsets = [0, 0], sizes = [16, 64], strides = [1, 1]} : vector<16x192xf32> to vector<16x64xf32>
    %215 = arith.mulf %214, %211 : vector<16x64xf32>
    %216 = arith.addf %213, %215 : vector<16x64xf32>
    %217 = vector.extract_strided_slice %209 {offsets = [0, 128], sizes = [16, 64], strides = [1, 1]} : vector<16x192xf32> to vector<16x64xf32>
    %218 = math.tanh %216 : vector<16x64xf32>
    %219 = arith.mulf %217, %218 : vector<16x64xf32>
    %220 = vector.extract_strided_slice %219 {offsets = [0, 0], sizes = [16, 32], strides = [1, 1]} : vector<16x64xf32> to vector<16x32xf32>
    %c112_99 = arith.constant 112 : index
    %c0_100 = arith.constant 0 : index
    %221 = vector.load %arg13[%c112_99, %c0_100] : memref<128x64xf32, #tpu.memory_space<vmem>>, vector<16x32xf32>
    tpu.vector_store %arg13[%c112_99, %c0_100], %220 {strides = array<i32>} : memref<128x64xf32, #tpu.memory_space<vmem>>, vector<16x32xf32>,
    %222 = vector.extract_strided_slice %219 {offsets = [0, 32], sizes = [16, 32], strides = [1, 1]} : vector<16x64xf32> to vector<16x32xf32>
    %c0_101 = arith.constant 0 : index
    %c32_102 = arith.constant 32 : index
    %223 = vector.load %arg13[%c0_101, %c32_102] : memref<128x64xf32, #tpu.memory_space<vmem>>, vector<16x32xf32>
    tpu.vector_store %arg13[%c0_101, %c32_102], %222 {strides = array<i32>} : memref<128x64xf32, #tpu.memory_space<vmem>>, vector<16x32xf32>,
    %c0_103 = arith.constant 0 : index
    %c0_104 = arith.constant 0 : index
    %224 = vector.load %arg13[%c0_103, %c0_104] : memref<128x64xf32, #tpu.memory_space<vmem>>, vector<128x64xf32>
    %c0_105 = arith.constant 0 : index
    %c0_106 = arith.constant 0 : index
    %225 = vector.load %arg7[%c0_105, %c0_106] : memref<64x16xf32, #tpu.memory_space<vmem>>, vector<64x16xf32>
    %cst_107 = arith.constant dense<0.000000e+00> : vector<128x16xf32>
    %226 = tpu.matmul %224, %225, %cst_107 {dimension_numbers = #tpu.dot_dimension_numbers<[1], [0], [0], [1], [0, 0, 1, 1], [], []>} : vector<128x64xf32>, vector<64x16xf32>, vector<128x16xf32> -> vector<128x16xf32>
    %c0_108 = arith.constant 0 : index
    %c0_109 = arith.constant 0 : index
    %227 = vector.load %arg8[%c0_108, %c0_109] : memref<1x16xf32, #tpu.memory_space<vmem>>, vector<1x16xf32>
    %228 = vector.broadcast %227 : vector<1x16xf32> to vector<128x16xf32>
    %229 = arith.addf %226, %228 : vector<128x16xf32>
    %cst_110 = arith.constant dense<0.000000e+00> : vector<128xf32>
    %230 = vector.multi_reduction <add>, %229, %cst_110 [1] : vector<128x16xf32> to vector<128xf32>
    %231 = vector.shape_cast %230 : vector<128xf32> to vector<128x1xf32>
    %cst_111 = arith.constant 1.600000e+01 : f32
    %232 = vector.broadcast %cst_111 : f32 to vector<128x1xf32>
    %233 = arith.divf %231, %232 : vector<128x1xf32>
    %234 = arith.mulf %229, %229 : vector<128x16xf32>
    %cst_112 = arith.constant dense<0.000000e+00> : vector<128xf32>
    %235 = vector.multi_reduction <add>, %234, %cst_112 [1] : vector<128x16xf32> to vector<128xf32>
    %236 = vector.shape_cast %235 : vector<128xf32> to vector<128x1xf32>
    %cst_113 = arith.constant 1.600000e+01 : f32
    %237 = vector.broadcast %cst_113 : f32 to vector<128x1xf32>
    %238 = arith.divf %236, %237 : vector<128x1xf32>
    %239 = arith.mulf %233, %233 : vector<128x1xf32>
    %240 = arith.subf %238, %239 : vector<128x1xf32>
    %241 = vector.broadcast %233 : vector<128x1xf32> to vector<128x16xf32>
    %242 = arith.subf %229, %241 : vector<128x16xf32>
    %cst_114 = arith.constant 9.99999974E-6 : f32
    %243 = vector.broadcast %cst_114 : f32 to vector<128x1xf32>
    %244 = arith.addf %240, %243 : vector<128x1xf32>
    %245 = math.rsqrt %244 : vector<128x1xf32>
    %246 = vector.broadcast %245 : vector<128x1xf32> to vector<128x16xf32>
    %247 = arith.mulf %242, %246 : vector<128x16xf32>
    %c0_115 = arith.constant 0 : index
    %c0_116 = arith.constant 0 : index
    %248 = vector.load %arg9[%c0_115, %c0_116] : memref<1x16xf32, #tpu.memory_space<vmem>>, vector<1x16xf32>
    %249 = vector.broadcast %248 : vector<1x16xf32> to vector<128x16xf32>
    %250 = arith.mulf %247, %249 : vector<128x16xf32>
    %c0_117 = arith.constant 0 : index
    %c0_118 = arith.constant 0 : index
    %251 = vector.load %arg10[%c0_117, %c0_118] : memref<1x16xf32, #tpu.memory_space<vmem>>, vector<1x16xf32>
    %252 = vector.broadcast %251 : vector<1x16xf32> to vector<128x16xf32>
    %253 = arith.addf %250, %252 : vector<128x16xf32>
    %254 = arith.addf %2, %253 : vector<128x16xf32>
    %255 = vector.shape_cast %254 : vector<128x16xf32> to vector<8x16x16xf32>
    %c0_119 = arith.constant 0 : index
    %c0_120 = arith.constant 0 : index
    %c0_121 = arith.constant 0 : index
    %c0_122 = arith.constant 0 : index
    %256 = vector.load %arg11[%c0_119, %c0_120, %c0_121, %c0_122] : memref<1x8x16x16xf32, #tpu.memory_space<vmem>>, vector<1x8x16x16xf32>
    %257 = vector.shape_cast %256 : vector<1x8x16x16xf32> to vector<8x16x16xf32>
    %258 = vector.shape_cast %255 : vector<8x16x16xf32> to vector<1x8x16x16xf32>
    tpu.vector_store %arg11[%c0_119, %c0_120, %c0_121, %c0_122], %258 {strides = array<i32>} : memref<1x8x16x16xf32, #tpu.memory_space<vmem>>, vector<1x8x16x16xf32>,
    return
  }
  func.func @transform_0(%arg0: i32, %arg1: i32) -> (i32, i32, i32, i32) {
    %c0_i32 = arith.constant 0 : i32
    %c0_i32_0 = arith.constant 0 : i32
    %c0_i32_1 = arith.constant 0 : i32
    return %arg0, %c0_i32, %arg1, %c0_i32_0 : i32, i32, i32, i32
  }
  func.func @transform_1(%arg0: i32, %arg1: i32) -> (i32, i32) {
    %c0_i32 = arith.constant 0 : i32
    %c0_i32_0 = arith.constant 0 : i32
    %c0_i32_1 = arith.constant 0 : i32
    return %c0_i32, %c0_i32_0 : i32, i32
  }
  func.func @transform_2(%arg0: i32, %arg1: i32) -> (i32, i32) {
    %c0_i32 = arith.constant 0 : i32
    %c0_i32_0 = arith.constant 0 : i32
    %c0_i32_1 = arith.constant 0 : i32
    return %c0_i32, %c0_i32_0 : i32, i32
  }
  func.func @transform_3(%arg0: i32, %arg1: i32) -> (i32, i32) {
    %c0_i32 = arith.constant 0 : i32
    %c0_i32_0 = arith.constant 0 : i32
    %c0_i32_1 = arith.constant 0 : i32
    return %c0_i32, %c0_i32_0 : i32, i32
  }
  func.func @transform_4(%arg0: i32, %arg1: i32) -> (i32, i32) {
    %c0_i32 = arith.constant 0 : i32
    %c0_i32_0 = arith.constant 0 : i32
    %c0_i32_1 = arith.constant 0 : i32
    return %c0_i32, %c0_i32_0 : i32, i32
  }
  func.func @transform_5(%arg0: i32, %arg1: i32) -> (i32, i32) {
    %c0_i32 = arith.constant 0 : i32
    %c0_i32_0 = arith.constant 0 : i32
    %c0_i32_1 = arith.constant 0 : i32
    return %c0_i32, %c0_i32_0 : i32, i32
  }
  func.func @transform_6(%arg0: i32, %arg1: i32) -> (i32, i32) {
    %c0_i32 = arith.constant 0 : i32
    %c0_i32_0 = arith.constant 0 : i32
    %c0_i32_1 = arith.constant 0 : i32
    return %c0_i32, %c0_i32_0 : i32, i32
  }
  func.func @transform_7(%arg0: i32, %arg1: i32) -> (i32, i32) {
    %c0_i32 = arith.constant 0 : i32
    %c0_i32_0 = arith.constant 0 : i32
    %c0_i32_1 = arith.constant 0 : i32
    return %c0_i32, %c0_i32_0 : i32, i32
  }
  func.func @transform_8(%arg0: i32, %arg1: i32) -> (i32, i32) {
    %c0_i32 = arith.constant 0 : i32
    %c0_i32_0 = arith.constant 0 : i32
    %c0_i32_1 = arith.constant 0 : i32
    return %c0_i32, %c0_i32_0 : i32, i32
  }
  func.func @transform_9(%arg0: i32, %arg1: i32) -> (i32, i32, i32, i32) {
    %c0_i32 = arith.constant 0 : i32
    %c0_i32_0 = arith.constant 0 : i32
    %c0_i32_1 = arith.constant 0 : i32
    return %arg0, %c0_i32, %arg1, %c0_i32_0 : i32, i32, i32, i32
  }
}

</mosaic_0001>

<bundles_post_ra>
// kernel: tpu_custom_call.1
= control target key start
LH: loop header
LB: loop body
LE: loop exit
PB: predicated region body
PF: predicated region fallthrough
CT: control target
= control target key end

     0   :  { %s5036_s0 = inlined_call_operand.hbm [shape: f32[2,8,16,16], index: 0, kind: input, shape index: {}]   ;;  %s5037_s1 = inlined_call_operand.vmem [shape: f32[1,256], index: 1, kind: input, shape index: {}]   ;;  %s5038_s2 = inlined_call_operand.vmem [shape: f32[16,256], index: 2, kind: input, shape index: {}]   ;;  %s5039_s3 = inlined_call_operand.vmem [shape: f32[1,256], index: 3, kind: input, shape index: {}]   ;;  %s5040_s4 = inlined_call_operand.hbm [shape: f32[64,256], index: 4, kind: input, shape index: {}]   ;;  %s5041_s5 = inlined_call_operand.vmem [shape: f32[64,16], index: 5, kind: input, shape index: {}]   ;;  %s5042_s6 = inlined_call_operand.vmem [shape: f32[1,16], index: 6, kind: input, shape index: {}]   ;;  %s5043_s7 = inlined_call_operand.vmem [shape: f32[1,16], index: 7, kind: input, shape index: {}]   ;;  %s5044_s8 = inlined_call_operand.vmem [shape: f32[1,16], index: 8, kind: input, shape index: {}]   ;;  %s5045_s9 = inlined_call_operand.hbm [shape: f32[2,8,16,16], index: 9, kind: output, shape index: {}]  }
   0x1   :  { %5061 = sst [smem:[#allocation25_spill]] %s5040_s4 }
   0x2   :  { %5062 = sst [smem:[#allocation26_spill]] %s5045_s9 }
   0x3   :  { %14 = vsyncpa [#allocation5], 0 }
   0x4   :  { %16 = vsyncpa [#allocation5 + $0x1], 0 }
   0x5   :  { %17 = vsyncpa [#allocation8], 0 }
   0x6   :  { %18 = vsyncpa [#allocation6], 0 }
   0x7   :  { %20 = vsyncpa [#allocation6 + $0x1], 0  ;;  %s3631_s30 = smov 0   ;;  %s3633_s10 = smov 0  }
   0x8   :  { %s3635_s11 = smov 0   ;;  %s3637_s12 = smov 0  }
   0x9   :  { %s3639_s13 = smov 0   ;;  %s3641_s14 = smov 0  }
   0xa LB: > { %5063 = sst [smem:[#allocation13_spill]] %s3548_s30  ;;  %s2953_s15 = sadd.s32 4294967295, %s3568_s14   ;;  %s3568_s14 = sphi %s3641_s14, %s26_s14   ;;  %s3564_s13 = sphi %s3639_s13, %s5128_s13   ;;  %s3560_s12 = sphi %s3637_s12, %s5127_s12   ;;  %s3556_s11 = sphi %s3635_s11, %s5126_s11   ;;  %s3552_s10 = sphi %s3633_s10, %s5125_s10   ;;  %s3548_s30 = sphi %s3631_s30, %s5124_s30  }
   0xb   : > { %5064 = sst [smem:[#allocation14_spill]] %s3568_s14  ;;  %s2954_s16 = sadd.s32 4294967294, %s3568_s14  }
   0xc   : > { %p60_p0 = scmp.ne.s32.totalorder %s3552_s10, %s3548_s30  ;;  %p3665_p1 = scmp.eq.s32.totalorder %s2953_s15, 0 }
   0xd   : > { %p3669_p2 = scmp.eq.s32.totalorder %s2953_s15, 1  ;;  %p260_p3 = scmp.eq.s32.totalorder %s2954_s16, 1 }
   0xe   : > { %p3675_p4 = por %p3665_p1, %p60_p0  ;;  %p2955_p5 = scmp.ge.s32.totalorder %s3568_s14, 1 }
   0xf   : > { %p3680_p6 = por %p260_p3, %p60_p0  ;;  %p267_p7 = scmp.lt.s32.totalorder %s3568_s14, 3 }
  0x10   : > { %s5070_s4 = sld [smem:[#allocation25_spill]]  ;;  %s3570_s25 = smov [#allocation7]  }
  0x11   : > { %s5068_s20 = scalar_select %p3680_p6, 1, 0 }
  0x12   : > { %p3688_p8 = pnand %p2955_p5, %p267_p7  ;;  %s289_s26 = sshll.u32 %s3570_s25, 4  ;;  %s290_s26 = int_to_ptr.vmem [resolvable:$true] %s289_s26 }
  0x13   : > { %5069 = sst [smem:[#allocation15_spill]] %s5068_s20  ;;  %p2957_p11 = scmp.ge.s32.totalorder %s3568_s14, 2 }
  0x14   : > { %p3102_p9 = pneg %p3688_p8  ;;  %s3571_s27 = smov 256  }
  0x15   : > { %s3572_s28 = smov 16   ;;  %s38_s29 = sadd.s32 1, %s3564_s13 }
  0x16   : > { %s287_s23 = sshll.u32 %s5070_s4, 4  ;;  %p3103_p10 = pnand %p3102_p9, %p3665_p1  ;;  %s288_s23 = int_to_ptr.hbm [resolvable:$true] %s287_s23 }
  0x17   : > { %p40_p12 = scmp.ge.s32.totalorder %s38_s29, 2  ;;  %s47_s15 = sadd.s32 1, %s3556_s11 }
  0x18   : > { %3105 = dma.hbm_to_vmem [thread:$0]  (!%p3103_p10), %s288_s23, 2048, %s290_s26, [#allocation8], %s3571_s27, %s3571_s27, %s3572_s28  }
  0x19   : > { %p54_p13 = scmp.ne.s32.totalorder %s3556_s11, %s3552_s10  ;;  %p55_p0 = scmp.eq.s32.totalorder %s3568_s14, 0 }
  0x1a   : > { %s5130_s29 = smov (%p40_p12, %s38_s29), 0  ;;  %p3115_p7 = scmp.lt.s32.totalorder %s3568_s14, 2 }
  0x1b   : > { %5072 = sst [smem:[#allocation16_spill]] %s5130_s29  ;;  %p3704_p3 = por %p55_p0, %p54_p13 }
  0x1c   : > { %p3710_p5 = por %p3669_p2, %p54_p13  ;;  %s42_s22 = ssub.s32 %s3564_s13, %s5130_s29 }
  0x1d   : > { %p45_p9 = scmp.eq.s32.totalorder %s42_s22, 0  ;;  %s315_s23 = sand.u32 1, %s3556_s11  }
  0x1e   : > { %s5074_s21 = scalar_select %p3710_p5, 1, 0 }
  0x1f   : > { %s2958_s25 = sshll.u32 %s315_s23, 7  ;;  %s3078_s27 = sshll.u32 %s3564_s13, 7 }
  0x20   : > { %5075 = sst [smem:[#allocation17_spill]] %s5074_s21  ;;  %s326_s20 = scalar_lea.hbm %s5036_s0, %s3078_s27 }
  0x21   : > { %s3719_s26 = scalar_select %p45_p9, %s3556_s11, %s47_s15  }
  0x22   : > { %s319_s30 = scalar_lea.vmem [#allocation4], %s2958_s25  ;;  %s327_s18 = sshll.u32 %s326_s20, 4  ;;  %s328_s18 = int_to_ptr.hbm [resolvable:$true] %s327_s18 }
  0x23   : > { %s329_s9 = sshll.u32 %s319_s30, 4  ;;  %p3107_p2 = pnand %p3115_p7, %p3704_p3  ;;  %s330_s9 = int_to_ptr.vmem [resolvable:$true] %s329_s9 }
  0x24   : > { %s316_s21 = scalar_lea.sflag [#allocation5], %s315_s23  ;;  %s3573_s29 = smov 128  }
  0x25   : > { %s3574_s14 = smov 8   ;;  %341 = sbr.rel (%p3688_p8) target bundleno = 4411 (0x113b), region = 56 }
  0x26   : > { %3109 = dma.hbm_to_vmem [thread:$0]  (!%p3107_p2), %s328_s18, 2048, %s330_s9, %s316_s21, %s3573_s29, %s3573_s29, %s3574_s14  }
  0x2a   : > { %s3730_s15 = sand.u32 1, %s3552_s10  }
  0x2b   : > { %s2962_s4 = sshll.u32 %s3730_s15, 7  ;;  %s344_s30 = scalar_lea.sflag [#allocation5], %s3730_s15 }
  0x2c   : > { %s3736_s20 = scalar_lea.vmem [#allocation4], %s2962_s4 }
  0x2d   : > { %3535 = dma.done.wait (%p3675_p4), %s344_s30, 2048  }
  0x2e   : > { %3537 = vsyncadd (%p3675_p4), %s344_s30, 4294965248 }
  0x2f   : > { %3539 = dma.done.wait (%p3665_p1), [#allocation8], 2048  }
  0x30   : > { %3541 = vsyncadd (%p3665_p1), [#allocation8], 4294965248  ;;  %v408_v0 = vld [vmem:[%s5038_s2 + $0x10] sm:$0xff]  ;;  %v406_v1 = vld [vmem:[%s5038_s2] sm:$0xff]  ;;  %vm416_vm0 = vcmask 130048   ;;  %v3575_v29 = vmov 0.0  }
  0x31   : > { %3080 = vmatpush.msra.mxu1 %v408_v0  ;;  %3081 = vmatpush.msra.mxu2 %v408_v0  ;;  %v395_v2 = vld [vmem:[%s3736_s20 + $0x28] sm:$0xff]  ;;  %v3754_v3 = vld [vmem:[%s3736_s20 + $0x50] sm:$0xff]  ;;  %v409_v4 = vld [vmem:[%s5038_s2 + $0x18] sm:$0xff]  ;;  %v3576_v40 = vmov 0   ;;  %s3577_s28 = smov 64   ;;  %s4817_s19 = scalar_lea.vmem [#allocation9], %s2962_s4 }
  0x32   : > { %3082 = vmatpush.msra.mxu3 %v408_v0  ;;  %479 = vmatpush.msra.mxu0 %v408_v0  ;;  %v407_v5 = vld [vmem:[%s5038_s2 + $0x8] sm:$0xff]  ;;  %v390_v6 = vld [vmem:[%s3736_s20] sm:$0xff]  ;;  %v396_v7 = vld [vmem:[%s3736_s20 + $0x30] sm:$0xff]  ;;  %s3079_s4 = sshll.u32 %s3560_s12, 7  ;;  %s5118_s22 = sld [smem:[#allocation26_spill]] }
  0x33   : > { %3083 = vmatpush.msra.mxu1 %v406_v1  ;;  %3084 = vmatpush.msra.mxu2 %v406_v1  ;;  %v3769_v8 = vld [vmem:[%s3736_s20 + $0x58] sm:$0xff]  ;;  %v391_v9 = vld [vmem:[%s3736_s20 + $0x8] sm:$0xff]  ;;  %v392_v11 = vld [vmem:[%s3736_s20 + $0x10] sm:$0xff]  ;;  %s2853_s25 = sshll.u32 %s4817_s19, 4  ;;  %s2839_s18 = scalar_lea.sflag [#allocation6], %s3730_s15  ;;  %s2854_s25 = int_to_ptr.vmem [resolvable:$true] %s2853_s25 }
  0x34   : > { %2970 = vmatmul.msk.f32.vlgmr.msra.gmra.mxu1 %vm416_vm0, %v395_v2  ;;  %2975 = vmatmul.msk.f32.vlgmr.msra.gmra.mxu2 %vm416_vm0, %v3754_v3  ;;  %v397_v10 = vld [vmem:[%s3736_s20 + $0x38] sm:$0xff]  ;;  %v398_v12 = vld [vmem:[%s3736_s20 + $0x40] sm:$0xff]  ;;  %v3785_v14 = vld [vmem:[%s3736_s20 + $0x48] sm:$0xff] }
  0x35   : > { %544 = vmatpush.msrb.mxu1 %v409_v4  ;;  %3085 = vmatpush.msra.mxu3 %v406_v1  ;;  %v393_v13 = vld [vmem:[%s3736_s20 + $0x18] sm:$0xff]  ;;  %v394_v15 = vld [vmem:[%s3736_s20 + $0x20] sm:$0xff]  ;;  %v3801_v17 = vld [vmem:[#allocation7 + $0x70] sm:$0xff] }
  0x36   : > { %480 = vmatpush.msra.mxu0 %v406_v1  ;;  %v3796_v16 = vld [vmem:[%s3736_s20 + $0x60] sm:$0xff]  ;;  %v3806_v19 = vld [vmem:[%s3736_s20 + $0x68] sm:$0xff]  ;;  %674 = vmatpush.msrb.mxu2 %v3801_v17  ;;  %v3812_v20 = vld [vmem:[#allocation7 + $0x50] sm:$0xff] }
  0x37   : > { %545 = vmatpush.msrb.mxu1 %v407_v5  ;;  %2965 = vmatmul.msk.f32.vlgmr.msra.gmra.mxu0 %vm416_vm0, %v390_v6  ;;  %v3803_v18 = vld [vmem:[#allocation7 + $0x60] sm:$0xff]  ;;  %v3818_v22 = vld [vmem:[#allocation7 + $0x78] sm:$0xff]  ;;  %v3820_v23 = vld [vmem:[#allocation7 + $0x30] sm:$0xff] }
  0x38   : > { %2977 = vmatmul.msk.f32.vlgmr.msra.gmra.mxu3 %vm416_vm0, %v3796_v16  ;;  %675 = vmatpush.msrb.mxu2 %v3803_v18  ;;  %v3816_v21 = vld [vmem:[#allocation7 + $0x40] sm:$0xff]  ;;  %v3824_v24 = vld [vmem:[%s3736_s20 + $0x70] sm:$0xff]  ;;  %v3837_v27 = vld [vmem:[#allocation7 + $0x68] sm:$0xff]  ;;  %s2852_s12 = scalar_lea.hbm %s5118_s22, %s3079_s4  ;;  %s3502_s24 = scalar_lea.hbm %s5118_s22, 256 }
  0x39   : > { %697 = vmatpush.msrb.mxu3 %v3818_v22  ;;  %v3829_v25 = vld [vmem:[#allocation7 + $0x20] sm:$0xff]  ;;  %v3833_v26 = vld [vmem:[#allocation7 + $0x10] sm:$0xff]  ;;  %v3841_v30 = vld [vmem:[#allocation7 + $0x58] sm:$0xff]  ;;  %s2855_s27 = sshll.u32 %s2852_s12, 4  ;;  %s2856_s27 = int_to_ptr.hbm [resolvable:$true] %s2855_s27 }
  0x3a   : > { %676 = vmatpush.msrb.mxu2 %v3812_v20  ;;  %v646_v28 = vld [vmem:[#allocation7] sm:$0xff]  ;;  %v3844_v31 = vld [vmem:[%s3736_s20 + $0x78] sm:$0xff]  ;;  %v3851_v32 = vld [vmem:[#allocation7 + $0x48] sm:$0xff]  ;;  %s3496_s30 = sshra.s32 %s2856_s27, 4  ;;  %s3497_s30 = int_to_ptr.hbm [resolvable:$true] %s3496_s30 }
  0x3b   : > { %698 = vmatpush.msrb.mxu3 %v3837_v27  ;;  %v3856_v33 = vld [vmem:[#allocation7 + $0x38] sm:$0xff]  ;;  %v3861_v34 = vld [vmem:[#allocation7 + $0x28] sm:$0xff]  ;;  %v627_v38 = vld [vmem:[%s5037_s1] sm:$0x3]  ;;  %p3503_p10 = scmp.lt.s32.totalorder %s3497_s30, %s5118_s22 }
  0x3c   : > { %2971 = vmatmul.msk.f32.gmra.mxu1 %vm416_vm0, %v396_v7  ;;  %2976 = vmatmul.msk.f32.gmra.mxu2 %vm416_vm0, %v3769_v8  ;;  %v3867_v35 = vld [vmem:[#allocation7 + $0x18] sm:$0xff]  ;;  %v3873_v36 = vld [vmem:[#allocation7 + $0x8] sm:$0xff]  ;;  %vm628_vm1 = vcmp.gt.f32.partialorder %v627_v38, 0.5  ;;  %v410_v42 = vld [vmem:[%s5039_s3] sm:$0x3] }
  0x3d   : > { %677 = vmatpush.msrb.mxu2 %v3816_v21  ;;  %699 = vmatpush.msrb.mxu3 %v3841_v30  ;;  %v629_v41 = vsel %vm628_vm1, 1, %v3576_v40  ;;  %v3904_v45 = vperm.slane %v410_v42, 0  ;;  %vm828_vm1 = vcmask 261120  }
  0x3e   : > { %v630_v44 = vperm.slane %v629_v41, 0 }
  0x3f   : > { %2966 = vmatmul.msk.f32.gmra.mxu0 %vm416_vm0, %v391_v9  ;;  %678 = vmatpush.msrb.mxu2 %v3820_v23 }
  0x40   : > { %2978 = vmatmul.msk.f32.gmra.mxu3 %vm416_vm0, %v3806_v19  ;;  %vm3910_vm2 = vcmp.eq.s32.totalorder %v630_v44, 1 }
  0x41   : > { %679 = vmatpush.msrb.mxu2 %v3829_v25  ;;  %700 = vmatpush.msrb.mxu3 %v3851_v32 }
  0x43   : > { %680 = vmatpush.msrb.mxu2 %v3833_v26  ;;  %701 = vmatpush.msrb.mxu3 %v3856_v33 }
  0x44   : > { %2972 = vmatmul.msk.f32.gmra.mxu1 %vm416_vm0, %v397_v10 }
  0x45   : > { %681 = vmatpush.msrb.mxu2 %v646_v28  ;;  %702 = vmatpush.msrb.mxu3 %v3861_v34 }
  0x46   : > { %682 = vmatmul.f32.vlgmr.msrb.gmra.mxu2 %v3575_v29 }
  0x47   : > { %2967 = vmatmul.msk.f32.gmra.mxu0 %vm416_vm0, %v392_v11  ;;  %876 = vmatpush.msra.mxu2 %v3801_v17 }
  0x48   : > { %2979 = vmatmul.msk.f32.gmra.mxu3 %vm416_vm0, %v3824_v24 }
  0x49   : > { %877 = vmatpush.msra.mxu2 %v3803_v18  ;;  %703 = vmatpush.msrb.mxu3 %v3867_v35 }
  0x4b   : > { %878 = vmatpush.msra.mxu2 %v3812_v20  ;;  %704 = vmatpush.msrb.mxu3 %v3873_v36 }
  0x4c   : > { %2973 = vmatmul.msk.f32.gmra.mxu1 %vm416_vm0, %v398_v12 }
  0x4d   : > { %879 = vmatpush.msra.mxu2 %v3816_v21  ;;  %899 = vmatpush.msra.mxu3 %v3818_v22 }
  0x4e   : > { %685 = vmatmul.f32.gmra.mxu2 %v3575_v29 }
  0x4f   : > { %2968 = vmatmul.msk.f32.gmra.mxu0 %vm416_vm0, %v393_v13  ;;  %880 = vmatpush.msra.mxu2 %v3820_v23 }
  0x50   : > { %2980 = vmatmul.msk.f32.gmra.mxu3 %vm416_vm0, %v3844_v31 }
  0x51   : > { %881 = vmatpush.msra.mxu2 %v3829_v25  ;;  %900 = vmatpush.msra.mxu3 %v3837_v27 }
  0x53   : > { %882 = vmatpush.msra.mxu2 %v3833_v26  ;;  %901 = vmatpush.msra.mxu3 %v3841_v30 }
  0x54   : > { %2974 = vmatmul.msk.f32.gmra.mxu1 %vm416_vm0, %v3785_v14 }
  0x55   : > { %883 = vmatpush.msra.mxu2 %v646_v28  ;;  %902 = vmatpush.msra.mxu3 %v3851_v32 }
  0x57   : > { %2969 = vmatmul.msk.f32.gmra.mxu0 %vm416_vm0, %v394_v15  ;;  %1076 = vmatpush.msrb.mxu2 %v3801_v17 }
  0x58   : > { %705 = vmatmul.f32.vlgmr.msrb.gmra.mxu3 %v3575_v29 }
  0x59   : > { %1077 = vmatpush.msrb.mxu2 %v3803_v18  ;;  %903 = vmatpush.msra.mxu3 %v3856_v33 }
  0x5b   : > { %1078 = vmatpush.msrb.mxu2 %v3812_v20  ;;  %904 = vmatpush.msra.mxu3 %v3861_v34 }
  0x5c   : > { %2981 = vmatmul.msk.f32.vlgmr.msrb.gmra.mxu1 %vm416_vm0, %v390_v6 }
  0x5d   : > { %1079 = vmatpush.msrb.mxu2 %v3816_v21  ;;  %905 = vmatpush.msra.mxu3 %v3867_v35 }
  0x5f   : > { %1080 = vmatpush.msrb.mxu2 %v3820_v23  ;;  %906 = vmatpush.msra.mxu3 %v3873_v36 }
  0x60   : > { %708 = vmatmul.f32.gmra.mxu3 %v3575_v29 }
  0x61   : > { %1081 = vmatpush.msrb.mxu2 %v3829_v25  ;;  %1099 = vmatpush.msrb.mxu3 %v3818_v22 }
  0x63   : > { %1082 = vmatpush.msrb.mxu2 %v3833_v26  ;;  %1100 = vmatpush.msrb.mxu3 %v3837_v27 }
  0x64   : > { %2982 = vmatmul.msk.f32.gmra.mxu1 %vm416_vm0, %v391_v9 }
  0x65   : > { %1083 = vmatpush.msrb.mxu2 %v646_v28  ;;  %1101 = vmatpush.msrb.mxu3 %v3841_v30 }
  0x67   : > { %1102 = vmatpush.msrb.mxu3 %v3851_v32 }
  0x69   : > { %1103 = vmatpush.msrb.mxu3 %v3856_v33 }
  0x6b   : > { %1104 = vmatpush.msrb.mxu3 %v3861_v34 }
  0x6c   : > { %2983 = vmatmul.msk.f32.gmra.mxu1 %vm416_vm0, %v392_v11 }
  0x6d   : > { %1105 = vmatpush.msrb.mxu3 %v3867_v35 }
  0x6f   : > { %1106 = vmatpush.msrb.mxu3 %v3873_v36 }
  0x74   : > { %2984 = vmatmul.msk.f32.gmra.mxu1 %vm416_vm0, %v393_v13 }
  0x7c   : > { %2985 = vmatmul.msk.f32.gmra.mxu1 %vm416_vm0, %v394_v15  ;;  %v631_v15 = vperm.slane %v629_v41, 1 }
  0x7e   : > { %vm3981_vm3 = vcmp.eq.s32.totalorder %v631_v15, 1 }
  0x84   : > { %2986 = vmatmul.msk.f32.gmra.mxu1 %vm416_vm0, %v395_v2 }
  0x8c   : > { %2987 = vmatmul.msk.f32.gmra.mxu1 %vm416_vm0, %v396_v7 }
  0x94   : > { %2988 = vmatmul.msk.f32.gmra.mxu1 %vm416_vm0, %v397_v10 }
  0x9c   : > { %2989 = vmatmul.msk.f32.gmra.mxu1 %vm416_vm0, %v398_v12 }
  0xa4   : > { %2990 = vmatmul.msk.f32.gmra.mxu1 %vm416_vm0, %v3785_v14 }
  0xac   : > { %2991 = vmatmul.msk.f32.gmra.mxu1 %vm416_vm0, %v3754_v3 }
  0xb1   : > { %v497_v37 = vpop.f32.mrf.mxu1 }
  0xb2   : > { %v3915_v48 = vadd.f32 %v497_v37, %v3904_v45 }
  0xb4   : > { %2992 = vmatmul.msk.f32.gmra.mxu1 %vm416_vm0, %v3769_v8  ;;  %v482_v3 = vpop.f32.mrf.mxu0 }
  0xb7   : > { %v3897_v39 = vpop.f32.mrf.mxu2 }
  0xb9   : > { %v500_v43 = vpop.f32.mrf.mxu1 }
  0xba   : > { %v3930_v53 = vadd.f32 %v500_v43, %v3904_v45  ;;  %v4002_v43 = vadd.f32 %v482_v3, %v3904_v45 }
  0xbb   : > { %v518_v6 = vpop.f32.mrf.mxu3 }
  0xbc   : > { %2993 = vmatmul.msk.f32.gmra.mxu1 %vm416_vm0, %v3796_v16  ;;  %v485_v5 = vpop.f32.mrf.mxu0  ;;  %v3966_v9 = vadd.f32 %v518_v6, %v3904_v45  ;;  %5080 = vst [vmem:[#allocation18_spill] sm:$0xff] %v4002_v43 }
  0xbf   : > { %v515_v46 = vpop.f32.mrf.mxu2 }
  0xc0   : > { %v3918_v49 = vadd.f32 %v515_v46, %v3904_v45 }
  0xc1   : > { %v503_v50 = vpop.f32.mrf.mxu1 }
  0xc2   : > { %v3946_v58 = vadd.f32 %v503_v50, %v3904_v45 }
  0xc3   : > { %v521_v12 = vpop.f32.mrf.mxu3 }
  0xc4   : > { %2994 = vmatmul.msk.f32.gmra.mxu1 %vm416_vm0, %v3806_v19  ;;  %v488_v8 = vpop.f32.mrf.mxu0  ;;  %v3976_v16 = vadd.f32 %v521_v12, %v3904_v45 }
  0xc5   : > { %v3969_v10 = vadd.f32 %v488_v8, %v3904_v45  ;;  %v4024_v8 = vadd.f32 %v485_v5, %v3904_v45 }
  0xc7   : > { %5082 = vst [vmem:[#allocation20_spill] sm:$0xff] %v4024_v8 }
  0xc9   : > { %v506_v52 = vpop.f32.mrf.mxu1 }
  0xca   : > { %v3933_v54 = vadd.f32 %v506_v52, %v3904_v45 }
  0xcb   : > { %v524_v40 = vpop.f32.mrf.mxu3 }
  0xcc   : > { %2995 = vmatmul.msk.f32.gmra.mxu1 %vm416_vm0, %v3824_v24  ;;  %v491_v14 = vpop.f32.mrf.mxu0  ;;  %v413_v24 = vperm.slane %v410_v42, 1  ;;  %v4005_v46 = vadd.f32 %v524_v40, %v3904_v45 }
  0xcd   : > { %v3979_v19 = vadd.f32 %v491_v14, %v3904_v45 }
  0xce   : > { %5081 = vst [vmem:[#allocation19_spill] sm:$0xff] %v4005_v46 }
  0xd1   : > { %v509_v57 = vpop.f32.mrf.mxu1 }
  0xd2   : > { %v3949_v59 = vadd.f32 %v509_v57, %v3904_v45 }
  0xd4   : > { %2996 = vmatmul.msk.f32.gmra.mxu1 %vm416_vm0, %v3844_v31 }
  0xd9   : > { %v3961_v62 = vpop.f32.mrf.mxu1 }
  0xda   : > { %v4082_v3 = vadd.f32 %v3961_v62, %v413_v24 }
  0xdc   : > { %5084 = vst [vmem:[#allocation22_spill] sm:$0xff] %v4082_v3 }
  0xe1   : > { %v3963_v63 = vpop.f32.mrf.mxu1 }
  0xe2   : > { %v4098_v62 = vadd.f32 %v3963_v63, %v413_v24 }
  0xe4   : > { %5085 = vst [vmem:[#allocation23_spill] sm:$0xff] %v4098_v62 }
  0xe9   : > { %v553_v0 = vpop.f32.mrf.mxu1 }
  0xea   : > { %v4057_v38 = vadd.f32 %v553_v0, %v413_v24 }
  0xf1   : > { %v556_v1 = vpop.f32.mrf.mxu1 }
  0xf2   : > { %v4069_v5 = vadd.f32 %v556_v1, %v413_v24 }
  0xf9   : > { %v559_v2 = vpop.f32.mrf.mxu1 }
  0xfa   : > { %v4029_v14 = vadd.f32 %v559_v2, %v413_v24 }
 0x101   : > { %v562_v4 = vpop.f32.mrf.mxu1 }
 0x102   : > { %v4045_v2 = vadd.f32 %v562_v4, %v413_v24 }
 0x109   : > { %v565_v7 = vpop.f32.mrf.mxu1 }
 0x10a   : > { %v3985_v31 = vadd.f32 %v565_v7, %v413_v24  ;;  %v527_v7 = vpop.f32.mrf.mxu3 }
 0x10b   : > { %v4027_v12 = vadd.f32 %v527_v7, %v3904_v45 }
 0x10d   : > { %5083 = vst [vmem:[#allocation21_spill] sm:$0xff] %v4027_v12 }
 0x111   : > { %v568_v11 = vpop.f32.mrf.mxu1 }
 0x112   : > { %v4007_v50 = vadd.f32 %v568_v11, %v413_v24 }
 0x119   : > { %v571_v28 = vpop.f32.mrf.mxu1 }
 0x11a   : > { %v3987_v37 = vadd.f32 %v571_v28, %v413_v24  ;;  %v706_v28 = vpop.f32.mrf.mxu3 }
 0x121   : > { %v574_v44 = vpop.f32.mrf.mxu1 }
 0x122   : > { %v4009_v52 = vadd.f32 %v574_v44, %v413_v24  ;;  %v709_v60 = vpop.f32.mrf.mxu3 }
 0x129   : > { %v577_v11 = vpop.f32.mrf.mxu1 }
 0x12a   : > { %v4031_v15 = vadd.f32 %v577_v11, %v413_v24 }
 0x131   : > { %v580_v44 = vpop.f32.mrf.mxu1 }
 0x132   : > { %v4047_v7 = vadd.f32 %v580_v44, %v413_v24 }
 0x139   : > { %v583_v57 = vpop.f32.mrf.mxu1 }
 0x13a   : > { %v4059_v13 = vadd.f32 %v583_v57, %v413_v24 }
 0x141   : > { %v586_v51 = vpop.f32.mrf.mxu1 }
 0x142   : > { %v4071_v61 = vadd.f32 %v586_v51, %v413_v24 }
 0x149   : > { %v589_v56 = vpop.f32.mrf.mxu1 }
 0x14a   : > { %v4084_v44 = vadd.f32 %v589_v56, %v413_v24 }
 0x14c   : > { %v643_v51 = vsel %vm3981_vm3, %v4082_v3, %v4084_v44 }
 0x14d   : > { %v4094_v42 = vadd.f32 %v706_v28, %v643_v51 }
 0x14f   : > { %3180 = vtanh.f32 %v4094_v42 }
 0x151   : > { %v592_v57 = vpop.f32.mrf.mxu1 }
 0x152   : > { %v4100_v56 = vadd.f32 %v592_v57, %v413_v24  ;;  %v494_v24 = vpop.f32.mrf.mxu0  ;;  %v4117_v57 = vadd.f32 %v3897_v39, %v3904_v45  ;;  %v644_v39 = vsel %vm3910_vm2, %v4024_v8, %v4027_v12 }
 0x153   : > { %v4120_v6 = vadd.f32 %v494_v24, %v3904_v45 }
 0x154   : > { %5086 = vst [vmem:[#allocation24_spill] sm:$0xff] %v4100_v56  ;;  %v645_v55 = vsel %vm3981_vm3, %v4098_v62, %v4100_v56 }
 0x155   : > { %v3181_v51 = vpop.eup %3180  ;;  %v4110_v1 = vadd.f32 %v709_v60, %v645_v55  ;;  %v683_v60 = vpop.f32.mrf.mxu2 }
 0x156   : > { %798 = vrot.lane.b32.xlu0 %v3181_v51, %s3577_s28  ;;  %v642_v51 = vsel %vm3910_vm2, %v4002_v43, %v4005_v46 }
 0x157   : > { %3182 = vtanh.f32 %v4110_v1 }
 0x15d   : > { %v3183_v63 = vpop.eup %3182  ;;  %v686_v45 = vpop.f32.mrf.mxu2 }
 0x15e   : > { %800 = vrot.lane.b32.xlu0 %v3183_v63, %s3577_s28  ;;  %v712_v63 = vadd.f32 %v683_v60, %v642_v51  ;;  %v714_v24 = vadd.f32 %v686_v45, %v644_v39 }
 0x160   : > { %v2997_v28 = vmul.f32 -1.442695, %v712_v63  ;;  %v2999_v41 = vmul.f32 -1.442695, %v714_v24 }
 0x162   : > { %3184 = vpow2.f32 %v2997_v28 }
 0x163   : > { %3186 = vpow2.f32 %v2999_v41 }
 0x168   : > { %v3185_v11 = vpop.eup %3184 }
 0x169   : > { %v728_v55 = vadd.f32 1.0, %v3185_v11  ;;  %v3187_v40 = vpop.eup %3186 }
 0x16a   : > { %v730_v0 = vadd.f32 1.0, %v3187_v40 }
 0x16b   : > { %3188 = vrcp.f32 %v728_v55  ;;  %vm737_vm4 = vweird.f32 %v728_v55  ;;  %v743_v8 = vand.u32 2147483648, %v728_v55  ;;  %v741_v28 = vand.u32 2147483647, %v728_v55 }
 0x16c   : > { %3190 = vrcp.f32 %v730_v0  ;;  %vm767_vm8 = vweird.f32 %v730_v0  ;;  %v773_v62 = vand.u32 2147483648, %v730_v0 }
 0x16d   : > { %v744_v45 = vor.u32 1.1754944e-38, %v743_v8  ;;  %vm742_vm7 = vcmp.eq.f32.partialorder %v741_v28, 8.507059e+37 }
 0x16e   : > { %v774_v3 = vor.u32 1.1754944e-38, %v773_v62 }
 0x171   : > { %v3189_v4 = vpop.eup %3188 }
 0x172   : > { %v733_v43 = vmul.f32 %v3189_v4, %v728_v55  ;;  %v3191_v51 = vpop.eup %3190  ;;  %vm738_vm5 = vweird.f32 %v3189_v4 }
 0x173   : > { %v763_v46 = vmul.f32 %v3191_v51, %v730_v0  ;;  %vm739_vm6 = vmor %vm737_vm4, %vm738_vm5  ;;  %vm768_vm9 = vweird.f32 %v3191_v51  ;;  %vm662_vm4 = vcmask 523264   ;;  %vm831_vm5 = vcmask 523520  }
 0x174   : > { %v734_v60 = vsub.f32 1.0, %v733_v43  ;;  %vm769_vm10 = vmor %vm767_vm8, %vm768_vm9 }
 0x175   : > { %v764_v39 = vsub.f32 1.0, %v763_v46 }
 0x176   : > { %v735_v63 = vmul.f32 %v3189_v4, %v734_v60  ;;  %v771_v60 = vand.u32 2147483647, %v730_v0 }
 0x177   : > { %v765_v11 = vmul.f32 %v3191_v51, %v764_v39 }
 0x178   : > { %v736_v12 = vadd.f32 %v3189_v4, %v735_v63  ;;  %vm772_vm11 = vcmp.eq.f32.partialorder %v771_v60, 8.507059e+37 }
 0x179   : > { %v766_v56 = vadd.f32 %v3191_v51, %v765_v11 }
 0x17a   : > { %v740_v41 = vsel %vm739_vm6, %v3189_v4, %v736_v12 }
 0x17b   : > { %v745_v24 = vsel %vm742_vm7, %v744_v45, %v740_v41  ;;  %v770_v63 = vsel %vm769_vm10, %v3191_v51, %v766_v56  ;;  %v3000_v56 = vmul.f32 -1.442695, %v4110_v1 }
 0x17c   : > { %v775_v55 = vsel %vm772_vm11, %v774_v3, %v770_v63  ;;  %v794_v12 = vmul.f32 0.0, %v745_v24  ;;  %v2998_v3 = vmul.f32 -1.442695, %v4094_v42 }
 0x17d   : > { %v795_v39 = vmul.f32 0.0, %v775_v55 }
 0x1c8   : > { %v799_v40 = vpop.permute.xlu0 %798 }
 0x1c9   : > { %v804_v43 = vmul.f32 %v799_v40, %v745_v24 }
 0x1cb   : > { %808 = vrot.lane.b32.xlu1 %v804_v43, %s3577_s28 }
 0x1d0   : > { %v801_v46 = vpop.permute.xlu0 %800 }
 0x1d1   : > { %v805_v8 = vmul.f32 %v801_v46, %v775_v55 }
 0x1d3   : > { %810 = vrot.lane.b32.xlu1 %v805_v8, %s3577_s28 }
 0x23d   : > { %v809_v4 = vpop.permute.xlu1 %808 }
 0x23e   : > { %v4136_v28 = vadd.f32 %v809_v4, %v794_v12 }
 0x240   : > { %3192 = vtanh.f32 %v4136_v28 }
 0x245   : > { %v811_v45 = vpop.permute.xlu1 %810 }
 0x246   : > { %v3193_v0 = vpop.eup %3192  ;;  %v4139_v41 = vadd.f32 %v811_v45, %v795_v39 }
 0x247   : > { %820 = vrot.lane.b32.xlu2 %v3193_v0, %s3577_s28 }
 0x248   : > { %3194 = vtanh.f32 %v4139_v41 }
 0x249   : > { %3196 = vpow2.f32 %v2998_v3 }
 0x24a   : > { %3198 = vpow2.f32 %v3000_v56 }
 0x24e   : > { %v3195_v62 = vpop.eup %3194 }
 0x24f   : > { %822 = vrot.lane.b32.xlu2 %v3195_v62, %s3577_s28  ;;  %v3197_v51 = vpop.eup %3196 }
 0x250   : > { %v729_v11 = vadd.f32 1.0, %v3197_v51  ;;  %v3199_v40 = vpop.eup %3198 }
 0x251   : > { %v731_v24 = vadd.f32 1.0, %v3199_v40 }
 0x252   : > { %3200 = vrcp.f32 %v729_v11  ;;  %v758_v42 = vand.u32 2147483648, %v729_v11  ;;  %vm752_vm13 = vweird.f32 %v729_v11  ;;  %v756_v39 = vand.u32 2147483647, %v729_v11 }
 0x253   : > { %3202 = vrcp.f32 %v731_v24  ;;  %v788_v40 = vand.u32 2147483648, %v731_v24  ;;  %vm782_vm7 = vweird.f32 %v731_v24 }
 0x254   : > { %v759_v0 = vor.u32 1.1754944e-38, %v758_v42  ;;  %vm757_vm15 = vcmp.eq.f32.partialorder %v756_v39, 8.507059e+37 }
 0x258   : > { %v3201_v43 = vpop.eup %3200 }
 0x259   : > { %v748_v60 = vmul.f32 %v3201_v43, %v729_v11  ;;  %v3203_v46 = vpop.eup %3202  ;;  %vm753_vm12 = vweird.f32 %v3201_v43  ;;  %v786_v11 = vand.u32 2147483647, %v731_v24 }
 0x25a   : > { %v778_v8 = vmul.f32 %v3203_v46, %v731_v24  ;;  %vm754_vm14 = vmor %vm752_vm13, %vm753_vm12  ;;  %vm783_vm6 = vweird.f32 %v3203_v46 }
 0x25b   : > { %v749_v63 = vsub.f32 1.0, %v748_v60  ;;  %vm784_vm8 = vmor %vm782_vm7, %vm783_vm6  ;;  %v789_v60 = vor.u32 1.1754944e-38, %v788_v40  ;;  %vm787_vm9 = vcmp.eq.f32.partialorder %v786_v11, 8.507059e+37 }
 0x25c   : > { %v779_v4 = vsub.f32 1.0, %v778_v8 }
 0x25d   : > { %v750_v55 = vmul.f32 %v3201_v43, %v749_v63 }
 0x25e   : > { %v780_v45 = vmul.f32 %v3203_v46, %v779_v4 }
 0x25f   : > { %v751_v12 = vadd.f32 %v3201_v43, %v750_v55 }
 0x260   : > { %v781_v51 = vadd.f32 %v3203_v46, %v780_v45 }
 0x261   : > { %v755_v1 = vsel %vm754_vm14, %v3201_v43, %v751_v12 }
 0x262   : > { %v760_v62 = vsel %vm757_vm15, %v759_v0, %v755_v1  ;;  %v785_v43 = vsel %vm784_vm8, %v3203_v46, %v781_v51 }
 0x263   : > { %v790_v63 = vsel %vm787_vm9, %v789_v60, %v785_v43 }
 0x2a1   : > { %v821_v3 = vpop.permute.xlu2 %820 }
 0x2a2   : > { %v826_v56 = vmul.f32 %v821_v3, %v760_v62 }
 0x2a4   : > { %829 = vst.msk [vmem:[#allocation3] sm:$0xff] %vm828_vm1, %v826_v56  ;;  %3001 = vmatmul.msk.f32.vlgmr.msra.gmra.mxu2 %vm662_vm4, %v826_v56  ;;  %3003 = vmatmul.msk.f32.vlgmr.msra.gmra.mxu3 %vm662_vm4, %v826_v56 }
 0x2a5   : > { %832 = vst.msk [vmem:[#allocation3 + $0x70] sm:$0xff] %vm831_vm5, %v826_v56  ;;  %1299 = vmatpush.msra.mxu3 %v3818_v22  ;;  %1276 = vmatpush.msra.mxu2 %v3801_v17 }
 0x2a7   : > { %1300 = vmatpush.msra.mxu3 %v3837_v27  ;;  %1277 = vmatpush.msra.mxu2 %v3803_v18  ;;  %v5087_v18 = vsel %vm3981_vm3, %v4057_v38, %v4059_v13 }
 0x2a9   : > { %v823_v55 = vpop.permute.xlu2 %822  ;;  %1301 = vmatpush.msra.mxu3 %v3841_v30  ;;  %1278 = vmatpush.msra.mxu2 %v3812_v20  ;;  %v842_v30 = vsel %vm3910_vm2, %v3969_v10, %v3966_v9 }
 0x2aa   : > { %v827_v24 = vmul.f32 %v823_v55, %v790_v63 }
 0x2ab   : > { %1302 = vmatpush.msra.mxu3 %v3851_v32  ;;  %1279 = vmatpush.msra.mxu2 %v3816_v21 }
 0x2ac   : > { %830 = vst.msk [vmem:[#allocation3 + $0x8] sm:$0xff] %vm828_vm1, %v827_v24  ;;  %3002 = vmatmul.msk.f32.gmra.mxu2 %vm662_vm4, %v827_v24  ;;  %3004 = vmatmul.msk.f32.gmra.mxu3 %vm662_vm4, %v827_v24 }
 0x2ad   : > { %833 = vst.msk [vmem:[#allocation3 + $0x78] sm:$0xff] %vm831_vm5, %v827_v24  ;;  %1303 = vmatpush.msra.mxu3 %v3856_v33  ;;  %1280 = vmatpush.msra.mxu2 %v3820_v23  ;;  %v5088_v23 = vsel %vm3981_vm3, %v4069_v5, %v4071_v61 }
 0x2af   : > { %1304 = vmatpush.msra.mxu3 %v3861_v34  ;;  %1281 = vmatpush.msra.mxu2 %v3829_v25 }
 0x2b1   : > { %1305 = vmatpush.msra.mxu3 %v3867_v35  ;;  %1282 = vmatpush.msra.mxu2 %v3833_v26  ;;  %v844_v35 = vsel %vm3910_vm2, %v3979_v19, %v3976_v16 }
 0x2b3   : > { %1306 = vmatpush.msra.mxu3 %v3873_v36 }
 0x327   : > { %v908_v17 = vpop.f32.mrf.mxu3  ;;  %v885_v27 = vpop.f32.mrf.mxu2 }
 0x328   : > { %v4174_v20 = vadd.f32 %v908_v17, %v5087_v18  ;;  %v914_v32 = vadd.f32 %v885_v27, %v842_v30 }
 0x32a   : > { %3204 = vtanh.f32 %v4174_v20  ;;  %v3005_v33 = vmul.f32 -1.442695, %v914_v32 }
 0x32f   : > { %v911_v21 = vpop.f32.mrf.mxu3  ;;  %v888_v34 = vpop.f32.mrf.mxu2 }
 0x330   : > { %v3205_v22 = vpop.eup %3204  ;;  %v4182_v25 = vadd.f32 %v911_v21, %v5088_v23  ;;  %v916_v36 = vadd.f32 %v888_v34, %v844_v35 }
 0x331   : > { %1000 = vrot.lane.b32.xlu0 %v3205_v22, %s3577_s28 }
 0x332   : > { %3206 = vtanh.f32 %v4182_v25  ;;  %v3007_v46 = vmul.f32 -1.442695, %v916_v36 }
 0x333   : > { %3208 = vpow2.f32 %v3005_v33 }
 0x334   : > { %3210 = vpow2.f32 %v3007_v46 }
 0x338   : > { %v3207_v26 = vpop.eup %3206 }
 0x339   : > { %1002 = vrot.lane.b32.xlu1 %v3207_v26, %s3577_s28  ;;  %v3209_v8 = vpop.eup %3208 }
 0x33a   : > { %v930_v12 = vadd.f32 1.0, %v3209_v8  ;;  %v3211_v4 = vpop.eup %3210 }
 0x33b   : > { %v932_v42 = vadd.f32 1.0, %v3211_v4 }
 0x33c   : > { %3212 = vrcp.f32 %v930_v12  ;;  %v945_v40 = vand.u32 2147483648, %v930_v12  ;;  %vm939_vm11 = vweird.f32 %v930_v12  ;;  %v943_v11 = vand.u32 2147483647, %v930_v12 }
 0x33d   : > { %3214 = vrcp.f32 %v932_v42  ;;  %v975_v21 = vand.u32 2147483648, %v932_v42  ;;  %vm969_vm15 = vweird.f32 %v932_v42  ;;  %v973_v22 = vand.u32 2147483647, %v932_v42 }
 0x33e   : > { %v946_v63 = vor.u32 1.1754944e-38, %v945_v40  ;;  %vm944_vm13 = vcmp.eq.f32.partialorder %v943_v11, 8.507059e+37 }
 0x33f   : > { %v976_v26 = vor.u32 1.1754944e-38, %v975_v21  ;;  %vm974_vm7 = vcmp.eq.f32.partialorder %v973_v22, 8.507059e+37 }
 0x342   : > { %v3213_v39 = vpop.eup %3212 }
 0x343   : > { %v935_v1 = vmul.f32 %v3213_v39, %v930_v12  ;;  %v3215_v0 = vpop.eup %3214  ;;  %vm940_vm10 = vweird.f32 %v3213_v39 }
 0x344   : > { %v965_v3 = vmul.f32 %v3215_v0, %v932_v42  ;;  %vm941_vm12 = vmor %vm939_vm11, %vm940_vm10  ;;  %vm970_vm14 = vweird.f32 %v3215_v0  ;;  %v3008_v42 = vmul.f32 -1.442695, %v4182_v25 }
 0x345   : > { %v936_v45 = vsub.f32 1.0, %v935_v1  ;;  %vm971_vm6 = vmor %vm969_vm15, %vm970_vm14 }
 0x346   : > { %v966_v51 = vsub.f32 1.0, %v965_v3 }
 0x347   : > { %v937_v62 = vmul.f32 %v3213_v39, %v936_v45 }
 0x348   : > { %v967_v60 = vmul.f32 %v3215_v0, %v966_v51 }
 0x349   : > { %v938_v56 = vadd.f32 %v3213_v39, %v937_v62 }
 0x34a   : > { %v968_v18 = vadd.f32 %v3215_v0, %v967_v60 }
 0x34b   : > { %v942_v43 = vsel %vm941_vm12, %v3213_v39, %v938_v56 }
 0x34c   : > { %v947_v24 = vsel %vm944_vm13, %v946_v63, %v942_v43  ;;  %v972_v23 = vsel %vm971_vm6, %v3215_v0, %v968_v18 }
 0x34d   : > { %v977_v30 = vsel %vm974_vm7, %v976_v26, %v972_v23  ;;  %v996_v33 = vmul.f32 %v947_v24, %v4136_v28  ;;  %v3006_v28 = vmul.f32 -1.442695, %v4174_v20 }
 0x34e   : > { %v997_v46 = vmul.f32 %v977_v30, %v4139_v41 }
 0x3a3   : > { %v1001_v55 = vpop.permute.xlu0 %1000 }
 0x3a4   : > { %v1006_v17 = vmul.f32 %v1001_v55, %v947_v24 }
 0x3a6   : > { %1010 = vrot.lane.b32.xlu2 %v1006_v17, %s3577_s28 }
 0x3ab   : > { %v1003_v27 = vpop.permute.xlu1 %1002 }
 0x3ac   : > { %v1007_v32 = vmul.f32 %v1003_v27, %v977_v30 }
 0x3ae   : > { %1012 = vrot.lane.b32.xlu0 %v1007_v32, %s3577_s28 }
 0x400   : > { %v1011_v34 = vpop.permute.xlu2 %1010 }
 0x401   : > { %v4198_v35 = vadd.f32 %v1011_v34, %v996_v33 }
 0x403   : > { %3216 = vtanh.f32 %v4198_v35 }
 0x409   : > { %v3217_v36 = vpop.eup %3216 }
 0x40a   : > { %1022 = vrot.lane.b32.xlu1 %v3217_v36, %s3577_s28  ;;  %v5089_v36 = vsel %vm3981_vm3, %v4029_v14, %v4031_v15 }
 0x420   : > { %v1013_v8 = vpop.permute.xlu0 %1012 }
 0x421   : > { %v4203_v12 = vadd.f32 %v1013_v8, %v997_v46 }
 0x423   : > { %3218 = vtanh.f32 %v4203_v12 }
 0x424   : > { %3220 = vpow2.f32 %v3006_v28  ;;  %v5090_v28 = vsel %vm3981_vm3, %v4045_v2, %v4047_v7 }
 0x425   : > { %3222 = vpow2.f32 %v3008_v42 }
 0x429   : > { %v3219_v4 = vpop.eup %3218 }
 0x42a   : > { %1024 = vrot.lane.b32.xlu2 %v3219_v4, %s3577_s28  ;;  %v3221_v39 = vpop.eup %3220 }
 0x42b   : > { %v931_v1 = vadd.f32 1.0, %v3221_v39  ;;  %v3223_v45 = vpop.eup %3222 }
 0x42c   : > { %v933_v0 = vadd.f32 1.0, %v3223_v45  ;;  %v1042_v45 = vsel %vm3910_vm2, %v4120_v6, %v4117_v57 }
 0x42d   : > { %3224 = vrcp.f32 %v931_v1  ;;  %v960_v20 = vand.u32 2147483648, %v931_v1  ;;  %vm954_vm9 = vweird.f32 %v931_v1  ;;  %v958_v60 = vand.u32 2147483647, %v931_v1 }
 0x42e   : > { %3226 = vrcp.f32 %v933_v0  ;;  %v990_v22 = vand.u32 2147483648, %v933_v0  ;;  %vm984_vm13 = vweird.f32 %v933_v0  ;;  %v988_v23 = vand.u32 2147483647, %v933_v0 }
 0x42f   : > { %v961_v55 = vor.u32 1.1754944e-38, %v960_v20  ;;  %vm959_vm11 = vcmp.eq.f32.partialorder %v958_v60, 8.507059e+37 }
 0x430   : > { %v991_v27 = vor.u32 1.1754944e-38, %v990_v22  ;;  %vm989_vm15 = vcmp.eq.f32.partialorder %v988_v23, 8.507059e+37 }
 0x433   : > { %v3225_v41 = vpop.eup %3224 }
 0x434   : > { %v950_v62 = vmul.f32 %v3225_v41, %v931_v1  ;;  %v3227_v56 = vpop.eup %3226  ;;  %vm955_vm8 = vweird.f32 %v3225_v41 }
 0x435   : > { %v980_v40 = vmul.f32 %v3227_v56, %v933_v0  ;;  %vm956_vm10 = vmor %vm954_vm9, %vm955_vm8  ;;  %vm985_vm12 = vweird.f32 %v3227_v56 }
 0x436   : > { %v951_v3 = vsub.f32 1.0, %v950_v62  ;;  %vm986_vm14 = vmor %vm984_vm13, %vm985_vm12 }
 0x437   : > { %v981_v43 = vsub.f32 1.0, %v980_v40 }
 0x438   : > { %v952_v51 = vmul.f32 %v3225_v41, %v951_v3  ;;  %v1044_v3 = vsel %vm3910_vm2, %v3915_v48, %v3918_v49 }
 0x439   : > { %v982_v63 = vmul.f32 %v3227_v56, %v981_v43 }
 0x43a   : > { %v953_v11 = vadd.f32 %v3225_v41, %v952_v51 }
 0x43b   : > { %v983_v21 = vadd.f32 %v3227_v56, %v982_v63 }
 0x43c   : > { %v957_v25 = vsel %vm956_vm10, %v3225_v41, %v953_v11 }
 0x43d   : > { %v962_v24 = vsel %vm959_vm11, %v961_v55, %v957_v25  ;;  %v987_v26 = vsel %vm986_vm14, %v3227_v56, %v983_v21 }
 0x43e   : > { %v992_v30 = vsel %vm989_vm15, %v991_v27, %v987_v26 }
 0x47c   : > { %v1023_v17 = vpop.permute.xlu1 %1022 }
 0x47d   : > { %v1028_v18 = vmul.f32 %v1023_v17, %v962_v24 }
 0x47f   : > { %1030 = vst.msk [vmem:[#allocation3 + $0x10] sm:$0xff] %vm828_vm1, %v1028_v18  ;;  %3009 = vmatmul.msk.f32.vlgmr.msrb.gmra.mxu2 %vm662_vm4, %v1028_v18  ;;  %3011 = vmatmul.msk.f32.vlgmr.msrb.gmra.mxu3 %vm662_vm4, %v1028_v18 }
 0x480   : > { %1032 = vst.msk [vmem:[#allocation3 + $0x60] sm:$0xff] %vm831_vm5, %v1028_v18 }
 0x484   : > { %v1025_v32 = vpop.permute.xlu2 %1024 }
 0x485   : > { %v1029_v33 = vmul.f32 %v1025_v32, %v992_v30 }
 0x487   : > { %1031 = vst.msk [vmem:[#allocation3 + $0x18] sm:$0xff] %vm828_vm1, %v1029_v33  ;;  %3010 = vmatmul.msk.f32.gmra.mxu2 %vm662_vm4, %v1029_v33  ;;  %3012 = vmatmul.msk.f32.gmra.mxu3 %vm662_vm4, %v1029_v33 }
 0x488   : > { %1033 = vst.msk [vmem:[#allocation3 + $0x68] sm:$0xff] %vm831_vm5, %v1029_v33 }
 0x502   : > { %v1108_v34 = vpop.f32.mrf.mxu3  ;;  %v1085_v1 = vpop.f32.mrf.mxu2 }
 0x503   : > { %v4222_v46 = vadd.f32 %v1108_v34, %v5089_v36  ;;  %v1114_v0 = vadd.f32 %v1085_v1, %v1042_v45 }
 0x505   : > { %3228 = vtanh.f32 %v4222_v46  ;;  %v3013_v41 = vmul.f32 -1.442695, %v1114_v0 }
 0x50a   : > { %v1111_v8 = vpop.f32.mrf.mxu3  ;;  %v1088_v62 = vpop.f32.mrf.mxu2 }
 0x50b   : > { %v3229_v4 = vpop.eup %3228  ;;  %v4230_v42 = vadd.f32 %v1111_v8, %v5090_v28  ;;  %v1116_v56 = vadd.f32 %v1088_v62, %v1044_v3 }
 0x50c   : > { %1200 = vrot.lane.b32.xlu0 %v3229_v4, %s3577_s28 }
 0x50d   : > { %3230 = vtanh.f32 %v4230_v42  ;;  %v3015_v51 = vmul.f32 -1.442695, %v1116_v56 }
 0x50e   : > { %3232 = vpow2.f32 %v3013_v41 }
 0x50f   : > { %3234 = vpow2.f32 %v3015_v51 }
 0x513   : > { %v3231_v39 = vpop.eup %3230 }
 0x514   : > { %1202 = vrot.lane.b32.xlu1 %v3231_v39, %s3577_s28  ;;  %v3233_v40 = vpop.eup %3232 }
 0x515   : > { %v1130_v11 = vadd.f32 1.0, %v3233_v40  ;;  %v3235_v43 = vpop.eup %3234 }
 0x516   : > { %v1132_v20 = vadd.f32 1.0, %v3235_v43 }
 0x517   : > { %3236 = vrcp.f32 %v1130_v11  ;;  %v1145_v22 = vand.u32 2147483648, %v1130_v11  ;;  %vm1139_vm7 = vweird.f32 %v1130_v11  ;;  %v1143_v23 = vand.u32 2147483647, %v1130_v11 }
 0x518   : > { %3238 = vrcp.f32 %v1132_v20  ;;  %v1175_v8 = vand.u32 2147483648, %v1132_v20  ;;  %vm1169_vm11 = vweird.f32 %v1132_v20  ;;  %v1173_v4 = vand.u32 2147483647, %v1132_v20 }
 0x519   : > { %v1146_v30 = vor.u32 1.1754944e-38, %v1145_v22  ;;  %vm1144_vm9 = vcmp.eq.f32.partialorder %v1143_v23, 8.507059e+37 }
 0x51a   : > { %v1176_v39 = vor.u32 1.1754944e-38, %v1175_v8  ;;  %vm1174_vm13 = vcmp.eq.f32.partialorder %v1173_v4, 8.507059e+37 }
 0x51d   : > { %v3237_v60 = vpop.eup %3236 }
 0x51e   : > { %v1135_v25 = vmul.f32 %v3237_v60, %v1130_v11  ;;  %v3239_v55 = vpop.eup %3238  ;;  %vm1140_vm6 = vweird.f32 %v3237_v60 }
 0x51f   : > { %v1165_v17 = vmul.f32 %v3239_v55, %v1132_v20  ;;  %vm1141_vm8 = vmor %vm1139_vm7, %vm1140_vm6  ;;  %vm1170_vm10 = vweird.f32 %v3239_v55  ;;  %v3016_v20 = vmul.f32 -1.442695, %v4230_v42 }
 0x520   : > { %v1136_v63 = vsub.f32 1.0, %v1135_v25  ;;  %vm1171_vm12 = vmor %vm1169_vm11, %vm1170_vm10 }
 0x521   : > { %v1166_v21 = vsub.f32 1.0, %v1165_v17 }
 0x522   : > { %v1137_v24 = vmul.f32 %v3237_v60, %v1136_v63  ;;  %v4257_v63 = vld [vmem:[#allocation7] sm:$0xff] }
 0x523   : > { %v1167_v27 = vmul.f32 %v3239_v55, %v1166_v21  ;;  %1283 = vmatpush.msra.mxu2 %v4257_v63 }
 0x524   : > { %v1138_v18 = vadd.f32 %v3237_v60, %v1137_v24 }
 0x525   : > { %v1168_v36 = vadd.f32 %v3239_v55, %v1167_v27 }
 0x526   : > { %v1142_v26 = vsel %vm1141_vm8, %v3237_v60, %v1138_v18 }
 0x527   : > { %v1147_v33 = vsel %vm1144_vm9, %v1146_v30, %v1142_v26  ;;  %v1172_v28 = vsel %vm1171_vm12, %v3239_v55, %v1168_v36 }
 0x528   : > { %v1177_v45 = vsel %vm1174_vm13, %v1176_v39, %v1172_v28  ;;  %v1196_v41 = vmul.f32 %v1147_v33, %v4198_v35  ;;  %v3014_v35 = vmul.f32 -1.442695, %v4222_v46 }
 0x529   : > { %v1197_v51 = vmul.f32 %v1177_v45, %v4203_v12 }
 0x57e   : > { %v1201_v32 = vpop.permute.xlu0 %1200 }
 0x57f   : > { %v1206_v34 = vmul.f32 %v1201_v32, %v1147_v33 }
 0x581   : > { %1210 = vrot.lane.b32.xlu2 %v1206_v34, %s3577_s28 }
 0x586   : > { %v1203_v1 = vpop.permute.xlu1 %1202 }
 0x587   : > { %v1207_v0 = vmul.f32 %v1203_v1, %v1177_v45 }
 0x589   : > { %1212 = vrot.lane.b32.xlu0 %v1207_v0, %s3577_s28 }
 0x5db   : > { %v1211_v62 = vpop.permute.xlu2 %1210 }
 0x5dc   : > { %v4246_v3 = vadd.f32 %v1211_v62, %v1196_v41 }
 0x5de   : > { %3240 = vtanh.f32 %v4246_v3 }
 0x5e4   : > { %v3241_v56 = vpop.eup %3240 }
 0x5e5   : > { %1222 = vrot.lane.b32.xlu1 %v3241_v56, %s3577_s28 }
 0x5fb   : > { %v1213_v40 = vpop.permute.xlu0 %1212 }
 0x5fc   : > { %v4251_v11 = vadd.f32 %v1213_v40, %v1197_v51  ;;  %v5091_v51 = vsel %vm3981_vm3, %v3985_v31, %v3987_v37 }
 0x5fe   : > { %3242 = vtanh.f32 %v4251_v11 }
 0x5ff   : > { %3244 = vpow2.f32 %v3014_v35 }
 0x600   : > { %3246 = vpow2.f32 %v3016_v20  ;;  %v5092_v20 = vsel %vm3981_vm3, %v4007_v50, %v4009_v52 }
 0x604   : > { %v3243_v43 = vpop.eup %3242 }
 0x605   : > { %1224 = vrot.lane.b32.xlu2 %v3243_v43, %s3577_s28  ;;  %v3245_v60 = vpop.eup %3244 }
 0x606   : > { %v1131_v25 = vadd.f32 1.0, %v3245_v60  ;;  %v3247_v12 = vpop.eup %3246 }
 0x607   : > { %v1133_v55 = vadd.f32 1.0, %v3247_v12 }
 0x608   : > { %3248 = vrcp.f32 %v1131_v25  ;;  %v1160_v26 = vand.u32 2147483648, %v1131_v25  ;;  %vm1154_vm15 = vweird.f32 %v1131_v25  ;;  %v1158_v27 = vand.u32 2147483647, %v1131_v25 }
 0x609   : > { %3250 = vrcp.f32 %v1133_v55  ;;  %v1190_v28 = vand.u32 2147483648, %v1133_v55  ;;  %vm1184_vm9 = vweird.f32 %v1133_v55  ;;  %v1188_v39 = vand.u32 2147483647, %v1133_v55 }
 0x60a   : > { %v1161_v33 = vor.u32 1.1754944e-38, %v1160_v26  ;;  %vm1159_vm7 = vcmp.eq.f32.partialorder %v1158_v27, 8.507059e+37 }
 0x60b   : > { %v1191_v45 = vor.u32 1.1754944e-38, %v1190_v28  ;;  %vm1189_vm11 = vcmp.eq.f32.partialorder %v1188_v39, 8.507059e+37 }
 0x60e   : > { %v3249_v24 = vpop.eup %3248 }
 0x60f   : > { %v1150_v17 = vmul.f32 %v3249_v24, %v1131_v25  ;;  %v3251_v21 = vpop.eup %3250  ;;  %vm1155_vm14 = vweird.f32 %v3249_v24 }
 0x610   : > { %v1180_v46 = vmul.f32 %v3251_v21, %v1133_v55  ;;  %vm1156_vm6 = vmor %vm1154_vm15, %vm1155_vm14  ;;  %vm1185_vm8 = vweird.f32 %v3251_v21  ;;  %v5093_v55 = vsel %vm3910_vm2, %v3930_v53, %v3933_v54 }
 0x611   : > { %v1151_v18 = vsub.f32 1.0, %v1150_v17  ;;  %vm1186_vm10 = vmor %vm1184_vm9, %vm1185_vm8 }
 0x612   : > { %v1181_v42 = vsub.f32 1.0, %v1180_v46 }
 0x613   : > { %v1152_v22 = vmul.f32 %v3249_v24, %v1151_v18 }
 0x614   : > { %v1182_v32 = vmul.f32 %v3251_v21, %v1181_v42 }
 0x615   : > { %v1153_v23 = vadd.f32 %v3249_v24, %v1152_v22 }
 0x616   : > { %v1183_v4 = vadd.f32 %v3251_v21, %v1182_v32 }
 0x617   : > { %v1157_v30 = vsel %vm1156_vm6, %v3249_v24, %v1153_v23 }
 0x618   : > { %v1162_v34 = vsel %vm1159_vm7, %v1161_v33, %v1157_v30  ;;  %v1187_v1 = vsel %vm1186_vm10, %v3251_v21, %v1183_v4  ;;  %v5094_v21 = vsel %vm3910_vm2, %v3946_v58, %v3949_v59 }
 0x619   : > { %v1192_v0 = vsel %vm1189_vm11, %v1191_v45, %v1187_v1 }
 0x657   : > { %v1223_v36 = vpop.permute.xlu1 %1222 }
 0x658   : > { %v1228_v8 = vmul.f32 %v1223_v36, %v1162_v34 }
 0x65a   : > { %1230 = vst.msk [vmem:[#allocation3 + $0x20] sm:$0xff] %vm828_vm1, %v1228_v8  ;;  %3017 = vmatmul.msk.f32.vlgmr.msra.gmra.mxu2 %vm662_vm4, %v1228_v8  ;;  %3019 = vmatmul.msk.f32.vlgmr.msra.gmra.mxu3 %vm662_vm4, %v1228_v8 }
 0x65b   : > { %1232 = vst.msk [vmem:[#allocation3 + $0x50] sm:$0xff] %vm831_vm5, %v1228_v8 }
 0x65f   : > { %v1225_v41 = vpop.permute.xlu2 %1224 }
 0x660   : > { %v1229_v62 = vmul.f32 %v1225_v41, %v1192_v0 }
 0x662   : > { %1231 = vst.msk [vmem:[#allocation3 + $0x28] sm:$0xff] %vm828_vm1, %v1229_v62  ;;  %3018 = vmatmul.msk.f32.gmra.mxu2 %vm662_vm4, %v1229_v62  ;;  %3020 = vmatmul.msk.f32.gmra.mxu3 %vm662_vm4, %v1229_v62 }
 0x663   : > { %1233 = vst.msk [vmem:[#allocation3 + $0x58] sm:$0xff] %vm831_vm5, %v1229_v62 }
 0x6dd   : > { %v1308_v56 = vpop.f32.mrf.mxu3  ;;  %v1285_v12 = vpop.f32.mrf.mxu2 }
 0x6de   : > { %v4273_v40 = vadd.f32 %v1308_v56, %v5091_v51  ;;  %v1314_v24 = vadd.f32 %v1285_v12, %v5093_v55 }
 0x6e0   : > { %3252 = vtanh.f32 %v4273_v40  ;;  %v3021_v17 = vmul.f32 -1.442695, %v1314_v24 }
 0x6e5   : > { %v1311_v43 = vpop.f32.mrf.mxu3  ;;  %v1288_v18 = vpop.f32.mrf.mxu2 }
 0x6e6   : > { %v3253_v35 = vpop.eup %3252  ;;  %v4281_v60 = vadd.f32 %v1311_v43, %v5092_v20  ;;  %v1316_v22 = vadd.f32 %v1288_v18, %v5094_v21 }
 0x6e7   : > { %1400 = vrot.lane.b32.xlu0 %v3253_v35, %s3577_s28 }
 0x6e8   : > { %3254 = vtanh.f32 %v4281_v60  ;;  %v3023_v46 = vmul.f32 -1.442695, %v1316_v22 }
 0x6e9   : > { %3256 = vpow2.f32 %v3021_v17 }
 0x6ea   : > { %3258 = vpow2.f32 %v3023_v46 }
 0x6ee   : > { %v3255_v25 = vpop.eup %3254 }
 0x6ef   : > { %1402 = vrot.lane.b32.xlu1 %v3255_v25, %s3577_s28  ;;  %v3257_v23 = vpop.eup %3256 }
 0x6f0   : > { %v1330_v42 = vadd.f32 1.0, %v3257_v23  ;;  %v3259_v26 = vpop.eup %3258  ;;  %v4303_v23 = vld [vmem:[#allocation7 + $0x78] sm:$0xff] }
 0x6f1   : > { %v1332_v27 = vadd.f32 1.0, %v3259_v26  ;;  %v4307_v26 = vld [vmem:[#allocation7 + $0x68] sm:$0xff]  ;;  %1499 = vmatpush.msrb.mxu3 %v4303_v23 }
 0x6f2   : > { %3260 = vrcp.f32 %v1330_v42  ;;  %v1345_v39 = vand.u32 2147483648, %v1330_v42  ;;  %vm1339_vm13 = vweird.f32 %v1330_v42  ;;  %v1343_v1 = vand.u32 2147483647, %v1330_v42 }
 0x6f3   : > { %3262 = vrcp.f32 %v1332_v27  ;;  %v1375_v35 = vand.u32 2147483648, %v1332_v27  ;;  %vm1369_vm7 = vweird.f32 %v1332_v27  ;;  %v1373_v20 = vand.u32 2147483647, %v1332_v27  ;;  %1500 = vmatpush.msrb.mxu3 %v4307_v26 }
 0x6f4   : > { %v1346_v41 = vor.u32 1.1754944e-38, %v1345_v39  ;;  %vm1344_vm15 = vcmp.eq.f32.partialorder %v1343_v1, 8.507059e+37  ;;  %v4339_v39 = vld [vmem:[#allocation7 + $0x10] sm:$0xff] }
 0x6f5   : > { %v1376_v12 = vor.u32 1.1754944e-38, %v1375_v35  ;;  %vm1374_vm9 = vcmp.eq.f32.partialorder %v1373_v20, 8.507059e+37 }
 0x6f8   : > { %v3261_v30 = vpop.eup %3260 }
 0x6f9   : > { %v1335_v32 = vmul.f32 %v3261_v30, %v1330_v42  ;;  %v3263_v34 = vpop.eup %3262  ;;  %vm1340_vm12 = vweird.f32 %v3261_v30  ;;  %v4305_v42 = vld [vmem:[#allocation7 + $0x70] sm:$0xff] }
 0x6fa   : > { %v1365_v8 = vmul.f32 %v3263_v34, %v1332_v27  ;;  %vm1341_vm14 = vmor %vm1339_vm13, %vm1340_vm12  ;;  %vm1370_vm6 = vweird.f32 %v3263_v34  ;;  %1476 = vmatpush.msrb.mxu2 %v4305_v42  ;;  %v4311_v27 = vld [vmem:[#allocation7 + $0x60] sm:$0xff] }
 0x6fb   : > { %v1336_v33 = vsub.f32 1.0, %v1335_v32  ;;  %vm1371_vm8 = vmor %vm1369_vm7, %vm1370_vm6  ;;  %v4319_v32 = vld [vmem:[#allocation7 + $0x48] sm:$0xff] }
 0x6fc   : > { %v1366_v28 = vsub.f32 1.0, %v1365_v8  ;;  %1477 = vmatpush.msrb.mxu2 %v4311_v27  ;;  %v4331_v8 = vld [vmem:[#allocation7 + $0x28] sm:$0xff] }
 0x6fd   : > { %v1337_v36 = vmul.f32 %v3261_v30, %v1336_v33  ;;  %v4321_v33 = vld [vmem:[#allocation7 + $0x40] sm:$0xff] }
 0x6fe   : > { %v1367_v0 = vmul.f32 %v3263_v34, %v1366_v28  ;;  %v4337_v28 = vld [vmem:[#allocation7 + $0x18] sm:$0xff] }
 0x6ff   : > { %v1338_v4 = vadd.f32 %v3261_v30, %v1337_v36  ;;  %v4327_v36 = vld [vmem:[#allocation7 + $0x30] sm:$0xff] }
 0x700   : > { %v1368_v43 = vadd.f32 %v3263_v34, %v1367_v0 }
 0x701   : > { %v1342_v45 = vsel %vm1341_vm14, %v3261_v30, %v1338_v4  ;;  %v4315_v30 = vld [vmem:[#allocation7 + $0x50] sm:$0xff]  ;;  %v4333_v4 = vld [vmem:[#allocation7 + $0x20] sm:$0xff] }
 0x702   : > { %v1347_v56 = vsel %vm1344_vm15, %v1346_v41, %v1342_v45  ;;  %v1372_v25 = vsel %vm1371_vm8, %v3263_v34, %v1368_v43  ;;  %1478 = vmatpush.msrb.mxu2 %v4315_v30  ;;  %v4325_v34 = vld [vmem:[#allocation7 + $0x38] sm:$0xff]  ;;  %v4361_v43 = vld [vmem:[#allocation7 + $0x8] sm:$0xff] }
 0x703   : > { %v1377_v24 = vsel %vm1374_vm9, %v1376_v12, %v1372_v25  ;;  %v1396_v18 = vmul.f32 %v1347_v56, %v4246_v3  ;;  %v4313_v3 = vld [vmem:[#allocation7 + $0x58] sm:$0xff] }
 0x704   : > { %1501 = vmatpush.msrb.mxu3 %v4313_v3  ;;  %1479 = vmatpush.msrb.mxu2 %v4321_v33  ;;  %v1397_v1 = vmul.f32 %v1377_v24, %v4251_v11  ;;  %v3022_v11 = vmul.f32 -1.442695, %v4273_v40 }
 0x706   : > { %1502 = vmatpush.msrb.mxu3 %v4319_v32  ;;  %1480 = vmatpush.msrb.mxu2 %v4327_v36 }
 0x708   : > { %1503 = vmatpush.msrb.mxu3 %v4325_v34  ;;  %1481 = vmatpush.msrb.mxu2 %v4333_v4 }
 0x70a   : > { %1504 = vmatpush.msrb.mxu3 %v4331_v8  ;;  %1482 = vmatpush.msrb.mxu2 %v4339_v39 }
 0x70c   : > { %1505 = vmatpush.msrb.mxu3 %v4337_v28  ;;  %1483 = vmatpush.msrb.mxu2 %v4257_v63 }
 0x70e   : > { %1676 = vmatpush.msra.mxu2 %v4305_v42  ;;  %1506 = vmatpush.msrb.mxu3 %v4361_v43 }
 0x710   : > { %1677 = vmatpush.msra.mxu2 %v4311_v27  ;;  %1699 = vmatpush.msra.mxu3 %v4303_v23 }
 0x712   : > { %1678 = vmatpush.msra.mxu2 %v4315_v30  ;;  %1700 = vmatpush.msra.mxu3 %v4307_v26 }
 0x714   : > { %1679 = vmatpush.msra.mxu2 %v4321_v33  ;;  %1701 = vmatpush.msra.mxu3 %v4313_v3 }
 0x716   : > { %1680 = vmatpush.msra.mxu2 %v4327_v36  ;;  %1702 = vmatpush.msra.mxu3 %v4319_v32 }
 0x718   : > { %1681 = vmatpush.msra.mxu2 %v4333_v4  ;;  %1703 = vmatpush.msra.mxu3 %v4325_v34 }
 0x71a   : > { %1682 = vmatpush.msra.mxu2 %v4339_v39  ;;  %1704 = vmatpush.msra.mxu3 %v4331_v8 }
 0x71c   : > { %1683 = vmatpush.msra.mxu2 %v4257_v63  ;;  %1705 = vmatpush.msra.mxu3 %v4337_v28 }
 0x71e   : > { %1706 = vmatpush.msra.mxu3 %v4361_v43 }
 0x759   : > { %v1401_v62 = vpop.permute.xlu0 %1400 }
 0x75a   : > { %v1406_v51 = vmul.f32 %v1401_v62, %v1347_v56  ;;  %v3024_v62 = vmul.f32 -1.442695, %v4281_v60 }
 0x75c   : > { %1410 = vrot.lane.b32.xlu2 %v1406_v51, %s3577_s28 }
 0x761   : > { %v1403_v55 = vpop.permute.xlu1 %1402 }
 0x762   : > { %v1407_v17 = vmul.f32 %v1403_v55, %v1377_v24 }
 0x764   : > { %1412 = vrot.lane.b32.xlu0 %v1407_v17, %s3577_s28 }
 0x7b6   : > { %v1411_v21 = vpop.permute.xlu2 %1410 }
 0x7b7   : > { %v4299_v22 = vadd.f32 %v1411_v21, %v1396_v18 }
 0x7b9   : > { %3264 = vtanh.f32 %v4299_v22 }
 0x7bf   : > { %v3265_v46 = vpop.eup %3264 }
 0x7c0   : > { %1422 = vrot.lane.b32.xlu1 %v3265_v46, %s3577_s28 }
 0x7d6   : > { %v1413_v45 = vpop.permute.xlu0 %1412 }
 0x7d7   : > { %v4351_v0 = vadd.f32 %v1413_v45, %v1397_v1 }
 0x7d9   : > { %3266 = vtanh.f32 %v4351_v0 }
 0x7da   : > { %3268 = vpow2.f32 %v3022_v11 }
 0x7db   : > { %3270 = vpow2.f32 %v3024_v62 }
 0x7df   : > { %v3267_v41 = vpop.eup %3266 }
 0x7e0   : > { %1424 = vrot.lane.b32.xlu2 %v3267_v41, %s3577_s28  ;;  %v3269_v56 = vpop.eup %3268 }
 0x7e1   : > { %v1331_v51 = vadd.f32 1.0, %v3269_v56  ;;  %v3271_v35 = vpop.eup %3270 }
 0x7e2   : > { %v1333_v20 = vadd.f32 1.0, %v3271_v35 }
 0x7e3   : > { %3272 = vrcp.f32 %v1331_v51  ;;  %v1360_v21 = vand.u32 2147483648, %v1331_v51  ;;  %vm1354_vm11 = vweird.f32 %v1331_v51  ;;  %v1358_v46 = vand.u32 2147483647, %v1331_v51 }
 0x7e4   : > { %3274 = vrcp.f32 %v1333_v20  ;;  %vm1384_vm15 = vweird.f32 %v1333_v20 }
 0x7e5   : > { %v1361_v41 = vor.u32 1.1754944e-38, %v1360_v21  ;;  %vm1359_vm13 = vcmp.eq.f32.partialorder %v1358_v46, 8.507059e+37 }
 0x7e9   : > { %v3273_v25 = vpop.eup %3272 }
 0x7ea   : > { %v1350_v40 = vmul.f32 %v3273_v25, %v1331_v51  ;;  %v3275_v12 = vpop.eup %3274  ;;  %vm1355_vm10 = vweird.f32 %v3273_v25 }
 0x7eb   : > { %v1380_v24 = vmul.f32 %v3275_v12, %v1333_v20  ;;  %vm1356_vm12 = vmor %vm1354_vm11, %vm1355_vm10  ;;  %vm1385_vm14 = vweird.f32 %v3275_v12 }
 0x7ec   : > { %v1351_v60 = vsub.f32 1.0, %v1350_v40  ;;  %v1390_v40 = vand.u32 2147483648, %v1333_v20  ;;  %vm1386_vm6 = vmor %vm1384_vm15, %vm1385_vm14 }
 0x7ed   : > { %v1381_v18 = vsub.f32 1.0, %v1380_v24 }
 0x7ee   : > { %v1352_v55 = vmul.f32 %v3273_v25, %v1351_v60  ;;  %v1388_v60 = vand.u32 2147483647, %v1333_v20 }
 0x7ef   : > { %v1382_v45 = vmul.f32 %v3275_v12, %v1381_v18 }
 0x7f0   : > { %v1353_v17 = vadd.f32 %v3273_v25, %v1352_v55  ;;  %vm1389_vm7 = vcmp.eq.f32.partialorder %v1388_v60, 8.507059e+37 }
 0x7f1   : > { %v1383_v35 = vadd.f32 %v3275_v12, %v1382_v45 }
 0x7f2   : > { %v1357_v1 = vsel %vm1356_vm12, %v3273_v25, %v1353_v17  ;;  %v1391_v25 = vor.u32 1.1754944e-38, %v1390_v40  ;;  %v5095_v17 = vsel %vm3981_vm3, %v3987_v37, %v3985_v31  ;;  %v5097_v37 = vsel %vm3910_vm2, %v3933_v54, %v3930_v53 }
 0x7f3   : > { %v1362_v11 = vsel %vm1359_vm13, %v1361_v41, %v1357_v1  ;;  %v1387_v51 = vsel %vm1386_vm6, %v3275_v12, %v1383_v35  ;;  %v5096_v1 = vsel %vm3981_vm3, %v4009_v52, %v4007_v50  ;;  %v5098_v50 = vsel %vm3910_vm2, %v3949_v59, %v3946_v58 }
 0x7f4   : > { %v1392_v55 = vsel %vm1389_vm7, %v1391_v25, %v1387_v51 }
 0x832   : > { %v1423_v62 = vpop.permute.xlu1 %1422 }
 0x833   : > { %v1428_v56 = vmul.f32 %v1423_v62, %v1362_v11 }
 0x835   : > { %1430 = vst.msk [vmem:[#allocation3 + $0x30] sm:$0xff] %vm828_vm1, %v1428_v56  ;;  %3025 = vmatmul.msk.f32.vlgmr.msrb.gmra.mxu2 %vm662_vm4, %v1428_v56  ;;  %3027 = vmatmul.msk.f32.vlgmr.msrb.gmra.mxu3 %vm662_vm4, %v1428_v56 }
 0x836   : > { %1432 = vst.msk [vmem:[#allocation3 + $0x40] sm:$0xff] %vm831_vm5, %v1428_v56  ;;  %1899 = vmatpush.msrb.mxu3 %v4303_v23  ;;  %1876 = vmatpush.msrb.mxu2 %v4305_v42 }
 0x838   : > { %1900 = vmatpush.msrb.mxu3 %v4307_v26  ;;  %1877 = vmatpush.msrb.mxu2 %v4311_v27 }
 0x83a   : > { %v1425_v24 = vpop.permute.xlu2 %1424  ;;  %1901 = vmatpush.msrb.mxu3 %v4313_v3  ;;  %1878 = vmatpush.msrb.mxu2 %v4315_v30 }
 0x83b   : > { %v1429_v20 = vmul.f32 %v1425_v24, %v1392_v55 }
 0x83c   : > { %1902 = vmatpush.msrb.mxu3 %v4319_v32  ;;  %1879 = vmatpush.msrb.mxu2 %v4321_v33 }
 0x83d   : > { %1431 = vst.msk [vmem:[#allocation3 + $0x38] sm:$0xff] %vm828_vm1, %v1429_v20  ;;  %3026 = vmatmul.msk.f32.gmra.mxu2 %vm662_vm4, %v1429_v20  ;;  %3028 = vmatmul.msk.f32.gmra.mxu3 %vm662_vm4, %v1429_v20 }
 0x83e   : > { %1433 = vst.msk [vmem:[#allocation3 + $0x48] sm:$0xff] %vm831_vm5, %v1429_v20  ;;  %1903 = vmatpush.msrb.mxu3 %v4325_v34  ;;  %1880 = vmatpush.msrb.mxu2 %v4327_v36 }
 0x840   : > { %1904 = vmatpush.msrb.mxu3 %v4331_v8  ;;  %1881 = vmatpush.msrb.mxu2 %v4333_v4 }
 0x842   : > { %1905 = vmatpush.msrb.mxu3 %v4337_v28  ;;  %1882 = vmatpush.msrb.mxu2 %v4339_v39 }
 0x844   : > { %1906 = vmatpush.msrb.mxu3 %v4361_v43  ;;  %1883 = vmatpush.msrb.mxu2 %v4257_v63 }
 0x8b8   : > { %v1508_v12 = vpop.f32.mrf.mxu3  ;;  %v1485_v31 = vpop.f32.mrf.mxu2 }
 0x8b9   : > { %v4401_v18 = vadd.f32 %v1508_v12, %v5095_v17  ;;  %v1514_v41 = vadd.f32 %v1485_v31, %v5097_v37 }
 0x8bb   : > { %3276 = vtanh.f32 %v4401_v18  ;;  %v3029_v11 = vmul.f32 -1.442695, %v1514_v41 }
 0x8c0   : > { %v1511_v21 = vpop.f32.mrf.mxu3  ;;  %v1488_v62 = vpop.f32.mrf.mxu2 }
 0x8c1   : > { %v3277_v46 = vpop.eup %3276  ;;  %v4409_v45 = vadd.f32 %v1511_v21, %v5096_v1  ;;  %v1516_v52 = vadd.f32 %v1488_v62, %v5098_v50 }
 0x8c2   : > { %1600 = vrot.lane.b32.xlu0 %v3277_v46, %s3577_s28 }
 0x8c3   : > { %3278 = vtanh.f32 %v4409_v45  ;;  %v3031_v56 = vmul.f32 -1.442695, %v1516_v52 }
 0x8c4   : > { %3280 = vpow2.f32 %v3029_v11 }
 0x8c5   : > { %3282 = vpow2.f32 %v3031_v56 }
 0x8c9   : > { %v3279_v63 = vpop.eup %3278 }
 0x8ca   : > { %1602 = vrot.lane.b32.xlu1 %v3279_v63, %s3577_s28  ;;  %v3281_v35 = vpop.eup %3280 }
 0x8cb   : > { %v1530_v40 = vadd.f32 1.0, %v3281_v35  ;;  %v3283_v60 = vpop.eup %3282 }
 0x8cc   : > { %v1532_v51 = vadd.f32 1.0, %v3283_v60 }
 0x8cd   : > { %3284 = vrcp.f32 %v1530_v40  ;;  %v1545_v21 = vand.u32 2147483648, %v1530_v40  ;;  %vm1539_vm9 = vweird.f32 %v1530_v40  ;;  %v1543_v58 = vand.u32 2147483647, %v1530_v40 }
 0x8ce   : > { %3286 = vrcp.f32 %v1532_v51  ;;  %v1575_v11 = vand.u32 2147483648, %v1532_v51  ;;  %vm1569_vm13 = vweird.f32 %v1532_v51  ;;  %v1573_v62 = vand.u32 2147483647, %v1532_v51 }
 0x8cf   : > { %v1546_v1 = vor.u32 1.1754944e-38, %v1545_v21  ;;  %vm1544_vm11 = vcmp.eq.f32.partialorder %v1543_v58, 8.507059e+37 }
 0x8d0   : > { %v1576_v52 = vor.u32 1.1754944e-38, %v1575_v11  ;;  %vm1574_vm15 = vcmp.eq.f32.partialorder %v1573_v62, 8.507059e+37 }
 0x8d3   : > { %v3285_v25 = vpop.eup %3284 }
 0x8d4   : > { %v1535_v53 = vmul.f32 %v3285_v25, %v1530_v40  ;;  %v3287_v55 = vpop.eup %3286  ;;  %vm1540_vm8 = vweird.f32 %v3285_v25 }
 0x8d5   : > { %v1565_v20 = vmul.f32 %v3287_v55, %v1532_v51  ;;  %vm1541_vm10 = vmor %vm1539_vm9, %vm1540_vm8  ;;  %vm1570_vm12 = vweird.f32 %v3287_v55 }
 0x8d6   : > { %v1536_v54 = vsub.f32 1.0, %v1535_v53  ;;  %vm1571_vm14 = vmor %vm1569_vm13, %vm1570_vm12 }
 0x8d7   : > { %v1566_v17 = vsub.f32 1.0, %v1565_v20 }
 0x8d8   : > { %v1537_v24 = vmul.f32 %v3285_v25, %v1536_v54 }
 0x8d9   : > { %v1567_v46 = vmul.f32 %v3287_v55, %v1566_v17 }
 0x8da   : > { %v1538_v12 = vadd.f32 %v3285_v25, %v1537_v24 }
 0x8db   : > { %v1568_v41 = vadd.f32 %v3287_v55, %v1567_v46 }
 0x8dc   : > { %v1542_v59 = vsel %vm1541_vm10, %v3285_v25, %v1538_v12  ;;  %v3032_v12 = vmul.f32 -1.442695, %v4409_v45 }
 0x8dd   : > { %v1547_v31 = vsel %vm1544_vm11, %v1546_v1, %v1542_v59  ;;  %v1572_v50 = vsel %vm1571_vm14, %v3287_v55, %v1568_v41 }
 0x8de   : > { %v1577_v35 = vsel %vm1574_vm15, %v1576_v52, %v1572_v50  ;;  %v1596_v60 = vmul.f32 %v1547_v31, %v4299_v22  ;;  %v3030_v22 = vmul.f32 -1.442695, %v4401_v18 }
 0x8df   : > { %v1597_v51 = vmul.f32 %v1577_v35, %v4351_v0 }
 0x934   : > { %v1601_v63 = vpop.permute.xlu0 %1600 }
 0x935   : > { %v1606_v37 = vmul.f32 %v1601_v63, %v1547_v31 }
 0x937   : > { %1610 = vrot.lane.b32.xlu2 %v1606_v37, %s3577_s28 }
 0x93c   : > { %v1603_v56 = vpop.permute.xlu1 %1602 }
 0x93d   : > { %v1607_v40 = vmul.f32 %v1603_v56, %v1577_v35 }
 0x93f   : > { %1612 = vrot.lane.b32.xlu0 %v1607_v40, %s3577_s28 }
 0x991   : > { %v1611_v25 = vpop.permute.xlu2 %1610 }
 0x992   : > { %v4427_v53 = vadd.f32 %v1611_v25, %v1596_v60 }
 0x994   : > { %3288 = vtanh.f32 %v4427_v53 }
 0x99a   : > { %v3289_v54 = vpop.eup %3288 }
 0x99b   : > { %1622 = vrot.lane.b32.xlu1 %v3289_v54, %s3577_s28 }
 0x9b1   : > { %v1613_v55 = vpop.permute.xlu0 %1612 }
 0x9b2   : > { %v4432_v24 = vadd.f32 %v1613_v55, %v1597_v51 }
 0x9b4   : > { %3290 = vtanh.f32 %v4432_v24 }
 0x9b5   : > { %3292 = vpow2.f32 %v3030_v22 }
 0x9b6   : > { %3294 = vpow2.f32 %v3032_v12 }
 0x9ba   : > { %v3291_v20 = vpop.eup %3290 }
 0x9bb   : > { %1624 = vrot.lane.b32.xlu2 %v3291_v20, %s3577_s28  ;;  %v3293_v17 = vpop.eup %3292 }
 0x9bc   : > { %v1531_v21 = vadd.f32 1.0, %v3293_v17  ;;  %v3295_v58 = vpop.eup %3294 }
 0x9bd   : > { %v1533_v59 = vadd.f32 1.0, %v3295_v58 }
 0x9be   : > { %3296 = vrcp.f32 %v1531_v21  ;;  %v1560_v18 = vand.u32 2147483648, %v1531_v21  ;;  %vm1554_vm7 = vweird.f32 %v1531_v21  ;;  %v1558_v62 = vand.u32 2147483647, %v1531_v21 }
 0x9bf   : > { %3298 = vrcp.f32 %v1533_v59  ;;  %v1590_v25 = vand.u32 2147483648, %v1533_v59  ;;  %vm1584_vm11 = vweird.f32 %v1533_v59  ;;  %v1588_v54 = vand.u32 2147483647, %v1533_v59 }
 0x9c0   : > { %v1561_v52 = vor.u32 1.1754944e-38, %v1560_v18  ;;  %vm1559_vm9 = vcmp.eq.f32.partialorder %v1558_v62, 8.507059e+37 }
 0x9c1   : > { %v1591_v55 = vor.u32 1.1754944e-38, %v1590_v25  ;;  %vm1589_vm13 = vcmp.eq.f32.partialorder %v1588_v54, 8.507059e+37 }
 0x9c4   : > { %v3297_v0 = vpop.eup %3296 }
 0x9c5   : > { %v1550_v46 = vmul.f32 %v3297_v0, %v1531_v21  ;;  %v3299_v63 = vpop.eup %3298  ;;  %vm1555_vm6 = vweird.f32 %v3297_v0 }
 0x9c6   : > { %v1580_v37 = vmul.f32 %v3299_v63, %v1533_v59  ;;  %vm1556_vm8 = vmor %vm1554_vm7, %vm1555_vm6  ;;  %vm1585_vm10 = vweird.f32 %v3299_v63 }
 0x9c7   : > { %v1551_v1 = vsub.f32 1.0, %v1550_v46  ;;  %vm1586_vm12 = vmor %vm1584_vm11, %vm1585_vm10 }
 0x9c8   : > { %v1581_v11 = vsub.f32 1.0, %v1580_v37 }
 0x9c9   : > { %v1552_v31 = vmul.f32 %v3297_v0, %v1551_v1 }
 0x9ca   : > { %v1582_v50 = vmul.f32 %v3299_v63, %v1581_v11 }
 0x9cb   : > { %v1553_v41 = vadd.f32 %v3297_v0, %v1552_v31 }
 0x9cc   : > { %v1583_v60 = vadd.f32 %v3299_v63, %v1582_v50 }
 0x9cd   : > { %v1557_v45 = vsel %vm1556_vm8, %v3297_v0, %v1553_v41 }
 0x9ce   : > { %v1562_v56 = vsel %vm1559_vm9, %v1561_v52, %v1557_v45  ;;  %v1587_v51 = vsel %vm1586_vm12, %v3299_v63, %v1583_v60 }
 0x9cf   : > { %v1592_v20 = vsel %vm1589_vm13, %v1591_v55, %v1587_v51 }
 0xa0d   : > { %v1623_v35 = vpop.permute.xlu1 %1622 }
 0xa0e   : > { %v1628_v40 = vmul.f32 %v1623_v35, %v1562_v56 }
 0xa10   : > { %1630 = vst.msk [vmem:[#allocation3 + $0x40] sm:$0xff] %vm828_vm1, %v1628_v40  ;;  %3033 = vmatmul.msk.f32.vlgmr.msra.gmra.mxu2 %vm662_vm4, %v1628_v40  ;;  %3035 = vmatmul.msk.f32.vlgmr.msra.gmra.mxu3 %vm662_vm4, %v1628_v40 }
 0xa11   : > { %1632 = vst.msk [vmem:[#allocation3 + $0x30] sm:$0xff] %vm831_vm5, %v1628_v40  ;;  %2099 = vmatpush.msra.mxu3 %v4303_v23  ;;  %2076 = vmatpush.msra.mxu2 %v4305_v42  ;;  %v5099_v42 = vsel %vm3981_vm3, %v4031_v15, %v4029_v14  ;;  %v5101_v15 = vsel %vm3910_vm2, %v4117_v57, %v4120_v6 }
 0xa13   : > { %2100 = vmatpush.msra.mxu3 %v4307_v26  ;;  %2077 = vmatpush.msra.mxu2 %v4311_v27 }
 0xa15   : > { %v1625_v22 = vpop.permute.xlu2 %1624  ;;  %2101 = vmatpush.msra.mxu3 %v4313_v3  ;;  %2078 = vmatpush.msra.mxu2 %v4315_v30  ;;  %v5100_v30 = vsel %vm3981_vm3, %v4047_v7, %v4045_v2  ;;  %v5102_v2 = vsel %vm3910_vm2, %v3918_v49, %v3915_v48 }
 0xa16   : > { %v1629_v12 = vmul.f32 %v1625_v22, %v1592_v20 }
 0xa17   : > { %2102 = vmatpush.msra.mxu3 %v4319_v32  ;;  %2079 = vmatpush.msra.mxu2 %v4321_v33 }
 0xa18   : > { %1631 = vst.msk [vmem:[#allocation3 + $0x48] sm:$0xff] %vm828_vm1, %v1629_v12  ;;  %3034 = vmatmul.msk.f32.gmra.mxu2 %vm662_vm4, %v1629_v12  ;;  %3036 = vmatmul.msk.f32.gmra.mxu3 %vm662_vm4, %v1629_v12 }
 0xa19   : > { %1633 = vst.msk [vmem:[#allocation3 + $0x38] sm:$0xff] %vm831_vm5, %v1629_v12  ;;  %2103 = vmatpush.msra.mxu3 %v4325_v34  ;;  %2080 = vmatpush.msra.mxu2 %v4327_v36 }
 0xa1b   : > { %2104 = vmatpush.msra.mxu3 %v4331_v8  ;;  %2081 = vmatpush.msra.mxu2 %v4333_v4 }
 0xa1d   : > { %2105 = vmatpush.msra.mxu3 %v4337_v28  ;;  %2082 = vmatpush.msra.mxu2 %v4339_v39 }
 0xa1f   : > { %2106 = vmatpush.msra.mxu3 %v4361_v43 }
 0xa93   : > { %v1708_v23 = vpop.f32.mrf.mxu3  ;;  %v1685_v14 = vpop.f32.mrf.mxu2 }
 0xa94   : > { %v4466_v26 = vadd.f32 %v1708_v23, %v5099_v42  ;;  %v1714_v34 = vadd.f32 %v1685_v14, %v5101_v15 }
 0xa96   : > { %3300 = vtanh.f32 %v4466_v26  ;;  %v3037_v36 = vmul.f32 -1.442695, %v1714_v34 }
 0xa9b   : > { %v1711_v27 = vpop.f32.mrf.mxu3  ;;  %v1688_v8 = vpop.f32.mrf.mxu2 }
 0xa9c   : > { %v3301_v3 = vpop.eup %3300  ;;  %v4474_v32 = vadd.f32 %v1711_v27, %v5100_v30  ;;  %v1716_v7 = vadd.f32 %v1688_v8, %v5102_v2 }
 0xa9d   : > { %1800 = vrot.lane.b32.xlu0 %v3301_v3, %s3577_s28 }
 0xa9e   : > { %3302 = vtanh.f32 %v4474_v32  ;;  %v3039_v4 = vmul.f32 -1.442695, %v1716_v7  ;;  %v3040_v42 = vmul.f32 -1.442695, %v4474_v32 }
 0xa9f   : > { %3304 = vpow2.f32 %v3037_v36 }
 0xaa0   : > { %3306 = vpow2.f32 %v3039_v4 }
 0xaa4   : > { %v3303_v33 = vpop.eup %3302 }
 0xaa5   : > { %1802 = vrot.lane.b32.xlu1 %v3303_v33, %s3577_s28  ;;  %v3305_v28 = vpop.eup %3304 }
 0xaa6   : > { %v1730_v39 = vadd.f32 1.0, %v3305_v28  ;;  %v3307_v43 = vpop.eup %3306 }
 0xaa7   : > { %v1732_v17 = vadd.f32 1.0, %v3307_v43 }
 0xaa8   : > { %3308 = vrcp.f32 %v1730_v39  ;;  %v1745_v63 = vand.u32 2147483648, %v1730_v39  ;;  %vm1739_vm15 = vweird.f32 %v1730_v39  ;;  %v1743_v48 = vand.u32 2147483647, %v1730_v39 }
 0xaa9   : > { %3310 = vrcp.f32 %v1732_v17  ;;  %v1775_v45 = vand.u32 2147483648, %v1732_v17  ;;  %vm1769_vm9 = vweird.f32 %v1732_v17  ;;  %v1773_v50 = vand.u32 2147483647, %v1732_v17 }
 0xaaa   : > { %v1746_v37 = vor.u32 1.1754944e-38, %v1745_v63  ;;  %vm1744_vm7 = vcmp.eq.f32.partialorder %v1743_v48, 8.507059e+37 }
 0xaab   : > { %v1776_v56 = vor.u32 1.1754944e-38, %v1775_v45  ;;  %vm1774_vm11 = vcmp.eq.f32.partialorder %v1773_v50, 8.507059e+37 }
 0xaae   : > { %v3309_v21 = vpop.eup %3308 }
 0xaaf   : > { %v1735_v6 = vmul.f32 %v3309_v21, %v1730_v39  ;;  %v3311_v58 = vpop.eup %3310  ;;  %vm1740_vm14 = vweird.f32 %v3309_v21 }
 0xab0   : > { %v1765_v0 = vmul.f32 %v3311_v58, %v1732_v17  ;;  %vm1741_vm6 = vmor %vm1739_vm15, %vm1740_vm14  ;;  %vm1770_vm8 = vweird.f32 %v3311_v58 }
 0xab1   : > { %v1736_v57 = vsub.f32 1.0, %v1735_v6  ;;  %vm1771_vm10 = vmor %vm1769_vm9, %vm1770_vm8 }
 0xab2   : > { %v1766_v1 = vsub.f32 1.0, %v1765_v0 }
 0xab3   : > { %v1737_v59 = vmul.f32 %v3309_v21, %v1736_v57 }
 0xab4   : > { %v1767_v31 = vmul.f32 %v3311_v58, %v1766_v1 }
 0xab5   : > { %v1738_v46 = vadd.f32 %v3309_v21, %v1737_v59 }
 0xab6   : > { %v1768_v62 = vadd.f32 %v3311_v58, %v1767_v31 }
 0xab7   : > { %v1742_v49 = vsel %vm1741_vm6, %v3309_v21, %v1738_v46 }
 0xab8   : > { %v1747_v11 = vsel %vm1744_vm7, %v1746_v37, %v1742_v49  ;;  %v1772_v52 = vsel %vm1771_vm10, %v3311_v58, %v1768_v62  ;;  %v5103_v49 = vsel %vm3981_vm3, %v4059_v13, %v4057_v38  ;;  %v5105_v38 = vsel %vm3910_vm2, %v3966_v9, %v3969_v10 }
 0xab9   : > { %v1777_v40 = vsel %vm1774_vm11, %v1776_v56, %v1772_v52  ;;  %v1796_v25 = vmul.f32 %v1747_v11, %v4427_v53  ;;  %v3038_v53 = vmul.f32 -1.442695, %v4466_v26 }
 0xaba   : > { %v1797_v20 = vmul.f32 %v1777_v40, %v4432_v24 }
 0xb0f   : > { %v1801_v41 = vpop.permute.xlu0 %1800 }
 0xb10   : > { %v1806_v18 = vmul.f32 %v1801_v41, %v1747_v11  ;;  %v5104_v11 = vsel %vm3981_vm3, %v4071_v61, %v4069_v5  ;;  %v5106_v61 = vsel %vm3910_vm2, %v3976_v16, %v3979_v19 }
 0xb12   : > { %1810 = vrot.lane.b32.xlu2 %v1806_v18, %s3577_s28 }
 0xb17   : > { %v1803_v35 = vpop.permute.xlu1 %1802 }
 0xb18   : > { %v1807_v60 = vmul.f32 %v1803_v35, %v1777_v40 }
 0xb1a   : > { %1812 = vrot.lane.b32.xlu0 %v1807_v60, %s3577_s28 }
 0xb6c   : > { %v1811_v54 = vpop.permute.xlu2 %1810 }
 0xb6d   : > { %v4492_v51 = vadd.f32 %v1811_v54, %v1796_v25 }
 0xb6f   : > { %3312 = vtanh.f32 %v4492_v51 }
 0xb75   : > { %v3313_v55 = vpop.eup %3312 }
 0xb76   : > { %1822 = vrot.lane.b32.xlu1 %v3313_v55, %s3577_s28 }
 0xb8c   : > { %v1813_v22 = vpop.permute.xlu0 %1812 }
 0xb8d   : > { %v4497_v12 = vadd.f32 %v1813_v22, %v1797_v20 }
 0xb8f   : > { %3314 = vtanh.f32 %v4497_v12 }
 0xb90   : > { %3316 = vpow2.f32 %v3038_v53 }
 0xb91   : > { %3318 = vpow2.f32 %v3040_v42 }
 0xb95   : > { %v3315_v23 = vpop.eup %3314 }
 0xb96   : > { %1824 = vrot.lane.b32.xlu2 %v3315_v23, %s3577_s28  ;;  %v3317_v27 = vpop.eup %3316 }
 0xb97   : > { %v1731_v3 = vadd.f32 1.0, %v3317_v27  ;;  %v3319_v30 = vpop.eup %3318 }
 0xb98   : > { %v1733_v33 = vadd.f32 1.0, %v3319_v30 }
 0xb99   : > { %3320 = vrcp.f32 %v1731_v3  ;;  %v1760_v26 = vand.u32 2147483648, %v1731_v3  ;;  %vm1754_vm13 = vweird.f32 %v1731_v3  ;;  %v1758_v4 = vand.u32 2147483647, %v1731_v3 }
 0xb9a   : > { %3322 = vrcp.f32 %v1733_v33  ;;  %v1790_v57 = vand.u32 2147483648, %v1733_v33  ;;  %vm1784_vm7 = vweird.f32 %v1733_v33  ;;  %v1788_v58 = vand.u32 2147483647, %v1733_v33 }
 0xb9b   : > { %v1761_v39 = vor.u32 1.1754944e-38, %v1760_v26  ;;  %vm1759_vm15 = vcmp.eq.f32.partialorder %v1758_v4, 8.507059e+37 }
 0xb9c   : > { %v1791_v0 = vor.u32 1.1754944e-38, %v1790_v57  ;;  %vm1789_vm9 = vcmp.eq.f32.partialorder %v1788_v58, 8.507059e+37 }
 0xb9f   : > { %v3321_v24 = vpop.eup %3320 }
 0xba0   : > { %v1750_v14 = vmul.f32 %v3321_v24, %v1731_v3  ;;  %v3323_v34 = vpop.eup %3322  ;;  %vm1755_vm12 = vweird.f32 %v3321_v24 }
 0xba1   : > { %v1780_v8 = vmul.f32 %v3323_v34, %v1733_v33  ;;  %vm1756_vm14 = vmor %vm1754_vm13, %vm1755_vm12  ;;  %vm1785_vm6 = vweird.f32 %v3323_v34 }
 0xba2   : > { %v1751_v15 = vsub.f32 1.0, %v1750_v14  ;;  %vm1786_vm8 = vmor %vm1784_vm7, %vm1785_vm6 }
 0xba3   : > { %v1781_v7 = vsub.f32 1.0, %v1780_v8 }
 0xba4   : > { %v1752_v36 = vmul.f32 %v3321_v24, %v1751_v15 }
 0xba5   : > { %v1782_v28 = vmul.f32 %v3323_v34, %v1781_v7 }
 0xba6   : > { %v1753_v2 = vadd.f32 %v3321_v24, %v1752_v36 }
 0xba7   : > { %v1783_v6 = vadd.f32 %v3323_v34, %v1782_v28 }
 0xba8   : > { %v1757_v32 = vsel %vm1756_vm14, %v3321_v24, %v1753_v2 }
 0xba9   : > { %v1762_v43 = vsel %vm1759_vm15, %v1761_v39, %v1757_v32  ;;  %v1787_v59 = vsel %vm1786_vm8, %v3323_v34, %v1783_v6 }
 0xbaa   : > { %v1792_v46 = vsel %vm1789_vm9, %v1791_v0, %v1787_v59  ;;  %v2046_v0 = vld [vmem:[#allocation7] sm:$0xff] }
 0xbab   : > { %2083 = vmatpush.msra.mxu2 %v2046_v0 }
 0xbe8   : > { %v1823_v17 = vpop.permute.xlu1 %1822 }
 0xbe9   : > { %v1828_v21 = vmul.f32 %v1823_v17, %v1762_v43 }
 0xbeb   : > { %1830 = vst.msk [vmem:[#allocation3 + $0x50] sm:$0xff] %vm828_vm1, %v1828_v21  ;;  %3041 = vmatmul.msk.f32.vlgmr.msrb.gmra.mxu2 %vm662_vm4, %v1828_v21  ;;  %3043 = vmatmul.msk.f32.vlgmr.msrb.gmra.mxu3 %vm662_vm4, %v1828_v21 }
 0xbec   : > { %1832 = vst.msk [vmem:[#allocation3 + $0x20] sm:$0xff] %vm831_vm5, %v1828_v21 }
 0xbf0   : > { %v1825_v1 = vpop.permute.xlu2 %1824 }
 0xbf1   : > { %v1829_v63 = vmul.f32 %v1825_v1, %v1792_v46 }
 0xbf3   : > { %1831 = vst.msk [vmem:[#allocation3 + $0x58] sm:$0xff] %vm828_vm1, %v1829_v63  ;;  %3042 = vmatmul.msk.f32.gmra.mxu2 %vm662_vm4, %v1829_v63  ;;  %3044 = vmatmul.msk.f32.gmra.mxu3 %vm662_vm4, %v1829_v63 }
 0xbf4   : > { %1833 = vst.msk [vmem:[#allocation3 + $0x28] sm:$0xff] %vm831_vm5, %v1829_v63 }
 0xc6e   : > { %v1908_v48 = vpop.f32.mrf.mxu3  ;;  %v1885_v13 = vpop.f32.mrf.mxu2 }
 0xc6f   : > { %v4516_v31 = vadd.f32 %v1908_v48, %v5103_v49  ;;  %v1914_v45 = vadd.f32 %v1885_v13, %v5105_v38 }
 0xc71   : > { %3324 = vtanh.f32 %v4516_v31  ;;  %v3045_v50 = vmul.f32 -1.442695, %v1914_v45 }
 0xc76   : > { %v1911_v37 = vpop.f32.mrf.mxu3  ;;  %v1888_v52 = vpop.f32.mrf.mxu2 }
 0xc77   : > { %v3325_v41 = vpop.eup %3324  ;;  %v4524_v18 = vadd.f32 %v1911_v37, %v5104_v11  ;;  %v1916_v5 = vadd.f32 %v1888_v52, %v5106_v61 }
 0xc78   : > { %2000 = vrot.lane.b32.xlu0 %v3325_v41, %s3577_s28 }
 0xc79   : > { %3326 = vtanh.f32 %v4524_v18  ;;  %v3047_v56 = vmul.f32 -1.442695, %v1916_v5  ;;  %v3048_v57 = vmul.f32 -1.442695, %v4524_v18 }
 0xc7a   : > { %3328 = vpow2.f32 %v3045_v50 }
 0xc7b   : > { %3330 = vpow2.f32 %v3047_v56 }
 0xc7f   : > { %v3327_v62 = vpop.eup %3326 }
 0xc80   : > { %2002 = vrot.lane.b32.xlu1 %v3327_v62, %s3577_s28  ;;  %v3329_v35 = vpop.eup %3328 }
 0xc81   : > { %v1930_v40 = vadd.f32 1.0, %v3329_v35  ;;  %v3331_v60 = vpop.eup %3330 }
 0xc82   : > { %v1932_v25 = vadd.f32 1.0, %v3331_v60 }
 0xc83   : > { %3332 = vrcp.f32 %v1930_v40  ;;  %v1945_v42 = vand.u32 2147483648, %v1930_v40  ;;  %vm1939_vm11 = vweird.f32 %v1930_v40  ;;  %v1943_v16 = vand.u32 2147483647, %v1930_v40 }
 0xc84   : > { %3334 = vrcp.f32 %v1932_v25  ;;  %v1975_v15 = vand.u32 2147483648, %v1932_v25  ;;  %vm1969_vm15 = vweird.f32 %v1932_v25  ;;  %v1973_v34 = vand.u32 2147483647, %v1932_v25 }
 0xc85   : > { %v1946_v3 = vor.u32 1.1754944e-38, %v1945_v42  ;;  %vm1944_vm13 = vcmp.eq.f32.partialorder %v1943_v16, 8.507059e+37  ;;  %v5109_v42 = vld [vmem:[#allocation24_spill] sm:$0xff]  ;;  %v5110_v16 = vld [vmem:[#allocation23_spill] sm:$0xff] }
 0xc86   : > { %v1976_v8 = vor.u32 1.1754944e-38, %v1975_v15  ;;  %vm1974_vm7 = vcmp.eq.f32.partialorder %v1973_v34, 8.507059e+37  ;;  %v5115_v34 = vld [vmem:[#allocation21_spill] sm:$0xff] }
 0xc89   : > { %v3333_v54 = vpop.eup %3332 }
 0xc8a   : > { %v1935_v9 = vmul.f32 %v3333_v54, %v1930_v40  ;;  %v3335_v55 = vpop.eup %3334  ;;  %vm1940_vm10 = vweird.f32 %v3333_v54 }
 0xc8b   : > { %v1965_v22 = vmul.f32 %v3335_v55, %v1932_v25  ;;  %vm1941_vm12 = vmor %vm1939_vm11, %vm1940_vm10  ;;  %vm1970_vm14 = vweird.f32 %v3335_v55 }
 0xc8c   : > { %v1936_v10 = vsub.f32 1.0, %v1935_v9  ;;  %vm1971_vm6 = vmor %vm1969_vm15, %vm1970_vm14 }
 0xc8d   : > { %v1966_v53 = vsub.f32 1.0, %v1965_v22 }
 0xc8e   : > { %v1937_v20 = vmul.f32 %v3333_v54, %v1936_v10 }
 0xc8f   : > { %v1967_v27 = vmul.f32 %v3335_v55, %v1966_v53 }
 0xc90   : > { %v1938_v23 = vadd.f32 %v3333_v54, %v1937_v20 }
 0xc91   : > { %v1968_v14 = vadd.f32 %v3335_v55, %v1967_v27 }
 0xc92   : > { %v1942_v19 = vsel %vm1941_vm12, %v3333_v54, %v1938_v23 }
 0xc93   : > { %v1947_v33 = vsel %vm1944_vm13, %v1946_v3, %v1942_v19  ;;  %v1972_v36 = vsel %vm1971_vm6, %v3335_v55, %v1968_v14  ;;  %v5107_v55 = vld [vmem:[#allocation22_spill] sm:$0xff]  ;;  %v5111_v19 = vsel %vm3981_vm3, %v5109_v42, %v5110_v16  ;;  %v2251_v16 = vld [vmem:[%s5041_s5 + $0x8] sm:$0xff] }
 0xc94   : > { %v1977_v7 = vsel %vm1974_vm7, %v1976_v8, %v1972_v36  ;;  %v1996_v4 = vmul.f32 %v1947_v33, %v4492_v51  ;;  %v3046_v51 = vmul.f32 -1.442695, %v4516_v31  ;;  %v5108_v20 = vsel %vm3981_vm3, %v4084_v44, %v5107_v55  ;;  %v5116_v36 = vld [vmem:[#allocation20_spill] sm:$0xff] }
 0xc95   : > { %v1997_v43 = vmul.f32 %v1977_v7, %v4497_v12  ;;  %v5117_v8 = vsel %vm3910_vm2, %v5115_v34, %v5116_v36 }
 0xcea   : > { %v2001_v30 = vpop.permute.xlu0 %2000 }
 0xceb   : > { %v2006_v24 = vmul.f32 %v2001_v30, %v1947_v33  ;;  %v5112_v30 = vld [vmem:[#allocation19_spill] sm:$0xff]  ;;  %v5113_v33 = vld [vmem:[#allocation18_spill] sm:$0xff] }
 0xced   : > { %2010 = vrot.lane.b32.xlu2 %v2006_v24, %s3577_s28  ;;  %v5114_v24 = vsel %vm3910_vm2, %v5112_v30, %v5113_v33 }
 0xcf2   : > { %v2003_v2 = vpop.permute.xlu1 %2002 }
 0xcf3   : > { %v2007_v26 = vmul.f32 %v2003_v2, %v1977_v7 }
 0xcf5   : > { %2012 = vrot.lane.b32.xlu0 %v2007_v26, %s3577_s28 }
 0xd47   : > { %v2011_v32 = vpop.permute.xlu2 %2010 }
 0xd48   : > { %v4542_v28 = vadd.f32 %v2011_v32, %v1996_v4 }
 0xd4a   : > { %3336 = vtanh.f32 %v4542_v28 }
 0xd50   : > { %v3337_v39 = vpop.eup %3336 }
 0xd51   : > { %2022 = vrot.lane.b32.xlu1 %v3337_v39, %s3577_s28 }
 0xd67   : > { %v2013_v17 = vpop.permute.xlu0 %2012 }
 0xd68   : > { %v4547_v21 = vadd.f32 %v2013_v17, %v1997_v43 }
 0xd6a   : > { %3338 = vtanh.f32 %v4547_v21 }
 0xd6b   : > { %3340 = vpow2.f32 %v3046_v51 }
 0xd6c   : > { %3342 = vpow2.f32 %v3048_v57 }
 0xd70   : > { %v3339_v6 = vpop.eup %3338 }
 0xd71   : > { %2024 = vrot.lane.b32.xlu2 %v3339_v6, %s3577_s28  ;;  %v3341_v58 = vpop.eup %3340 }
 0xd72   : > { %v1931_v59 = vadd.f32 1.0, %v3341_v58  ;;  %v3343_v46 = vpop.eup %3342 }
 0xd73   : > { %v1933_v12 = vadd.f32 1.0, %v3343_v46 }
 0xd74   : > { %3344 = vrcp.f32 %v1931_v59  ;;  %v1960_v62 = vand.u32 2147483648, %v1931_v59  ;;  %vm1954_vm9 = vweird.f32 %v1931_v59  ;;  %v1958_v18 = vand.u32 2147483647, %v1931_v59 }
 0xd75   : > { %3346 = vrcp.f32 %v1933_v12  ;;  %v1990_v56 = vand.u32 2147483648, %v1933_v12  ;;  %vm1984_vm13 = vweird.f32 %v1933_v12  ;;  %v1988_v35 = vand.u32 2147483647, %v1933_v12 }
 0xd76   : > { %v1961_v45 = vor.u32 1.1754944e-38, %v1960_v62  ;;  %vm1959_vm11 = vcmp.eq.f32.partialorder %v1958_v18, 8.507059e+37 }
 0xd77   : > { %v1991_v60 = vor.u32 1.1754944e-38, %v1990_v56  ;;  %vm1989_vm15 = vcmp.eq.f32.partialorder %v1988_v35, 8.507059e+37  ;;  %v2257_v56 = vld [vmem:[%s5041_s5 + $0x38] sm:$0xff]  ;;  %v2256_v35 = vld [vmem:[%s5041_s5 + $0x30] sm:$0xff] }
 0xd78   : > { %2318 = vmatpush.msrb.mxu0 %v2257_v56  ;;  %3086 = vmatpush.msrb.mxu2 %v2257_v56 }
 0xd7a   : > { %v3345_v1 = vpop.eup %3344  ;;  %2319 = vmatpush.msrb.mxu0 %v2256_v35  ;;  %3087 = vmatpush.msrb.mxu2 %v2256_v35 }
 0xd7b   : > { %v1950_v63 = vmul.f32 %v3345_v1, %v1931_v59  ;;  %v3347_v49 = vpop.eup %3346  ;;  %vm1955_vm8 = vweird.f32 %v3345_v1 }
 0xd7c   : > { %v1980_v41 = vmul.f32 %v3347_v49, %v1933_v12  ;;  %vm1956_vm10 = vmor %vm1954_vm9, %vm1955_vm8  ;;  %vm1985_vm12 = vweird.f32 %v3347_v49 }
 0xd7d   : > { %v1951_v48 = vsub.f32 1.0, %v1950_v63  ;;  %vm1986_vm14 = vmor %vm1984_vm13, %vm1985_vm12 }
 0xd7e   : > { %v1981_v31 = vsub.f32 1.0, %v1980_v41 }
 0xd7f   : > { %v1952_v37 = vmul.f32 %v3345_v1, %v1951_v48 }
 0xd80   : > { %v1982_v38 = vmul.f32 %v3347_v49, %v1981_v31 }
 0xd81   : > { %v1953_v11 = vadd.f32 %v3345_v1, %v1952_v37 }
 0xd82   : > { %v1983_v5 = vadd.f32 %v3347_v49, %v1982_v38 }
 0xd83   : > { %v1957_v13 = vsel %vm1956_vm10, %v3345_v1, %v1953_v11 }
 0xd84   : > { %v1962_v50 = vsel %vm1959_vm11, %v1961_v45, %v1957_v13  ;;  %v1987_v40 = vsel %vm1986_vm14, %v3347_v49, %v1983_v5 }
 0xd85   : > { %v1992_v25 = vsel %vm1989_vm15, %v1991_v60, %v1987_v40  ;;  %v2254_v40 = vld [vmem:[%s5041_s5 + $0x20] sm:$0xff]  ;;  %v2253_v60 = vld [vmem:[%s5041_s5 + $0x18] sm:$0xff] }
 0xdc3   : > { %v2023_v52 = vpop.permute.xlu1 %2022 }
 0xdc4   : > { %v2028_v61 = vmul.f32 %v2023_v52, %v1962_v50 }
 0xdc6   : > { %2030 = vst.msk [vmem:[#allocation3 + $0x60] sm:$0xff] %vm828_vm1, %v2028_v61  ;;  %3049 = vmatmul.msk.f32.vlgmr.msra.gmra.mxu2 %vm662_vm4, %v2028_v61  ;;  %3051 = vmatmul.msk.f32.vlgmr.msra.gmra.mxu3 %vm662_vm4, %v2028_v61 }
 0xdc7   : > { %2032 = vst.msk [vmem:[#allocation3 + $0x10] sm:$0xff] %vm831_vm5, %v2028_v61 }
 0xdcb   : > { %v2025_v54 = vpop.permute.xlu2 %2024 }
 0xdcc   : > { %v2029_v9 = vmul.f32 %v2025_v54, %v1992_v25  ;;  %v2252_v25 = vld [vmem:[%s5041_s5 + $0x10] sm:$0xff] }
 0xdce   : > { %2031 = vst.msk [vmem:[#allocation3 + $0x68] sm:$0xff] %vm828_vm1, %v2029_v9  ;;  %3050 = vmatmul.msk.f32.gmra.mxu2 %vm662_vm4, %v2029_v9  ;;  %3052 = vmatmul.msk.f32.gmra.mxu3 %vm662_vm4, %v2029_v9 }
 0xdcf   : > { %2033 = vst.msk [vmem:[#allocation3 + $0x18] sm:$0xff] %vm831_vm5, %v2029_v9 }
 0xe49   : > { %v2108_v10 = vpop.f32.mrf.mxu3  ;;  %v2085_v44 = vpop.f32.mrf.mxu2 }
 0xe4a   : > { %v4566_v22 = vadd.f32 %v2108_v10, %v5108_v20  ;;  %v2114_v14 = vadd.f32 %v2085_v44, %v5114_v24 }
 0xe4c   : > { %3348 = vtanh.f32 %v4566_v22  ;;  %v3053_v29 = vmul.f32 -1.442695, %v2114_v14  ;;  %v3054_v20 = vmul.f32 -1.442695, %v4566_v22 }
 0xe51   : > { %v2111_v23 = vpop.f32.mrf.mxu3  ;;  %v2088_v15 = vpop.f32.mrf.mxu2 }
 0xe52   : > { %v3349_v53 = vpop.eup %3348  ;;  %v4574_v27 = vadd.f32 %v2111_v23, %v5111_v19  ;;  %v2116_v2 = vadd.f32 %v2088_v15, %v5117_v8 }
 0xe53   : > { %2200 = vrot.lane.b32.xlu0 %v3349_v53, %s3577_s28 }
 0xe54   : > { %3350 = vtanh.f32 %v4574_v27  ;;  %v3055_v7 = vmul.f32 -1.442695, %v2116_v2  ;;  %v3056_v23 = vmul.f32 -1.442695, %v4574_v27 }
 0xe55   : > { %3352 = vpow2.f32 %v3053_v29 }
 0xe56   : > { %3354 = vpow2.f32 %v3055_v7 }
 0xe5a   : > { %v3351_v3 = vpop.eup %3350 }
 0xe5b   : > { %2202 = vrot.lane.b32.xlu1 %v3351_v3, %s3577_s28  ;;  %v3353_v26 = vpop.eup %3352 }
 0xe5c   : > { %v2130_v4 = vadd.f32 1.0, %v3353_v26  ;;  %v3355_v32 = vpop.eup %3354 }
 0xe5d   : > { %v2132_v39 = vadd.f32 1.0, %v3355_v32 }
 0xe5e   : > { %3356 = vrcp.f32 %v2130_v4  ;;  %v2145_v0 = vand.u32 2147483648, %v2130_v4  ;;  %vm2139_vm2 = vweird.f32 %v2130_v4  ;;  %v2143_v46 = vand.u32 2147483647, %v2130_v4 }
 0xe5f   : > { %3358 = vrcp.f32 %v2132_v39  ;;  %v2175_v11 = vand.u32 2147483648, %v2132_v39  ;;  %vm2169_vm9 = vweird.f32 %v2132_v39  ;;  %v2173_v31 = vand.u32 2147483647, %v2132_v39 }
 0xe60   : > { %v2146_v63 = vor.u32 1.1754944e-38, %v2145_v0  ;;  %vm2144_vm7 = vcmp.eq.f32.partialorder %v2143_v46, 8.507059e+37  ;;  %v2236_v46 = vld [vmem:[#allocation3 + $0x10] sm:$0xff] }
 0xe61   : > { %v2176_v18 = vor.u32 1.1754944e-38, %v2175_v11  ;;  %vm2174_vm11 = vcmp.eq.f32.partialorder %v2173_v31, 8.507059e+37  ;;  %v2244_v11 = vld [vmem:[#allocation3 + $0x50] sm:$0xff]  ;;  %v2245_v31 = vld [vmem:[#allocation3 + $0x58] sm:$0xff] }
 0xe64   : > { %v3357_v43 = vpop.eup %3356 }
 0xe65   : > { %v2135_v17 = vmul.f32 %v3357_v43, %v2130_v4  ;;  %v3359_v51 = vpop.eup %3358  ;;  %vm2140_vm3 = vweird.f32 %v3357_v43 }
 0xe66   : > { %v2165_v58 = vmul.f32 %v3359_v51, %v2132_v39  ;;  %vm2141_vm6 = vmor %vm2139_vm2, %vm2140_vm3  ;;  %vm2170_vm8 = vweird.f32 %v3359_v51 }
 0xe67   : > { %v2136_v6 = vsub.f32 1.0, %v2135_v17  ;;  %vm2171_vm10 = vmor %vm2169_vm9, %vm2170_vm8 }
 0xe68   : > { %v2166_v47 = vsub.f32 1.0, %v2165_v58 }
 0xe69   : > { %v2137_v57 = vmul.f32 %v3357_v43, %v2136_v6 }
 0xe6a   : > { %v2167_v1 = vmul.f32 %v3359_v51, %v2166_v47 }
 0xe6b   : > { %v2138_v59 = vadd.f32 %v3357_v43, %v2137_v57 }
 0xe6c   : > { %v2168_v41 = vadd.f32 %v3359_v51, %v2167_v1  ;;  %v2238_v1 = vld [vmem:[#allocation3 + $0x20] sm:$0xff] }
 0xe6d   : > { %v2142_v12 = vsel %vm2141_vm6, %v3357_v43, %v2138_v59 }
 0xe6e   : > { %v2147_v49 = vsel %vm2144_vm7, %v2146_v63, %v2142_v12  ;;  %v2172_v62 = vsel %vm2171_vm10, %v3359_v51, %v2168_v41  ;;  %v2237_v12 = vld [vmem:[#allocation3 + $0x18] sm:$0xff]  ;;  %v2239_v63 = vld [vmem:[#allocation3 + $0x28] sm:$0xff] }
 0xe6f   : > { %v2177_v38 = vsel %vm2174_vm11, %v2176_v18, %v2172_v62  ;;  %v2196_v50 = vmul.f32 %v2147_v49, %v4542_v28  ;;  %v2255_v28 = vld [vmem:[%s5041_s5 + $0x28] sm:$0xff]  ;;  %v2246_v62 = vld [vmem:[#allocation3 + $0x60] sm:$0xff] }
 0xe70   : > { %2320 = vmatpush.msrb.mxu0 %v2255_v28  ;;  %3088 = vmatpush.msrb.mxu2 %v2255_v28  ;;  %v2197_v54 = vmul.f32 %v2177_v38, %v4547_v21  ;;  %v2250_v21 = vld [vmem:[%s5041_s5] sm:$0xff]  ;;  %v2243_v41 = vld [vmem:[#allocation3 + $0x48] sm:$0xff] }
 0xe71   : > { %v2247_v18 = vld [vmem:[#allocation3 + $0x68] sm:$0xff] }
 0xe72   : > { %2321 = vmatpush.msrb.mxu0 %v2254_v40  ;;  %3089 = vmatpush.msrb.mxu2 %v2254_v40 }
 0xe74   : > { %2322 = vmatpush.msrb.mxu0 %v2253_v60  ;;  %3090 = vmatpush.msrb.mxu2 %v2253_v60 }
 0xe76   : > { %2323 = vmatpush.msrb.mxu0 %v2252_v25  ;;  %3091 = vmatpush.msrb.mxu2 %v2252_v25 }
 0xe78   : > { %2324 = vmatpush.msrb.mxu0 %v2251_v16  ;;  %3092 = vmatpush.msrb.mxu2 %v2251_v16 }
 0xe7a   : > { %2325 = vmatpush.msrb.mxu0 %v2250_v21  ;;  %3093 = vmatpush.msrb.mxu2 %v2250_v21 }
 0xec5   : > { %v2201_v48 = vpop.permute.xlu0 %2200 }
 0xec6   : > { %v2206_v37 = vmul.f32 %v2201_v48, %v2147_v49  ;;  %v2240_v48 = vld [vmem:[#allocation3 + $0x30] sm:$0xff]  ;;  %v2241_v49 = vld [vmem:[#allocation3 + $0x38] sm:$0xff] }
 0xec8   : > { %2210 = vrot.lane.b32.xlu2 %v2206_v37, %s3577_s28  ;;  %v2242_v37 = vld [vmem:[#allocation3 + $0x40] sm:$0xff] }
 0xecd   : > { %v2203_v13 = vpop.permute.xlu1 %2202 }
 0xece   : > { %v2207_v45 = vmul.f32 %v2203_v13, %v2177_v38  ;;  %v4644_v38 = vld [vmem:[%s5042_s6] ss:$0 sm:$0xff] }
 0xed0   : > { %2212 = vrot.lane.b32.xlu0 %v2207_v45, %s3577_s28 }
 0xf22   : > { %v2211_v52 = vpop.permute.xlu2 %2210 }
 0xf23   : > { %v2216_v61 = vadd.f32 %v2211_v52, %v2196_v50 }
 0xf25   : > { %3360 = vtanh.f32 %v2216_v61 }
 0xf2b   : > { %v3361_v5 = vpop.eup %3360 }
 0xf2c   : > { %2222 = vrot.lane.b32.xlu1 %v3361_v5, %s3577_s28 }
 0xf42   : > { %v2213_v9 = vpop.permute.xlu0 %2212 }
 0xf43   : > { %v2217_v10 = vadd.f32 %v2213_v9, %v2197_v54 }
 0xf45   : > { %3362 = vtanh.f32 %v2217_v10 }
 0xf46   : > { %3364 = vpow2.f32 %v3054_v20 }
 0xf47   : > { %3366 = vpow2.f32 %v3056_v23 }
 0xf4b   : > { %v3363_v55 = vpop.eup %3362 }
 0xf4c   : > { %2224 = vrot.lane.b32.xlu2 %v3363_v55, %s3577_s28  ;;  %v3365_v53 = vpop.eup %3364  ;;  %s3498_s28 = scalar_lea.hbm %s3497_s30, 128 }
 0xf4d   : > { %v2131_v42 = vadd.f32 1.0, %v3365_v53  ;;  %v3367_v19 = vpop.eup %3366  ;;  %p3499_p1 = scmp.ne.s32.totalorder %s3497_s30, %s3498_s28  ;;  %p3504_p12 = scmp.lt.s32.totalorder %s3502_s24, %s3498_s28 }
 0xf4e   : > { %v2133_v22 = vadd.f32 1.0, %v3367_v19 }
 0xf4f   : > { %3368 = vrcp.f32 %v2131_v42  ;;  %v2160_v15 = vand.u32 2147483648, %v2131_v42  ;;  %vm2154_vm13 = vweird.f32 %v2131_v42  ;;  %v2158_v34 = vand.u32 2147483647, %v2131_v42  ;;  %p3500_p4 = pnand %p3499_p1, %p3710_p5  ;;  %p3505_p13 = por %p3504_p12, %p3503_p10 }
 0xf50   : > { %3370 = vrcp.f32 %v2133_v22  ;;  %v2190_v39 = vand.u32 2147483648, %v2133_v22  ;;  %vm2184_vm2 = vweird.f32 %v2133_v22  ;;  %v2188_v43 = vand.u32 2147483647, %v2133_v22 }
 0xf51   : > { %v2161_v2 = vor.u32 1.1754944e-38, %v2160_v15  ;;  %vm2159_vm15 = vcmp.eq.f32.partialorder %v2158_v34, 8.507059e+37  ;;  %p3501_p8 = pneg %p3500_p4 }
 0xf52   : > { %v2191_v6 = vor.u32 1.1754944e-38, %v2190_v39  ;;  %vm2189_vm7 = vcmp.eq.f32.partialorder %v2188_v43, 8.507059e+37 }
 0xf53   : > { %p3506_p0 = pnand %p3505_p13, %p3501_p8 }
 0xf55   : > { %v3369_v3 = vpop.eup %3368 }
 0xf56   : > { %v2150_v27 = vmul.f32 %v3369_v3, %v2131_v42  ;;  %v3371_v30 = vpop.eup %3370  ;;  %vm2155_vm12 = vweird.f32 %v3369_v3 }
 0xf57   : > { %v2180_v24 = vmul.f32 %v3371_v30, %v2133_v22  ;;  %vm2156_vm14 = vmor %vm2154_vm13, %vm2155_vm12  ;;  %vm2185_vm3 = vweird.f32 %v3371_v30 }
 0xf58   : > { %v2151_v44 = vsub.f32 1.0, %v2150_v27  ;;  %vm2186_vm6 = vmor %vm2184_vm2, %vm2185_vm3 }
 0xf59   : > { %v2181_v29 = vsub.f32 1.0, %v2180_v24 }
 0xf5a   : > { %v2152_v33 = vmul.f32 %v3369_v3, %v2151_v44 }
 0xf5b   : > { %v2182_v8 = vmul.f32 %v3371_v30, %v2181_v29 }
 0xf5c   : > { %v2153_v14 = vadd.f32 %v3369_v3, %v2152_v33 }
 0xf5d   : > { %v2183_v32 = vadd.f32 %v3371_v30, %v2182_v8 }
 0xf5e   : > { %v2157_v36 = vsel %vm2156_vm14, %v3369_v3, %v2153_v14 }
 0xf5f   : > { %v2162_v7 = vsel %vm2159_vm15, %v2161_v2, %v2157_v36  ;;  %v2187_v17 = vsel %vm2186_vm6, %v3371_v30, %v2183_v32 }
 0xf60   : > { %v2192_v51 = vsel %vm2189_vm7, %v2191_v6, %v2187_v17 }
 0xf9e   : > { %v2223_v26 = vpop.permute.xlu1 %2222 }
 0xf9f   : > { %v2228_v4 = vmul.f32 %v2223_v26, %v2162_v7 }
 0xfa1   : > { %2230 = vst.msk [vmem:[#allocation3 + $0x70] sm:$0xff] %vm828_vm1, %v2228_v4 }
 0xfa2   : > { %2232 = vst.msk [vmem:[#allocation3] sm:$0xff] %vm831_vm5, %v2228_v4 }
 0xfa6   : > { %v2225_v57 = vpop.permute.xlu2 %2224 }
 0xfa7   : > { %v2229_v58 = vmul.f32 %v2225_v57, %v2192_v51 }
 0xfa8   : > { %v2248_v13 = vld [vmem:[#allocation3 + $0x70] sm:$0xff] }
 0xfa9   : > { %2231 = vst.msk [vmem:[#allocation3 + $0x78] sm:$0xff] %vm828_vm1, %v2229_v58  ;;  %v2234_v59 = vld [vmem:[#allocation3] sm:$0xff] }
 0xfaa   : > { %2233 = vst.msk [vmem:[#allocation3 + $0x8] sm:$0xff] %vm831_vm5, %v2229_v58  ;;  %3057 = vmatmul.msk.f32.vlgmr.msrb.gmra.mxu0 %vm662_vm4, %v2234_v59 }
 0xfb0   : > { %v2249_v47 = vld [vmem:[#allocation3 + $0x78] sm:$0xff] }
 0xfb1   : > { %v2235_v0 = vld [vmem:[#allocation3 + $0x8] sm:$0xff]  ;;  %3072 = vmatmul.msk.f32.vlgmr.msrb.gmra.mxu2 %vm662_vm4, %v2249_v47 }
 0xfb2   : > { %3058 = vmatmul.msk.f32.gmra.mxu0 %vm662_vm4, %v2235_v0 }
 0xfba   : > { %3059 = vmatmul.msk.f32.gmra.mxu0 %vm662_vm4, %v2236_v46 }
 0xfc2   : > { %3060 = vmatmul.msk.f32.gmra.mxu0 %vm662_vm4, %v2237_v12 }
 0xfca   : > { %3061 = vmatmul.msk.f32.gmra.mxu0 %vm662_vm4, %v2238_v1 }
 0xfd2   : > { %3062 = vmatmul.msk.f32.gmra.mxu0 %vm662_vm4, %v2239_v63 }
 0xfda   : > { %3063 = vmatmul.msk.f32.gmra.mxu0 %vm662_vm4, %v2240_v48 }
 0xfe2   : > { %3064 = vmatmul.msk.f32.gmra.mxu0 %vm662_vm4, %v2241_v49 }
 0xfea   : > { %3065 = vmatmul.msk.f32.gmra.mxu0 %vm662_vm4, %v2242_v37 }
 0xff2   : > { %3066 = vmatmul.msk.f32.gmra.mxu0 %vm662_vm4, %v2243_v41 }
 0xffa   : > { %3067 = vmatmul.msk.f32.gmra.mxu0 %vm662_vm4, %v2244_v11 }
0x1002   : > { %3068 = vmatmul.msk.f32.gmra.mxu0 %vm662_vm4, %v2245_v31 }
0x100a   : > { %3069 = vmatmul.msk.f32.gmra.mxu0 %vm662_vm4, %v2246_v62 }
0x1012   : > { %3070 = vmatmul.msk.f32.gmra.mxu0 %vm662_vm4, %v2247_v18 }
0x101a   : > { %3071 = vmatmul.msk.f32.gmra.mxu0 %vm662_vm4, %v2248_v13 }
0x1027   : > { %v2327_v45 = vpop.f32.mrf.mxu0 }
0x1028   : > { %v4647_v50 = vadd.f32 %v4644_v38, %v2327_v45 }
0x102a   : > { %v2375_v52 = vsel %vm416_vm0, %v4647_v50, 0.0  ;;  %v2446_v61 = vmul.f32 %v4647_v50, %v4647_v50 }
0x102b   : > { %2376 = vadd.xlane.f32.xlu0 %v2375_v52  ;;  %v3578_v52 = vmov 16.0  }
0x102c   : > { %v2462_v35 = vsel %vm416_vm0, %v2446_v61, 0.0  ;;  %3372 = vrcp.f32 %v3578_v52 }
0x102f   : > { %v2330_v5 = vpop.f32.mrf.mxu0 }
0x1030   : > { %v4654_v56 = vadd.f32 %v4644_v38, %v2330_v5 }
0x1032   : > { %v2378_v28 = vsel %vm416_vm0, %v4654_v56, 0.0  ;;  %v2447_v25 = vmul.f32 %v4654_v56, %v4654_v56 }
0x1033   : > { %2463 = vadd.xlane.f32.xlu0 %v2462_v35  ;;  %2379 = vadd.xlane.f32.xlu1 %v2378_v28 }
0x1034   : > { %v2372_v40 = vpop.f32.mrf.mxu2  ;;  %v2465_v10 = vsel %vm416_vm0, %v2447_v25, 0.0 }
0x1035   : > { %v4660_v60 = vadd.f32 %v4644_v38, %v2372_v40  ;;  %v3373_v40 = vpop.eup %3372 }
0x1036   : > { %vm2428_vm1 = vweird.f32 %v3373_v40 }
0x1037   : > { %v2333_v54 = vpop.f32.mrf.mxu0  ;;  %v2420_v9 = vsel %vm416_vm0, %v4660_v60, 0.0 }
0x1038   : > { %2421 = vadd.xlane.f32.xlu2 %v2420_v9  ;;  %v4668_v55 = vadd.f32 %v4644_v38, %v2333_v54  ;;  %v2424_v9 = vmul.f32 16.0, %v3373_v40 }
0x103a   : > { %v2381_v23 = vsel %vm416_vm0, %v4668_v55, 0.0  ;;  %v2448_v16 = vmul.f32 %v4668_v55, %v4668_v55 }
0x103b   : > { %2466 = vadd.xlane.f32.xlu1 %v2465_v10 }
0x103c   : > { %v2468_v22 = vsel %vm416_vm0, %v2448_v16, 0.0  ;;  %v2461_v16 = vmul.f32 %v4660_v60, %v4660_v60 }
0x103f   : > { %v2336_v20 = vpop.f32.mrf.mxu0 }
0x1040   : > { %v4673_v53 = vadd.f32 %v4644_v38, %v2336_v20  ;;  %2382 = vadd.xlane.f32.xlu2 %v2381_v23  ;;  %v2425_v20 = vsub.f32 1.0, %v2424_v9  ;;  %v4797_v9 = vld [vmem:[%s5044_s8] ss:$0 sm:$0xff] }
0x1042   : > { %v2449_v42 = vmul.f32 %v4673_v53, %v4673_v53  ;;  %v2384_v24 = vsel %vm416_vm0, %v4673_v53, 0.0 }
0x1044   : > { %v2471_v21 = vsel %vm416_vm0, %v2449_v42, 0.0 }
0x1045   : > { %2472 = vadd.xlane.f32.xlu0 %v2471_v21  ;;  %v2426_v21 = vmul.f32 %v3373_v40, %v2425_v20 }
0x1047   : > { %v2339_v19 = vpop.f32.mrf.mxu0 }
0x1048   : > { %v4682_v3 = vadd.f32 %v4644_v38, %v2339_v19  ;;  %2469 = vadd.xlane.f32.xlu2 %v2468_v22 }
0x104a   : > { %v2450_v27 = vmul.f32 %v4682_v3, %v4682_v3  ;;  %v2387_v44 = vsel %vm416_vm0, %v4682_v3, 0.0 }
0x104c   : > { %v2474_v30 = vsel %vm416_vm0, %v2450_v27, 0.0  ;;  %v2507_v27 = vsel %vm416_vm0, %v2461_v16, 0.0 }
0x104d   : > { %2388 = vadd.xlane.f32.xlu0 %v2387_v44  ;;  %2475 = vadd.xlane.f32.xlu1 %v2474_v30  ;;  %v2427_v30 = vadd.f32 %v3373_v40, %v2426_v21 }
0x104f   : > { %v2342_v33 = vpop.f32.mrf.mxu0 }
0x1050   : > { %v4692_v14 = vadd.f32 %v4644_v38, %v2342_v33  ;;  %2385 = vadd.xlane.f32.xlu2 %v2384_v24  ;;  %v4773_v24 = vsel %vm2428_vm1, %v3373_v40, %v2427_v30 }
0x1052   : > { %v2451_v29 = vmul.f32 %v4692_v14, %v4692_v14  ;;  %v2390_v15 = vsel %vm416_vm0, %v4692_v14, 0.0 }
0x1054   : > { %v2477_v36 = vsel %vm416_vm0, %v2451_v29, 0.0 }
0x1055   : > { %2391 = vadd.xlane.f32.xlu1 %v2390_v15 }
0x1057   : > { %v2345_v34 = vpop.f32.mrf.mxu0 }
0x1058   : > { %v4700_v8 = vadd.f32 %v4644_v38, %v2345_v34  ;;  %2478 = vadd.xlane.f32.xlu2 %v2477_v36 }
0x105a   : > { %v2452_v2 = vmul.f32 %v4700_v8, %v4700_v8  ;;  %v2393_v4 = vsel %vm416_vm0, %v4700_v8, 0.0 }
0x105c   : > { %v2480_v7 = vsel %vm416_vm0, %v2452_v2, 0.0 }
0x105d   : > { %2481 = vadd.xlane.f32.xlu0 %v2480_v7 }
0x105f   : > { %v2348_v26 = vpop.f32.mrf.mxu0 }
0x1060   : > { %v4708_v32 = vadd.f32 %v4644_v38, %v2348_v26  ;;  %2394 = vadd.xlane.f32.xlu2 %v2393_v4 }
0x1062   : > { %v2453_v39 = vmul.f32 %v4708_v32, %v4708_v32  ;;  %v2396_v43 = vsel %vm416_vm0, %v4708_v32, 0.0 }
0x1064   : > { %v2483_v17 = vsel %vm416_vm0, %v2453_v39, 0.0 }
0x1065   : > { %2397 = vadd.xlane.f32.xlu0 %v2396_v43  ;;  %2484 = vadd.xlane.f32.xlu1 %v2483_v17 }
0x1067   : > { %v2351_v6 = vpop.f32.mrf.mxu0 }
0x1068   : > { %v4716_v51 = vadd.f32 %v4644_v38, %v2351_v6 }
0x106a   : > { %v2454_v57 = vmul.f32 %v4716_v51, %v4716_v51  ;;  %v2399_v58 = vsel %vm416_vm0, %v4716_v51, 0.0 }
0x106c   : > { %v2486_v59 = vsel %vm416_vm0, %v2454_v57, 0.0 }
0x106d   : > { %2400 = vadd.xlane.f32.xlu1 %v2399_v58  ;;  %2487 = vadd.xlane.f32.xlu2 %v2486_v59 }
0x106f   : > { %v2354_v47 = vpop.f32.mrf.mxu0 }
0x1070   : > { %v4724_v0 = vadd.f32 %v4644_v38, %v2354_v47 }
0x1072   : > { %v2455_v46 = vmul.f32 %v4724_v0, %v4724_v0  ;;  %v2402_v1 = vsel %vm416_vm0, %v4724_v0, 0.0 }
0x1074   : > { %v2489_v12 = vsel %vm416_vm0, %v2455_v46, 0.0 }
0x1075   : > { %2490 = vadd.xlane.f32.xlu0 %v2489_v12  ;;  %2403 = vadd.xlane.f32.xlu2 %v2402_v1 }
0x1077   : > { %v2357_v63 = vpop.f32.mrf.mxu0 }
0x1078   : > { %v4732_v48 = vadd.f32 %v4644_v38, %v2357_v63 }
0x107a   : > { %v2456_v49 = vmul.f32 %v4732_v48, %v4732_v48  ;;  %v2405_v37 = vsel %vm416_vm0, %v4732_v48, 0.0 }
0x107c   : > { %v2492_v41 = vsel %vm416_vm0, %v2456_v49, 0.0 }
0x107d   : > { %2406 = vadd.xlane.f32.xlu0 %v2405_v37  ;;  %2493 = vadd.xlane.f32.xlu1 %v2492_v41 }
0x107f   : > { %v2360_v11 = vpop.f32.mrf.mxu0 }
0x1080   : > { %v4740_v31 = vadd.f32 %v4644_v38, %v2360_v11 }
0x1082   : > { %v2457_v62 = vmul.f32 %v4740_v31, %v4740_v31  ;;  %v2408_v18 = vsel %vm416_vm0, %v4740_v31, 0.0 }
0x1084   : > { %v2495_v13 = vsel %vm416_vm0, %v2457_v62, 0.0 }
0x1085   : > { %2409 = vadd.xlane.f32.xlu1 %v2408_v18  ;;  %2496 = vadd.xlane.f32.xlu2 %v2495_v13 }
0x1087   : > { %v2363_v45 = vpop.f32.mrf.mxu0 }
0x1088   : > { %v4748_v61 = vadd.f32 %v4644_v38, %v2363_v45 }
0x108a   : > { %v2458_v5 = vmul.f32 %v4748_v61, %v4748_v61  ;;  %v2411_v28 = vsel %vm416_vm0, %v4748_v61, 0.0 }
0x108c   : > { %v2498_v35 = vsel %vm416_vm0, %v2458_v5, 0.0 }
0x108d   : > { %2499 = vadd.xlane.f32.xlu0 %v2498_v35  ;;  %2412 = vadd.xlane.f32.xlu2 %v2411_v28  ;;  %v4792_v35 = vld [vmem:[%s5043_s7] ss:$0 sm:$0xff] }
0x108f   : > { %v2366_v25 = vpop.f32.mrf.mxu0 }
0x1090   : > { %v4756_v54 = vadd.f32 %v4644_v38, %v2366_v25 }
0x1092   : > { %v2414_v10 = vsel %vm416_vm0, %v4756_v54, 0.0  ;;  %v2459_v33 = vmul.f32 %v4756_v54, %v4756_v54 }
0x1094   : > { %v2501_v29 = vsel %vm416_vm0, %v2459_v33, 0.0 }
0x1095   : > { %2415 = vadd.xlane.f32.xlu0 %v2414_v10 }
0x1097   : > { %v2369_v23 = vpop.f32.mrf.mxu0 }
0x1098   : > { %v4761_v42 = vadd.f32 %v4644_v38, %v2369_v23 }
0x109a   : > { %v2417_v19 = vsel %vm416_vm0, %v4761_v42, 0.0  ;;  %v2460_v22 = vmul.f32 %v4761_v42, %v4761_v42 }
0x109b   : > { %2418 = vadd.xlane.f32.xlu1 %v2417_v19 }
0x109c   : > { %v2504_v44 = vsel %vm416_vm0, %v2460_v22, 0.0 }
0x109d   : > { %2508 = vadd.xlane.f32.xlu0 %v2507_v27  ;;  %2505 = vadd.xlane.f32.xlu2 %v2504_v44 }
0x109e   : > { %v2377_v38 = vpop.xlane.xlu0 %2376 }
0x109f   : > { %v2430_v15 = vmul.f32 %v4773_v24, %v2377_v38 }
0x10a1   : > { %v2526_v2 = vmul.f32 %v2430_v15, %v2430_v15  ;;  %v2558_v5 = vsub.f32 %v4647_v50, %v2430_v15  ;;  %v3406_v15 = vld [vmem:[%s3736_s20] sm:$0xff] }
0x10a3   : > { %2502 = vadd.xlane.f32.xlu1 %v2501_v29 }
0x10a6   : > { %v2464_v34 = vpop.xlane.xlu0 %2463  ;;  %v2380_v36 = vpop.xlane.xlu1 %2379 }
0x10a7   : > { %v2510_v7 = vmul.f32 %v2464_v34, %v4773_v24  ;;  %v2431_v39 = vmul.f32 %v4773_v24, %v2380_v36 }
0x10a9   : > { %v2542_v26 = vsub.f32 %v2510_v7, %v2526_v2  ;;  %v2527_v6 = vmul.f32 %v2431_v39, %v2431_v39  ;;  %v2559_v36 = vsub.f32 %v4654_v56, %v2431_v39 }
0x10ab   : > { %v2574_v4 = vadd.f32 1e-05, %v2542_v26  ;;  %v4779_v43 = vpop.xlane.xlu2 %2421 }
0x10ad   : > { %3374 = vrsqrt.f32 %v2574_v4  ;;  %vm2596_vm5 = vweird.f32 %v2574_v4 }
0x10ae   : > { %v2467_v17 = vpop.xlane.xlu1 %2466 }
0x10af   : > { %v2511_v57 = vmul.f32 %v2467_v17, %v4773_v24 }
0x10b1   : > { %v2543_v58 = vsub.f32 %v2511_v57, %v2527_v6 }
0x10b3   : > { %v3375_v59 = vpop.eup %3374  ;;  %v2575_v47 = vadd.f32 1e-05, %v2543_v58  ;;  %v2383_v46 = vpop.xlane.xlu2 %2382 }
0x10b4   : > { %v2591_v12 = vmul.f32 %v3375_v59, %v2574_v4  ;;  %v4783_v49 = vmul.f32 %v4773_v24, %v2383_v46  ;;  %vm2597_vm4 = vweird.f32 %v3375_v59 }
0x10b5   : > { %3376 = vrsqrt.f32 %v2575_v47  ;;  %vm2598_vm8 = vmor %vm2596_vm5, %vm2597_vm4  ;;  %vm2606_vm10 = vweird.f32 %v2575_v47 }
0x10b6   : > { %v2592_v1 = vmul.f32 %v3375_v59, %v2591_v12  ;;  %v2528_v45 = vmul.f32 %v4783_v49, %v4783_v49 }
0x10b8   : > { %v2593_v63 = vmul.f32 0.5, %v2592_v1  ;;  %v2473_v37 = vpop.xlane.xlu0 %2472 }
0x10b9   : > { %v2513_v26 = vmul.f32 %v2473_v37, %v4773_v24  ;;  %v3407_v37 = vld [vmem:[%s3736_s20 + $0x8] sm:$0xff] }
0x10ba   : > { %v2594_v41 = vsub.f32 1.5, %v2593_v63 }
0x10bb   : > { %v3377_v11 = vpop.eup %3376  ;;  %v2470_v62 = vpop.xlane.xlu2 %2469 }
0x10bc   : > { %v2595_v18 = vmul.f32 %v3375_v59, %v2594_v41  ;;  %v2601_v13 = vmul.f32 %v3377_v11, %v2575_v47  ;;  %v2512_v52 = vmul.f32 %v2470_v62, %v4773_v24  ;;  %vm2607_vm9 = vweird.f32 %v3377_v11 }
0x10bd   : > { %vm2608_vm11 = vmor %vm2606_vm10, %vm2607_vm9 }
0x10be   : > { %v2599_v28 = vsel %vm2598_vm8, %v3375_v59, %v2595_v18  ;;  %v2602_v40 = vmul.f32 %v3377_v11, %v2601_v13  ;;  %v2544_v25 = vsub.f32 %v2512_v52, %v2528_v45 }
0x10bf   : > { %v2750_v10 = vmul.f32 %v2599_v28, %v2558_v5 }
0x10c0   : > { %v2603_v20 = vmul.f32 0.5, %v2602_v40  ;;  %v2576_v23 = vadd.f32 1e-05, %v2544_v25  ;;  %v2389_v16 = vpop.xlane.xlu0 %2388  ;;  %v2476_v50 = vpop.xlane.xlu1 %2475 }
0x10c1   : > { %v2770_v21 = vmul.f32 %v4792_v35, %v2750_v10  ;;  %v4801_v19 = vmul.f32 %v4773_v24, %v2389_v16  ;;  %v2514_v30 = vmul.f32 %v2476_v50, %v4773_v24 }
0x10c2   : > { %v2604_v22 = vsub.f32 1.5, %v2603_v20  ;;  %3378 = vrsqrt.f32 %v2576_v23  ;;  %vm2616_vm13 = vweird.f32 %v2576_v23  ;;  %v2560_v20 = vsub.f32 %v4668_v55, %v4783_v49 }
0x10c3   : > { %v2790_v27 = vadd.f32 %v4797_v9, %v2770_v21  ;;  %v2530_v44 = vmul.f32 %v4801_v19, %v4801_v19  ;;  %v2386_v38 = vpop.xlane.xlu2 %2385 }
0x10c4   : > { %v2605_v33 = vmul.f32 %v3377_v11, %v2604_v22  ;;  %v4808_v29 = vmul.f32 %v4773_v24, %v2386_v38 }
0x10c5   : > { %v2806_v34 = vadd.f32 %v3406_v15, %v2790_v27  ;;  %v2546_v2 = vsub.f32 %v2514_v30, %v2530_v44 }
0x10c6   : > { %v2609_v7 = vsel %vm2608_vm11, %v3377_v11, %v2605_v33  ;;  %v2529_v4 = vmul.f32 %v4808_v29, %v4808_v29 }
0x10c7   : > { %2822 = vst.msk [vmem:[%s4817_s19] sm:$0xff] %vm416_vm0, %v2806_v34  ;;  %v2751_v17 = vmul.f32 %v2609_v7, %v2559_v36  ;;  %v2578_v6 = vadd.f32 1e-05, %v2546_v2 }
0x10c8   : > { %v3379_v57 = vpop.eup %3378  ;;  %v2545_v58 = vsub.f32 %v2513_v26, %v2529_v4  ;;  %v2392_v56 = vpop.xlane.xlu1 %2391 }
0x10c9   : > { %v2771_v39 = vmul.f32 %v4792_v35, %v2751_v17  ;;  %v2611_v59 = vmul.f32 %v3379_v57, %v2576_v23  ;;  %3380 = vrsqrt.f32 %v2578_v6  ;;  %v4823_v46 = vmul.f32 %v4773_v24, %v2392_v56  ;;  %v3408_v56 = vld [vmem:[%s3736_s20 + $0x10] sm:$0xff] }
0x10ca   : > { %v2577_v47 = vadd.f32 1e-05, %v2545_v58  ;;  %vm2617_vm12 = vweird.f32 %v3379_v57  ;;  %vm2636_vm3 = vweird.f32 %v2578_v6  ;;  %v2562_v17 = vsub.f32 %v4682_v3, %v4801_v19 }
0x10cb   : > { %v2791_v12 = vadd.f32 %v4797_v9, %v2771_v39  ;;  %v2612_v1 = vmul.f32 %v3379_v57, %v2611_v59  ;;  %v2479_v63 = vpop.xlane.xlu2 %2478  ;;  %v2531_v62 = vmul.f32 %v4823_v46, %v4823_v46  ;;  %vm2618_vm14 = vmor %vm2616_vm13, %vm2617_vm12  ;;  %v2561_v3 = vsub.f32 %v4673_v53, %v4808_v29 }
0x10cc   : > { %3382 = vrsqrt.f32 %v2577_v47  ;;  %v2515_v18 = vmul.f32 %v2479_v63, %v4773_v24  ;;  %vm2626_vm7 = vweird.f32 %v2577_v47 }
0x10cd   : > { %v2807_v41 = vadd.f32 %v3407_v37, %v2791_v12  ;;  %v2613_v11 = vmul.f32 0.5, %v2612_v1 }
0x10ce   : > { %v2547_v52 = vsub.f32 %v2515_v18, %v2531_v62 }
0x10cf   : > { %v3381_v13 = vpop.eup %3380  ;;  %2823 = vst.msk [vmem:[%s4817_s19 + $0x8] sm:$0xff] %vm416_vm0, %v2807_v41  ;;  %v2614_v45 = vsub.f32 1.5, %v2613_v11 }
0x10d0   : > { %v2631_v5 = vmul.f32 %v3381_v13, %v2578_v6  ;;  %v2482_v28 = vpop.xlane.xlu0 %2481  ;;  %v4832_v25 = vadd.f32 1e-05, %v2547_v52  ;;  %vm2637_vm15 = vweird.f32 %v3381_v13 }
0x10d1   : > { %v2615_v40 = vmul.f32 %v3379_v57, %v2614_v45  ;;  %v2516_v55 = vmul.f32 %v2482_v28, %v4773_v24  ;;  %vm2638_vm2 = vmor %vm2636_vm3, %vm2637_vm15 }
0x10d2   : > { %v3383_v10 = vpop.eup %3382  ;;  %v2632_v16 = vmul.f32 %v3381_v13, %v2631_v5  ;;  %3384 = vrsqrt.f32 %v4832_v25  ;;  %vm2646_vm5 = vweird.f32 %v4832_v25 }
0x10d3   : > { %v2619_v50 = vsel %vm2618_vm14, %v3379_v57, %v2615_v40  ;;  %v2621_v21 = vmul.f32 %v3383_v10, %v2577_v47  ;;  %v2395_v22 = vpop.xlane.xlu2 %2394  ;;  %vm2627_vm6 = vweird.f32 %v3383_v10  ;;  %v3409_v40 = vld [vmem:[%s3736_s20 + $0x20] sm:$0xff] }
0x10d4   : > { %v2752_v27 = vmul.f32 %v2619_v50, %v2560_v20  ;;  %v2633_v44 = vmul.f32 0.5, %v2632_v16  ;;  %v4838_v30 = vmul.f32 %v4773_v24, %v2395_v22  ;;  %vm2628_vm1 = vmor %vm2626_vm7, %vm2627_vm6  ;;  %v2563_v22 = vsub.f32 %v4692_v14, %v4823_v46 }
0x10d5   : > { %v2622_v23 = vmul.f32 %v3383_v10, %v2621_v21 }
0x10d6   : > { %v2772_v38 = vmul.f32 %v4792_v35, %v2752_v27  ;;  %v2634_v33 = vsub.f32 1.5, %v2633_v44  ;;  %v2532_v49 = vmul.f32 %v4838_v30, %v4838_v30 }
0x10d7   : > { %v2623_v15 = vmul.f32 0.5, %v2622_v23  ;;  %v3410_v23 = vld [vmem:[%s3736_s20 + $0x18] sm:$0xff] }
0x10d8   : > { %v2792_v34 = vadd.f32 %v4797_v9, %v2772_v38  ;;  %v2635_v36 = vmul.f32 %v3381_v13, %v2634_v33  ;;  %v2548_v2 = vsub.f32 %v2516_v55, %v2532_v49  ;;  %v2398_v7 = vpop.xlane.xlu0 %2397  ;;  %v2485_v26 = vpop.xlane.xlu1 %2484 }
0x10d9   : > { %v3385_v4 = vpop.eup %3384  ;;  %v2624_v57 = vsub.f32 1.5, %v2623_v15  ;;  %v4849_v58 = vmul.f32 %v4773_v24, %v2398_v7  ;;  %v2517_v41 = vmul.f32 %v2485_v26, %v4773_v24 }
0x10da   : > { %v2808_v39 = vadd.f32 %v3408_v56, %v2792_v34  ;;  %v2639_v59 = vsel %vm2638_vm2, %v3381_v13, %v2635_v36  ;;  %v2641_v6 = vmul.f32 %v3385_v4, %v4832_v25  ;;  %v2580_v63 = vadd.f32 1e-05, %v2548_v2  ;;  %v3411_v56 = vld [vmem:[%s3736_s20 + $0x28] sm:$0xff] }
0x10db   : > { %v2754_v12 = vmul.f32 %v2639_v59, %v2562_v17  ;;  %v2625_v1 = vmul.f32 %v3383_v10, %v2624_v57  ;;  %v2533_v37 = vmul.f32 %v4849_v58, %v4849_v58  ;;  %vm2647_vm4 = vweird.f32 %v3385_v4 }
0x10dc   : > { %2824 = vst.msk [vmem:[%s4817_s19 + $0x10] sm:$0xff] %vm416_vm0, %v2808_v39  ;;  %v2642_v19 = vmul.f32 %v3385_v4, %v2641_v6  ;;  %3386 = vrsqrt.f32 %v2580_v63  ;;  %vm2648_vm8 = vmor %vm2646_vm5, %vm2647_vm4  ;;  %vm2656_vm10 = vweird.f32 %v2580_v63 }
0x10dd   : > { %v2774_v47 = vmul.f32 %v4792_v35, %v2754_v12  ;;  %v2629_v11 = vsel %vm2628_vm1, %v3383_v10, %v2625_v1  ;;  %v2549_v13 = vsub.f32 %v2517_v41, %v2533_v37  ;;  %v2564_v37 = vsub.f32 %v4700_v8, %v4838_v30 }
0x10de   : > { %v2753_v62 = vmul.f32 %v2629_v11, %v2561_v3  ;;  %v2643_v18 = vmul.f32 0.5, %v2642_v19  ;;  %v2565_v8 = vsub.f32 %v4708_v32, %v4849_v58 }
0x10df   : > { %v2794_v45 = vadd.f32 %v4797_v9, %v2774_v47  ;;  %v2581_v53 = vadd.f32 1e-05, %v2549_v13 }
0x10e0   : > { %v2773_v52 = vmul.f32 %v4792_v35, %v2753_v62  ;;  %v2644_v5 = vsub.f32 1.5, %v2643_v18  ;;  %v2401_v29 = vpop.xlane.xlu1 %2400  ;;  %v2488_v28 = vpop.xlane.xlu2 %2487 }
0x10e1   : > { %v2810_v20 = vadd.f32 %v3409_v40, %v2794_v45  ;;  %v4865_v16 = vmul.f32 %v4773_v24, %v2401_v29  ;;  %3388 = vrsqrt.f32 %v2581_v53  ;;  %v2518_v44 = vmul.f32 %v2488_v28, %v4773_v24 }
0x10e2   : > { %v2793_v10 = vadd.f32 %v4797_v9, %v2773_v52  ;;  %v2645_v50 = vmul.f32 %v3385_v4, %v2644_v5  ;;  %v3387_v21 = vpop.eup %3386  ;;  %vm2666_vm13 = vweird.f32 %v2581_v53 }
0x10e3   : > { %2826 = vst.msk [vmem:[%s4817_s19 + $0x20] sm:$0xff] %vm416_vm0, %v2810_v20  ;;  %v2534_v27 = vmul.f32 %v4865_v16, %v4865_v16  ;;  %v2651_v55 = vmul.f32 %v3387_v21, %v2580_v63  ;;  %vm2657_vm9 = vweird.f32 %v3387_v21 }
0x10e4   : > { %v2809_v38 = vadd.f32 %v3410_v23, %v2793_v10  ;;  %v2649_v33 = vsel %vm2648_vm8, %v3385_v4, %v2645_v50  ;;  %vm2658_vm11 = vmor %vm2656_vm10, %vm2657_vm9 }
0x10e5   : > { %v2755_v49 = vmul.f32 %v2649_v33, %v2563_v22  ;;  %v2550_v25 = vsub.f32 %v2518_v44, %v2534_v27  ;;  %v2652_v15 = vmul.f32 %v3387_v21, %v2651_v55 }
0x10e6   : > { %2825 = vst.msk [vmem:[%s4817_s19 + $0x18] sm:$0xff] %vm416_vm0, %v2809_v38 }
0x10e7   : > { %v2775_v34 = vmul.f32 %v4792_v35, %v2755_v49  ;;  %v2582_v36 = vadd.f32 1e-05, %v2550_v25  ;;  %v3389_v14 = vpop.eup %3388  ;;  %v2653_v46 = vmul.f32 0.5, %v2652_v15  ;;  %v2566_v25 = vsub.f32 %v4716_v51, %v4865_v16 }
0x10e8   : > { %v2491_v2 = vpop.xlane.xlu0 %2490  ;;  %v2404_v7 = vpop.xlane.xlu2 %2403  ;;  %v2661_v17 = vmul.f32 %v3389_v14, %v2581_v53  ;;  %vm2667_vm12 = vweird.f32 %v3389_v14 }
0x10e9   : > { %v2795_v26 = vadd.f32 %v4797_v9, %v2775_v34  ;;  %3390 = vrsqrt.f32 %v2582_v36  ;;  %v2654_v4 = vsub.f32 1.5, %v2653_v46  ;;  %v4882_v57 = vmul.f32 %v4773_v24, %v2404_v7  ;;  %vm2668_vm14 = vmor %vm2666_vm13, %vm2667_vm12  ;;  %v3413_v34 = vld [vmem:[%s3736_s20 + $0x38] sm:$0xff] }
0x10ea   : > { %v2662_v59 = vmul.f32 %v3389_v14, %v2661_v17  ;;  %v2519_v12 = vmul.f32 %v2491_v2, %v4773_v24  ;;  %vm2676_vm3 = vweird.f32 %v2582_v36 }
0x10eb   : > { %v2811_v39 = vadd.f32 %v3411_v56, %v2795_v26  ;;  %v2655_v6 = vmul.f32 %v3387_v21, %v2654_v4  ;;  %v2535_v1 = vmul.f32 %v4882_v57, %v4882_v57 }
0x10ec   : > { %v2663_v3 = vmul.f32 0.5, %v2662_v59 }
0x10ed   : > { %2827 = vst.msk [vmem:[%s4817_s19 + $0x28] sm:$0xff] %vm416_vm0, %v2811_v39  ;;  %v2659_v19 = vsel %vm2658_vm11, %v3387_v21, %v2655_v6  ;;  %v2551_v41 = vsub.f32 %v2519_v12, %v2535_v1  ;;  %v3412_v21 = vld [vmem:[%s3736_s20 + $0x30] sm:$0xff] }
0x10ee   : > { %v2756_v11 = vmul.f32 %v2659_v19, %v2564_v37  ;;  %v2664_v62 = vsub.f32 1.5, %v2663_v3  ;;  %v3414_v3 = vld [vmem:[%s3736_s20 + $0x40] sm:$0xff] }
0x10ef   : > { %v3391_v47 = vpop.eup %3390  ;;  %v2583_v63 = vadd.f32 1e-05, %v2551_v41 }
0x10f0   : > { %v2671_v18 = vmul.f32 %v3391_v47, %v2582_v36  ;;  %v2407_v13 = vpop.xlane.xlu0 %2406  ;;  %v2494_v45 = vpop.xlane.xlu1 %2493  ;;  %v2776_v52 = vmul.f32 %v4792_v35, %v2756_v11  ;;  %v2665_v5 = vmul.f32 %v3389_v14, %v2664_v62  ;;  %vm2677_vm15 = vweird.f32 %v3391_v47 }
0x10f1   : > { %v4894_v29 = vmul.f32 %v4773_v24, %v2407_v13  ;;  %3392 = vrsqrt.f32 %v2583_v63  ;;  %v2520_v10 = vmul.f32 %v2494_v45, %v4773_v24  ;;  %vm2678_vm2 = vmor %vm2676_vm3, %vm2677_vm15  ;;  %vm2686_vm7 = vweird.f32 %v2583_v63 }
0x10f2   : > { %v2672_v30 = vmul.f32 %v3391_v47, %v2671_v18  ;;  %v2796_v28 = vadd.f32 %v4797_v9, %v2776_v52  ;;  %v2669_v40 = vsel %vm2668_vm14, %v3389_v14, %v2665_v5  ;;  %v2567_v11 = vsub.f32 %v4724_v0, %v4882_v57 }
0x10f3   : > { %v2536_v20 = vmul.f32 %v4894_v29, %v4894_v29  ;;  %v2757_v50 = vmul.f32 %v2669_v40, %v2565_v8 }
0x10f4   : > { %v2673_v53 = vmul.f32 0.5, %v2672_v30  ;;  %v2812_v22 = vadd.f32 %v3412_v21, %v2796_v28 }
0x10f5   : > { %v2552_v27 = vsub.f32 %v2520_v10, %v2536_v20  ;;  %v2777_v32 = vmul.f32 %v4792_v35, %v2757_v50  ;;  %v2568_v10 = vsub.f32 %v4732_v48, %v4894_v29 }
0x10f6   : > { %v2674_v58 = vsub.f32 1.5, %v2673_v53  ;;  %2828 = vst.msk [vmem:[%s4817_s19 + $0x30] sm:$0xff] %vm416_vm0, %v2812_v22  ;;  %v3415_v53 = vld [vmem:[%s3736_s20 + $0x48] sm:$0xff] }
0x10f7   : > { %v2584_v44 = vadd.f32 1e-05, %v2552_v27  ;;  %v3393_v23 = vpop.eup %3392  ;;  %v2797_v38 = vadd.f32 %v4797_v9, %v2777_v32 }
0x10f8   : > { %v2675_v33 = vmul.f32 %v3391_v47, %v2674_v58  ;;  %v2410_v55 = vpop.xlane.xlu1 %2409  ;;  %v2497_v49 = vpop.xlane.xlu2 %2496  ;;  %v2681_v15 = vmul.f32 %v3393_v23, %v2583_v63  ;;  %vm2687_vm6 = vweird.f32 %v3393_v23  ;;  %v4938_v58 = vmul.f32 %v4773_v24, %v4779_v43 }
0x10f9   : > { %3394 = vrsqrt.f32 %v2584_v44  ;;  %v2813_v14 = vadd.f32 %v3413_v34, %v2797_v38  ;;  %v4911_v2 = vmul.f32 %v4773_v24, %v2410_v55  ;;  %v2521_v17 = vmul.f32 %v2497_v49, %v4773_v24  ;;  %vm2688_vm1 = vmor %vm2686_vm7, %vm2687_vm6  ;;  %v3416_v34 = vld [vmem:[%s3736_s20 + $0x50] sm:$0xff] }
0x10fa   : > { %v2679_v46 = vsel %vm2678_vm2, %v3391_v47, %v2675_v33  ;;  %v2682_v26 = vmul.f32 %v3393_v23, %v2681_v15  ;;  %vm2696_vm5 = vweird.f32 %v2584_v44  ;;  %v2541_v49 = vmul.f32 %v4938_v58, %v4938_v58 }
0x10fb   : > { %v2758_v7 = vmul.f32 %v2679_v46, %v2566_v25  ;;  %2829 = vst.msk [vmem:[%s4817_s19 + $0x38] sm:$0xff] %vm416_vm0, %v2813_v14  ;;  %v2537_v36 = vmul.f32 %v4911_v2, %v4911_v2 }
0x10fc   : > { %v2683_v16 = vmul.f32 0.5, %v2682_v26  ;;  %v2569_v26 = vsub.f32 %v4740_v31, %v4911_v2 }
0x10fd   : > { %v2778_v51 = vmul.f32 %v4792_v35, %v2758_v7  ;;  %v2553_v4 = vsub.f32 %v2521_v17, %v2537_v36 }
0x10fe   : > { %v2684_v59 = vsub.f32 1.5, %v2683_v16 }
0x10ff   : > { %v3395_v56 = vpop.eup %3394  ;;  %v2798_v39 = vadd.f32 %v4797_v9, %v2778_v51  ;;  %v2585_v12 = vadd.f32 1e-05, %v2553_v4 }
0x1100   : > { %v2691_v6 = vmul.f32 %v3395_v56, %v2584_v44  ;;  %v2500_v1 = vpop.xlane.xlu0 %2499  ;;  %v2413_v37 = vpop.xlane.xlu2 %2412  ;;  %v2685_v41 = vmul.f32 %v3393_v23, %v2684_v59  ;;  %vm2697_vm4 = vweird.f32 %v3395_v56 }
0x1101   : > { %v2814_v19 = vadd.f32 %v3414_v3, %v2798_v39  ;;  %v4922_v47 = vmul.f32 %v4773_v24, %v2413_v37  ;;  %3396 = vrsqrt.f32 %v2585_v12  ;;  %v2522_v13 = vmul.f32 %v2500_v1, %v4773_v24  ;;  %vm2698_vm8 = vmor %vm2696_vm5, %vm2697_vm4 }
0x1102   : > { %v2692_v62 = vmul.f32 %v3395_v56, %v2691_v6  ;;  %v2689_v18 = vsel %vm2688_vm1, %v3393_v23, %v2685_v41  ;;  %vm2706_vm10 = vweird.f32 %v2585_v12 }
0x1103   : > { %2830 = vst.msk [vmem:[%s4817_s19 + $0x40] sm:$0xff] %vm416_vm0, %v2814_v19  ;;  %v2538_v45 = vmul.f32 %v4922_v47, %v4922_v47  ;;  %v2759_v52 = vmul.f32 %v2689_v18, %v2567_v11 }
0x1104   : > { %v2693_v63 = vmul.f32 0.5, %v2692_v62  ;;  %v2570_v62 = vsub.f32 %v4748_v61, %v4922_v47 }
0x1105   : > { %v2554_v5 = vsub.f32 %v2522_v13, %v2538_v45  ;;  %v2779_v8 = vmul.f32 %v4792_v35, %v2759_v52  ;;  %v3417_v13 = vld [vmem:[%s3736_s20 + $0x58] sm:$0xff] }
0x1106   : > { %v2694_v30 = vsub.f32 1.5, %v2693_v63 }
0x1107   : > { %v2586_v0 = vadd.f32 1e-05, %v2554_v5  ;;  %v3397_v57 = vpop.eup %3396  ;;  %v2799_v28 = vadd.f32 %v4797_v9, %v2779_v8 }
0x1108   : > { %v2695_v40 = vmul.f32 %v3395_v56, %v2694_v30  ;;  %v2416_v20 = vpop.xlane.xlu0 %2415  ;;  %v2701_v50 = vmul.f32 %v3397_v57, %v2585_v12  ;;  %vm2707_vm9 = vweird.f32 %v3397_v57 }
0x1109   : > { %3398 = vrsqrt.f32 %v2586_v0  ;;  %v2815_v21 = vadd.f32 %v3415_v53, %v2799_v28  ;;  %vm2708_vm11 = vmor %vm2706_vm10, %vm2707_vm9  ;;  %v4959_v4 = vmul.f32 %v4773_v24, %v2416_v20  ;;  %vm2716_vm13 = vweird.f32 %v2586_v0 }
0x110a   : > { %v2699_v22 = vsel %vm2698_vm8, %v3395_v56, %v2695_v40  ;;  %v2702_v32 = vmul.f32 %v3397_v57, %v2701_v50 }
0x110b   : > { %v2760_v27 = vmul.f32 %v2699_v22, %v2568_v10  ;;  %2831 = vst.msk [vmem:[%s4817_s19 + $0x48] sm:$0xff] %vm416_vm0, %v2815_v21  ;;  %v2539_v3 = vmul.f32 %v4959_v4, %v4959_v4 }
0x110c   : > { %v2703_v23 = vmul.f32 0.5, %v2702_v32 }
0x110d   : > { %v2780_v44 = vmul.f32 %v4792_v35, %v2760_v27 }
0x110e   : > { %v2419_v38 = vpop.xlane.xlu1 %2418  ;;  %v2704_v33 = vsub.f32 1.5, %v2703_v23  ;;  %v2573_v23 = vsub.f32 %v4660_v60, %v4938_v58  ;;  %v2571_v58 = vsub.f32 %v4756_v54, %v4959_v4  ;;  %v3420_v54 = vld [vmem:[%s3736_s20 + $0x70] sm:$0xff]  ;;  %v3421_v4 = vld [vmem:[%s3736_s20 + $0x68] sm:$0xff] }
0x110f   : > { %v3399_v48 = vpop.eup %3398  ;;  %v2800_v29 = vadd.f32 %v4797_v9, %v2780_v44  ;;  %v4945_v55 = vmul.f32 %v4773_v24, %v2419_v38 }
0x1110   : > { %v2711_v43 = vmul.f32 %v3399_v48, %v2586_v0  ;;  %v2509_v25 = vpop.xlane.xlu0 %2508  ;;  %v2506_v15 = vpop.xlane.xlu2 %2505  ;;  %v2705_v46 = vmul.f32 %v3397_v57, %v2704_v33  ;;  %vm2717_vm12 = vweird.f32 %v3399_v48 }
0x1111   : > { %v2816_v14 = vadd.f32 %v3416_v34, %v2800_v29  ;;  %v2540_v7 = vmul.f32 %v4945_v55, %v4945_v55  ;;  %v2525_v17 = vmul.f32 %v2509_v25, %v4773_v24  ;;  %v2524_v51 = vmul.f32 %v2506_v15, %v4773_v24  ;;  %vm2718_vm14 = vmor %vm2716_vm13, %vm2717_vm12 }
0x1112   : > { %v2712_v36 = vmul.f32 %v3399_v48, %v2711_v43  ;;  %v2709_v16 = vsel %vm2708_vm11, %v3397_v57, %v2705_v46  ;;  %v3418_v57 = vld [vmem:[%s3736_s20 + $0x60] sm:$0xff]  ;;  %v2572_v29 = vsub.f32 %v4761_v42, %v4945_v55 }
0x1113   : > { %2832 = vst.msk [vmem:[%s4817_s19 + $0x50] sm:$0xff] %vm416_vm0, %v2816_v14  ;;  %v2761_v56 = vmul.f32 %v2709_v16, %v2569_v26  ;;  %v2557_v59 = vsub.f32 %v2525_v17, %v2541_v49  ;;  %v2556_v6 = vsub.f32 %v2524_v51, %v2540_v7  ;;  %v3419_v26 = vld [vmem:[%s3736_s20 + $0x78] sm:$0xff] }
0x1114   : > { %v2713_v39 = vmul.f32 0.5, %v2712_v36 }
0x1115   : > { %v2781_v31 = vmul.f32 %v4792_v35, %v2761_v56  ;;  %v2589_v12 = vadd.f32 1e-05, %v2557_v59  ;;  %v2588_v1 = vadd.f32 1e-05, %v2556_v6 }
0x1116   : > { %v2714_v2 = vsub.f32 1.5, %v2713_v39  ;;  %v2503_v37 = vpop.xlane.xlu1 %2502 }
0x1117   : > { %v2523_v19 = vmul.f32 %v2503_v37, %v4773_v24  ;;  %v2801_v41 = vadd.f32 %v4797_v9, %v2781_v31  ;;  %3400 = vrsqrt.f32 %v2589_v12  ;;  %vm2746_vm2 = vweird.f32 %v2589_v12 }
0x1118   : > { %v2715_v11 = vmul.f32 %v3399_v48, %v2714_v2  ;;  %3402 = vrsqrt.f32 %v2588_v1  ;;  %vm2736_vm7 = vweird.f32 %v2588_v1 }
0x1119   : > { %v2555_v18 = vsub.f32 %v2523_v19, %v2539_v3  ;;  %v2817_v45 = vadd.f32 %v3417_v13, %v2801_v41 }
0x111a   : > { %v2719_v52 = vsel %vm2718_vm14, %v3399_v48, %v2715_v11 }
0x111b   : > { %v2762_v63 = vmul.f32 %v2719_v52, %v2570_v62  ;;  %v2587_v5 = vadd.f32 1e-05, %v2555_v18  ;;  %2833 = vst.msk [vmem:[%s4817_s19 + $0x58] sm:$0xff] %vm416_vm0, %v2817_v45 }
0x111d   : > { %v2782_v24 = vmul.f32 %v4792_v35, %v2762_v63  ;;  %3404 = vrsqrt.f32 %v2587_v5  ;;  %v3401_v8 = vpop.eup %3400  ;;  %vm2726_vm5 = vweird.f32 %v2587_v5 }
0x111e   : > { %v3403_v30 = vpop.eup %3402  ;;  %v2741_v61 = vmul.f32 %v3401_v8, %v2589_v12  ;;  %vm2747_vm15 = vweird.f32 %v3401_v8 }
0x111f   : > { %v2802_v0 = vadd.f32 %v4797_v9, %v2782_v24  ;;  %v2731_v47 = vmul.f32 %v3403_v30, %v2588_v1  ;;  %vm2737_vm3 = vweird.f32 %v3403_v30  ;;  %vm2748_vm6 = vmor %vm2746_vm2, %vm2747_vm15 }
0x1120   : > { %v2742_v40 = vmul.f32 %v3401_v8, %v2741_v61  ;;  %vm2738_vm1 = vmor %vm2736_vm7, %vm2737_vm3 }
0x1121   : > { %v2818_v28 = vadd.f32 %v3418_v57, %v2802_v0  ;;  %v2732_v20 = vmul.f32 %v3403_v30, %v2731_v47 }
0x1122   : > { %v2743_v50 = vmul.f32 0.5, %v2742_v40 }
0x1123   : > { %v3405_v10 = vpop.eup %3404  ;;  %2834 = vst.msk [vmem:[%s4817_s19 + $0x60] sm:$0xff] %vm416_vm0, %v2818_v28  ;;  %v2733_v53 = vmul.f32 0.5, %v2732_v20 }
0x1124   : > { %v2721_v21 = vmul.f32 %v3405_v10, %v2587_v5  ;;  %v2744_v22 = vsub.f32 1.5, %v2743_v50  ;;  %vm2727_vm4 = vweird.f32 %v3405_v10 }
0x1125   : > { %v2734_v27 = vsub.f32 1.5, %v2733_v53  ;;  %vm2728_vm8 = vmor %vm2726_vm5, %vm2727_vm4 }
0x1126   : > { %v2722_v32 = vmul.f32 %v3405_v10, %v2721_v21  ;;  %v2745_v44 = vmul.f32 %v3401_v8, %v2744_v22 }
0x1127   : > { %v2735_v38 = vmul.f32 %v3403_v30, %v2734_v27 }
0x1128   : > { %v2723_v48 = vmul.f32 0.5, %v2722_v32  ;;  %v2749_v33 = vsel %vm2748_vm6, %v3401_v8, %v2745_v44 }
0x1129   : > { %v2765_v49 = vmul.f32 %v2749_v33, %v2573_v23  ;;  %v2739_v43 = vsel %vm2738_vm1, %v3403_v30, %v2735_v38 }
0x112a   : > { %v2724_v25 = vsub.f32 1.5, %v2723_v48  ;;  %v2764_v15 = vmul.f32 %v2739_v43, %v2572_v29 }
0x112b   : > { %v2785_v34 = vmul.f32 %v4792_v35, %v2765_v49 }
0x112c   : > { %v2725_v60 = vmul.f32 %v3405_v10, %v2724_v25  ;;  %v2784_v42 = vmul.f32 %v4792_v35, %v2764_v15 }
0x112d   : > { %v2805_v55 = vadd.f32 %v4797_v9, %v2785_v34 }
0x112e   : > { %v2729_v14 = vsel %vm2728_vm8, %v3405_v10, %v2725_v60  ;;  %v2804_v46 = vadd.f32 %v4797_v9, %v2784_v42 }
0x112f   : > { %v2763_v7 = vmul.f32 %v2729_v14, %v2571_v58  ;;  %v2821_v36 = vadd.f32 %v3419_v26, %v2805_v55 }
0x1130   : > { %v2820_v17 = vadd.f32 %v3420_v54, %v2804_v46 }
0x1131   : > { %v2783_v51 = vmul.f32 %v4792_v35, %v2763_v7  ;;  %2837 = vst.msk [vmem:[%s4817_s19 + $0x78] sm:$0xff] %vm416_vm0, %v2821_v36 }
0x1132   : > { %2836 = vst.msk [vmem:[%s4817_s19 + $0x70] sm:$0xff] %vm416_vm0, %v2820_v17 }
0x1133   : > { %v2803_v16 = vadd.f32 %v4797_v9, %v2783_v51 }
0x1135   : > { %v2819_v56 = vadd.f32 %v3421_v4, %v2803_v16 }
0x1137   : > { %2835 = vst.msk [vmem:[%s4817_s19 + $0x68] sm:$0xff] %vm416_vm0, %v2819_v56 }
0x1138   : > { %3509 = shalt.err (!%p3506_p0)
}
0x1139   : > { %s3579_s15 = smov 128   ;;  %s3580_s20 = smov 8  }
0x113a   : > { %3100 = dma.vmem_to_hbm [thread:$0]  (%p3710_p5), %s2854_s25, 2048, %s2856_s27, %s2839_s18, %s3579_s15, %s3579_s15, %s3580_s20  }
0x113b PF: > { %s5120_s19 = sld [smem:[#allocation13_spill]]  ;;  %p3111_p3 = pnand %p2957_p11, %p3680_p6 }
0x113c   : > { %s5122_s16 = sld [smem:[#allocation14_spill]] }
0x113d   : > { %p3112_p7 = pneg %p3111_p3 }
0x1141   : > { %s2870_s21 = sand.u32 1, %s5120_s19  }
0x1142   : > { %s2871_s12 = scalar_lea.sflag [#allocation6], %s2870_s21 }
0x1143   : > { %3543 = dma.done.wait (%p3112_p7), %s2871_s12, 2048  }
0x1144   : > { %3545 = vsyncadd (%p3112_p7), %s2871_s12, 4294965248  ;;  %s26_s14 = sadd.s32 1, %s5122_s16   ;;  %s5123_s23 = sld [smem:[#allocation16_spill]] }
0x1145   : > { %p23_p9 = scmp.ge.s32.totalorder %s26_s14, 4   ;;  %s5124_s30 = smov %s3552_s10 }
0x1146   : > { %s5125_s10 = smov %s3556_s11  ;;  %s5126_s11 = smov %s3719_s26 }
0x1147   : > { %s5127_s12 = smov %s3564_s13  ;;  %25 = sbr.rel (!%p23_p9) target bundleno = 10 (0xa), region = 105 }
0x114a   : > { %s5128_s13 = smov %s5123_s23 }
0x114c   :  { %2877 = vsyncpa [#allocation5], 1 }
0x114d   :  { %2879 = vsyncpa [#allocation5 + $0x1], 1 }
0x114e   :  { %2880 = vsyncpa [#allocation8], 1 }
0x114f   :  { %2881 = vsyncpa [#allocation6], 1 }
0x1150   :  { %2883 = vsyncpa [#allocation6 + $0x1], 1 }

</bundles_post_ra>
